<compile_context>
chip_gen: v7x
topology: tpu7x:2x2x1
jax: 0.10.0
libtpu: 0.0.40
codegen_flags: <defaults>
</compile_context>

<pallas_src>
import jax
import jax.numpy as jnp
import numpy as np
from jax.experimental import pallas as pl
from jax.experimental.pallas import tpu as pltpu


# ----------------------------- JAX glue ------------------------------------

def adaptive_avg_pool2d(x, out_size):
    """PyTorch AdaptiveAvgPool2d semantics (floor/ceil window bounds)."""
    B, C, H, W = x.shape
    K = out_size
    rows = []
    for i in range(K):
        h0 = (i * H) // K
        h1 = -((-(i + 1) * H) // K)          # ceil((i+1)*H/K)
        cols = []
        for j in range(K):
            w0 = (j * W) // K
            w1 = -((-(j + 1) * W) // K)
            cols.append(jnp.mean(x[:, :, h0:h1, w0:w1], axis=(2, 3)))
        rows.append(jnp.stack(cols, axis=-1))
    return jnp.stack(rows, axis=-2)           # (B, C, K, K)


def proj_apply(y, p):
    """proj = ConvModule(1x1 conv, no bias -> BN2d (eval) -> GELU) -> 1x1 conv."""
    # TODO(synk): BN uses eval-mode running stats; training-mode batch
    # statistics are not modeled.
    z = jnp.einsum('bchw,oc->bohw', y, p['w1'])
    inv_std = 1.0 / jnp.sqrt(p['bn_var'] + 1e-5)
    z = (z - p['bn_mean'][None, :, None, None]) * inv_std[None, :, None, None]
    z = z * p['bn_gamma'][None, :, None, None] + p['bn_beta'][None, :, None, None]
    z = jax.nn.gelu(z, approximate=False)     # exact GELU, like nn.GELU default
    z = jnp.einsum('bchw,oc->bohw', z, p['w2']) + p['b2'][None, :, None, None]
    return z


# --------------------------- tiling helpers ---------------------------------

def _round_up(a, m):
    return ((a + m - 1) // m) * m


def _vmem_budget():
    """Generation-aware VMEM limit (v5e/v6e: 128 MiB physical, v7x: 64 MiB)."""
    try:
        phys = int(pltpu.get_tpu_info().vmem_capacity_bytes)
    except Exception:
        phys = 64 * 1024 * 1024                         # conservative fallback
    limit = max(16 * 1024 * 1024, min(phys * 7 // 16, 64 * 1024 * 1024))
    return int(limit), int((limit * 7) // 10)           # (vmem_limit, planning budget)


def _pick_block_sizes(H, W, K, G, C, io_itemsize, budget):
    """Pick lane tile TBC (multiple of 128, divides Cp), H tile TH, chunk CH."""
    pad = K // 2
    Hp, Wp = H + 2 * pad, W + 2 * pad
    Cp = _round_up(C, 128)
    KK = K * K

    def per_lane(th):
        return (2 * Hp * Wp * io_itemsize          # input slab, double buffered
                + (K - 1) * Hp * W * 4             # shifted f32 slabs (scratch)
                + Hp * W * 4                       # headroom for copy temporaries
                + 2 * th * W * io_itemsize         # output block, double buffered
                + 2 * (2 * G * KK + 2 * G) * 4     # scale / base blocks
                + (KK + 1) * 4)                    # dynamic weight / bias scratch

    # lane tile: largest multiple of 128 dividing Cp (capped at 512) that fits
    tbc = 128
    for m in range(1, Cp // 128 + 1):
        cand = 128 * m
        if (Cp // 128) % m == 0 and cand <= 512 and cand * per_lane(min(H, 8)) <= budget:
            tbc = cand
    # H tile: largest divisor of H that fits (input slab is resident across h)
    th = None
    for cand in range(H, 0, -1):
        if H % cand == 0 and tbc * per_lane(cand) <= budget:
            th = cand
            break
    assert th is not None, (
        "DynamicConv2d Pallas kernel: padded input slab does not fit the VMEM "
        "budget even at TBC=128 -- this spatial extent needs halo'd H tiling.")
    # register chunk: acc vregs = CH * ceil(W/8) * (TBC/128) <= 16 and CH | TH
    wregs = (-(-W // 8)) * (tbc // 128)
    ch = 1
    for cand in range(1, min(th, 8) + 1):
        if th % cand == 0 and cand * wregs <= 16:
            ch = cand
    return tbc, th, ch, Cp


# --------------------------- Pallas kernel ----------------------------------

def _dyn_conv_kernel(W, K, G, TH, TBC, CH, nh):
    KK = K * K
    nchunks = TH // CH

    def kernel(x_ref, sw_ref, wb_ref, sb_ref, bb_ref, o_ref,
               dynw_ref, dynb_ref, *xsh_refs):
        # x_ref   : (Hp, Wp, TBC)  padded activations, resident across h tiles
        # sw_ref  : (G, KK, TBC)   proj weight scales
        # wb_ref  : (G, KK, TBC)   base kernels (per channel)
        # sb_ref  : (G, 1, TBC)    proj bias scales
        # bb_ref  : (G, 1, TBC)    base biases (per channel)
        # o_ref   : (TH, W, TBC)
        # dynw_ref: (KK, TBC) f32  fused dynamic kernel       (scratch)
        # dynb_ref: (1, TBC)  f32  fused dynamic bias         (scratch)
        # xsh_refs: (K-1) x (Hp, W, TBC) f32 shifted slabs    (scratch)
        Hp = x_ref.shape[0]

        def init():
            # ---- group softmax + weighted sum of base kernels (once/tile) ----
            sw = sw_ref[...]
            wb = wb_ref[...]
            m = sw[0]
            for g in range(1, G):
                m = jnp.maximum(m, sw[g])
            den = jnp.zeros_like(m)
            num = jnp.zeros_like(m)
            for g in range(G):
                e = jnp.exp(sw[g] - m)
                den = den + e
                num = num + e * wb[g]
            dynw_ref[...] = num / den             # exact divide (runs once/tile)

            sb = sb_ref[...]
            bb = bb_ref[...]
            mb = sb[0]
            for g in range(1, G):
                mb = jnp.maximum(mb, sb[g])
            denb = jnp.zeros_like(mb)
            numb = jnp.zeros_like(mb)
            for g in range(G):
                e = jnp.exp(sb[g] - mb)
                denb = denb + e
                numb = numb + e * bb[g]
            dynb_ref[...] = numb / denb

            # ---- W-shifted, sublane-aligned f32 copies of the padded slab ----
            # Built once per BC tile; every kx>0 tap below is then an aligned
            # slice (no per-tap (8,128) realignment).  Copied in 8-row pieces
            # to bound live ranges.  For bf16 I/O the up-cast happens here,
            # once per element (kx=0 taps still cast at load, 1/K of taps).
            for kx in range(1, K):
                dst = xsh_refs[kx - 1]
                for r0 in range(0, Hp, 8):
                    nr = min(8, Hp - r0)
                    dst[r0:r0 + nr, :, :] = (
                        x_ref[r0:r0 + nr, kx:kx + W, :].astype(jnp.float32))

        if nh > 1:
            h = pl.program_id(1)
            pl.when(h == 0)(init)
            row_base = h * TH
        else:
            init()                                # every step is a new BC tile
            row_base = 0

        dynw = dynw_ref[...]                      # (KK, TBC)
        dynb = dynb_ref[...]                      # (1, TBC)

        # ---- depthwise KxK conv: register-resident row chunks --------------
        for c in range(nchunks):
            r0 = c * CH                           # output-row offset in block
            acc = None
            for ky in range(K):
                rin = row_base + r0 + ky          # padded-input row of this tap
                for kx in range(K):
                    rr = ky * K + kx
                    wrow = dynw[rr:rr + 1, :]     # (1, TBC)
                    if kx == 0:
                        tap = x_ref[pl.ds(rin, CH), 0:W, :].astype(jnp.float32)
                    else:
                        tap = xsh_refs[kx - 1][pl.ds(rin, CH), :, :]
                    t = tap * wrow
                    acc = t if acc is None else acc + t
            o_ref[r0:r0 + CH, :, :] = (acc + dynb).astype(o_ref.dtype)

    return kernel


def dynamic_conv2d_forward(x, params, K=3, G=2, rr=4, io_dtype=jnp.float32):
    """Forward of transxnet DynamicConv2d.  io_dtype=bfloat16 is an opt-in that
    halves HBM traffic for the activations (accumulation stays f32)."""
    del rr  # hidden width is implied by params['w1']
    B, C, H, W = x.shape
    pad = K // 2
    Hp, Wp = H + 2 * pad, W + 2 * pad
    io_itemsize = np.dtype(io_dtype).itemsize
    KK = K * K

    vmem_limit, budget = _vmem_budget()
    TBC, TH, CH, Cp = _pick_block_sizes(H, W, K, G, C, io_itemsize, budget)
    ncb = Cp // TBC                               # channel blocks per batch
    BCp = B * Cp
    nbc = B * ncb
    nh = H // TH

    # ---- dynamic scale branch (tiny; plain JAX glue) ----
    pooled = adaptive_avg_pool2d(x, K)                            # (B, C, K, K)
    sw = proj_apply(pooled, params).reshape(B, G, C, K, K)        # weight scales
    sw = jnp.transpose(sw, (1, 3, 4, 0, 2)).reshape(G, KK, B, C)
    sw = jnp.pad(sw, ((0, 0), (0, 0), (0, 0), (0, Cp - C))).reshape(G, KK, BCp)

    gm = jnp.mean(x, axis=(2, 3), keepdims=True)                  # (B, C, 1, 1)
    sb = proj_apply(gm, params).reshape(B, G, C)                  # bias scales
    sb = jnp.transpose(sb, (1, 0, 2))                             # (G, B, C)
    sb = jnp.pad(sb, ((0, 0), (0, 0), (0, Cp - C))).reshape(G, 1, BCp)

    # ---- per-channel base kernels / biases (no batch broadcast in HBM) ----
    wb = jnp.transpose(params['weight'], (0, 2, 3, 1)).reshape(G, KK, C)
    wb = jnp.pad(wb, ((0, 0), (0, 0), (0, Cp - C)))               # (G, KK, Cp)
    bb = jnp.pad(params['bias'], ((0, 0), (0, Cp - C)))[:, None, :]  # (G, 1, Cp)

    # ---- activations: (nbc, Hp, Wp, TBC) so each block DMA is contiguous ----
    x_p = jnp.pad(x, ((0, 0), (0, Cp - C), (0, 0), (0, 0)))       # (B, Cp, H, W)
    x_cl = jnp.transpose(x_p.reshape(B, ncb, TBC, H, W), (0, 1, 3, 4, 2))
    x_cl = jnp.pad(x_cl, ((0, 0), (0, 0), (pad, pad), (pad, pad), (0, 0)))
    x_cl = x_cl.reshape(nbc, Hp, Wp, TBC).astype(io_dtype)

    out = pl.pallas_call(
        _dyn_conv_kernel(W, K, G, TH, TBC, CH, nh),
        out_shape=jax.ShapeDtypeStruct((nbc, H, W, TBC), io_dtype),
        grid=(nbc, nh),
        in_specs=[
            # padded slab: full spatial, one BC tile of lanes; index ignores h
            # so the block stays resident across the H-tile axis
            pl.BlockSpec((None, Hp, Wp, TBC), lambda j, h: (j, 0, 0, 0)),
            pl.BlockSpec((G, KK, TBC), lambda j, h: (0, 0, j)),          # sw
            pl.BlockSpec((G, KK, TBC), lambda j, h: (0, 0, j % ncb)),    # weight
            pl.BlockSpec((G, 1, TBC), lambda j, h: (0, 0, j)),           # sb
            pl.BlockSpec((G, 1, TBC), lambda j, h: (0, 0, j % ncb)),     # bias
        ],
        out_specs=pl.BlockSpec((None, TH, W, TBC), lambda j, h: (j, h, 0, 0)),
        scratch_shapes=(
            [pltpu.VMEM((KK, TBC), jnp.float32),       # fused dynamic kernel
             pltpu.VMEM((1, TBC), jnp.float32)]        # fused dynamic bias
            + [pltpu.VMEM((Hp, W, TBC), jnp.float32)] * (K - 1)  # shifted slabs
        ),
        compiler_params=pltpu.CompilerParams(
            # TODO(synk): on v7x, if xprof shows one TensorCore idle, switch the
            # BC axis to pltpu.CORE_PARALLEL (nbc is >= 2 and even for B >= 2).
            dimension_semantics=("parallel", "arbitrary"),
            vmem_limit_bytes=int(vmem_limit),
        ),
    )(x_cl, sw, wb, sb, bb)

    out = out.reshape(B, ncb, H, W, TBC)
    out = jnp.transpose(out, (0, 1, 4, 2, 3)).reshape(B, Cp, H, W)[:, :C]
    return out.astype(x.dtype)                                    # back to NCHW


# --------------------------- pure-JAX reference ------------------------------

def reference_forward(x, params, K=3, G=2):
    B, C, H, W = x.shape
    p = K // 2
    pooled = adaptive_avg_pool2d(x, K)
    scale = proj_apply(pooled, params).reshape(B, G, C, K, K)
    scale = jax.nn.softmax(scale, axis=1)
    weight = jnp.sum(scale * params['weight'][None], axis=1)        # (B, C, K, K)
    scale_b = proj_apply(jnp.mean(x, axis=(2, 3), keepdims=True), params)
    scale_b = jax.nn.softmax(scale_b.reshape(B, G, C), axis=1)
    bias = jnp.sum(scale_b * params['bias'][None], axis=1)          # (B, C)
    xp = jnp.pad(x, ((0, 0), (0, 0), (p, p), (p, p)))
    out = jnp.zeros_like(x)
    for ky in range(K):
        for kx in range(K):
            out = out + xp[:, :, ky:ky + H, kx:kx + W] * weight[:, :, ky:ky + 1, kx:kx + 1]
    return out + bias[:, :, None, None]


# --------------------------- parameter init ---------------------------------

def init_params(key, dim, K, G, rr):
    hidden = dim // rr
    ks = jax.random.split(key, 5)
    return {
        'weight':   0.02 * jax.random.normal(ks[0], (G, dim, K, K), jnp.float32),
        'bias':     0.02 * jax.random.normal(ks[1], (G, dim), jnp.float32),
        'w1':       0.10 * jax.random.normal(ks[2], (hidden, dim), jnp.float32),
        'bn_gamma': jnp.ones((hidden,), jnp.float32),
        'bn_beta':  jnp.zeros((hidden,), jnp.float32),
        'bn_mean':  jnp.zeros((hidden,), jnp.float32),
        'bn_var':   jnp.ones((hidden,), jnp.float32),
        'w2':       0.10 * jax.random.normal(ks[3], (G * dim, hidden), jnp.float32),
        'b2':       0.02 * jax.random.normal(ks[4], (G * dim,), jnp.float32),
    }


if __name__ == "__main__":
    # lane-dense demo: B*C = 256 -> 2 BC tiles of 128 lanes, TH = H (nh = 1)
    B, C, H, W = 2, 128, 32, 32
    K, G, rr = 3, 2, 4

    key = jax.random.PRNGKey(0)
    kx_, kp_ = jax.random.split(key)
    x = jax.random.normal(kx_, (B, C, H, W), jnp.float32)
    params = init_params(kp_, C, K, G, rr)

    fwd = jax.jit(lambda xx: dynamic_conv2d_forward(xx, params, K=K, G=G, rr=rr))
    y = fwd(x)
    jax.block_until_ready(y)
    assert y.shape == (B, C, H, W) and y.dtype == jnp.float32

    y_ref = reference_forward(x, params, K=K, G=G)
    np.testing.assert_allclose(np.asarray(y), np.asarray(y_ref), rtol=1e-4, atol=1e-5)
    print("KERNEL_OK")
</pallas_src>

<mosaic_0001>
module attributes {stable_mosaic.version = 11 : i64} {
  func.func @kernel(%arg0: i32, %arg1: i32, %arg2: memref<1x34x34x128xf32, #tpu.memory_space<vmem>>, %arg3: memref<2x9x128xf32, #tpu.memory_space<vmem>>, %arg4: memref<2x9x128xf32, #tpu.memory_space<vmem>>, %arg5: memref<2x1x128xf32, #tpu.memory_space<vmem>>, %arg6: memref<2x1x128xf32, #tpu.memory_space<vmem>>, %arg7: memref<1x32x32x128xf32, #tpu.memory_space<vmem>>, %arg8: memref<9x128xf32, #tpu.memory_space<vmem>>, %arg9: memref<1x128xf32, #tpu.memory_space<vmem>>, %arg10: memref<34x32x128xf32, #tpu.memory_space<vmem>>, %arg11: memref<34x32x128xf32, #tpu.memory_space<vmem>>) attributes {dimension_semantics = [#tpu.dimension_semantics<parallel>, #tpu.dimension_semantics<arbitrary>], iteration_bounds = array<i64: 2, 1>, scalar_prefetch = 0 : i64, scratch_operands = 4 : i64, tpu.core_type = #tpu.core_type<tc>, window_params = [{transform_indices = @transform_0, window_bounds = array<i64: 1, 34, 34, 128>}, {transform_indices = @transform_1, window_bounds = array<i64: 2, 9, 128>}, {transform_indices = @transform_2, window_bounds = array<i64: 2, 9, 128>}, {transform_indices = @transform_3, window_bounds = array<i64: 2, 1, 128>}, {transform_indices = @transform_4, window_bounds = array<i64: 2, 1, 128>}, {transform_indices = @transform_5, window_bounds = array<i64: 1, 32, 32, 128>}]} {
    %c0 = arith.constant 0 : index
    %c0_0 = arith.constant 0 : index
    %c0_1 = arith.constant 0 : index
    %0 = vector.load %arg3[%c0, %c0_0, %c0_1] : memref<2x9x128xf32, #tpu.memory_space<vmem>>, vector<2x9x128xf32>
    %c0_2 = arith.constant 0 : index
    %c0_3 = arith.constant 0 : index
    %c0_4 = arith.constant 0 : index
    %1 = vector.load %arg4[%c0_2, %c0_3, %c0_4] : memref<2x9x128xf32, #tpu.memory_space<vmem>>, vector<2x9x128xf32>
    %2 = vector.extract_strided_slice %0 {offsets = [0, 0, 0], sizes = [1, 9, 128], strides = [1, 1, 1]} : vector<2x9x128xf32> to vector<1x9x128xf32>
    %3 = vector.shape_cast %2 : vector<1x9x128xf32> to vector<9x128xf32>
    %4 = vector.extract_strided_slice %0 {offsets = [1, 0, 0], sizes = [1, 9, 128], strides = [1, 1, 1]} : vector<2x9x128xf32> to vector<1x9x128xf32>
    %5 = vector.shape_cast %4 : vector<1x9x128xf32> to vector<9x128xf32>
    %6 = arith.maximumf %3, %5 : vector<9x128xf32>
    %cst = arith.constant 0.000000e+00 : f32
    %7 = vector.broadcast %cst : f32 to vector<9x128xf32>
    %cst_5 = arith.constant 0.000000e+00 : f32
    %8 = vector.broadcast %cst_5 : f32 to vector<9x128xf32>
    %9 = vector.extract_strided_slice %0 {offsets = [0, 0, 0], sizes = [1, 9, 128], strides = [1, 1, 1]} : vector<2x9x128xf32> to vector<1x9x128xf32>
    %10 = vector.shape_cast %9 : vector<1x9x128xf32> to vector<9x128xf32>
    %11 = arith.subf %10, %6 : vector<9x128xf32>
    %12 = math.exp %11 : vector<9x128xf32>
    %13 = arith.addf %7, %12 : vector<9x128xf32>
    %14 = vector.extract_strided_slice %1 {offsets = [0, 0, 0], sizes = [1, 9, 128], strides = [1, 1, 1]} : vector<2x9x128xf32> to vector<1x9x128xf32>
    %15 = vector.shape_cast %14 : vector<1x9x128xf32> to vector<9x128xf32>
    %16 = arith.mulf %12, %15 : vector<9x128xf32>
    %17 = arith.addf %8, %16 : vector<9x128xf32>
    %18 = vector.extract_strided_slice %0 {offsets = [1, 0, 0], sizes = [1, 9, 128], strides = [1, 1, 1]} : vector<2x9x128xf32> to vector<1x9x128xf32>
    %19 = vector.shape_cast %18 : vector<1x9x128xf32> to vector<9x128xf32>
    %20 = arith.subf %19, %6 : vector<9x128xf32>
    %21 = math.exp %20 : vector<9x128xf32>
    %22 = arith.addf %13, %21 : vector<9x128xf32>
    %23 = vector.extract_strided_slice %1 {offsets = [1, 0, 0], sizes = [1, 9, 128], strides = [1, 1, 1]} : vector<2x9x128xf32> to vector<1x9x128xf32>
    %24 = vector.shape_cast %23 : vector<1x9x128xf32> to vector<9x128xf32>
    %25 = arith.mulf %21, %24 : vector<9x128xf32>
    %26 = arith.addf %17, %25 : vector<9x128xf32>
    %27 = arith.divf %26, %22 : vector<9x128xf32>
    %c0_6 = arith.constant 0 : index
    %c0_7 = arith.constant 0 : index
    %28 = vector.load %arg8[%c0_6, %c0_7] : memref<9x128xf32, #tpu.memory_space<vmem>>, vector<9x128xf32>
    tpu.vector_store %arg8[%c0_6, %c0_7], %27 {strides = array<i32>} : memref<9x128xf32, #tpu.memory_space<vmem>>, vector<9x128xf32>,
    %c0_8 = arith.constant 0 : index
    %c0_9 = arith.constant 0 : index
    %c0_10 = arith.constant 0 : index
    %29 = vector.load %arg5[%c0_8, %c0_9, %c0_10] : memref<2x1x128xf32, #tpu.memory_space<vmem>>, vector<2x1x128xf32>
    %c0_11 = arith.constant 0 : index
    %c0_12 = arith.constant 0 : index
    %c0_13 = arith.constant 0 : index
    %30 = vector.load %arg6[%c0_11, %c0_12, %c0_13] : memref<2x1x128xf32, #tpu.memory_space<vmem>>, vector<2x1x128xf32>
    %31 = vector.extract_strided_slice %29 {offsets = [0, 0, 0], sizes = [1, 1, 128], strides = [1, 1, 1]} : vector<2x1x128xf32> to vector<1x1x128xf32>
    %32 = vector.shape_cast %31 : vector<1x1x128xf32> to vector<1x128xf32>
    %33 = vector.extract_strided_slice %29 {offsets = [1, 0, 0], sizes = [1, 1, 128], strides = [1, 1, 1]} : vector<2x1x128xf32> to vector<1x1x128xf32>
    %34 = vector.shape_cast %33 : vector<1x1x128xf32> to vector<1x128xf32>
    %35 = arith.maximumf %32, %34 : vector<1x128xf32>
    %cst_14 = arith.constant 0.000000e+00 : f32
    %36 = vector.broadcast %cst_14 : f32 to vector<1x128xf32>
    %cst_15 = arith.constant 0.000000e+00 : f32
    %37 = vector.broadcast %cst_15 : f32 to vector<1x128xf32>
    %38 = vector.extract_strided_slice %29 {offsets = [0, 0, 0], sizes = [1, 1, 128], strides = [1, 1, 1]} : vector<2x1x128xf32> to vector<1x1x128xf32>
    %39 = vector.shape_cast %38 : vector<1x1x128xf32> to vector<1x128xf32>
    %40 = arith.subf %39, %35 : vector<1x128xf32>
    %41 = math.exp %40 : vector<1x128xf32>
    %42 = arith.addf %36, %41 : vector<1x128xf32>
    %43 = vector.extract_strided_slice %30 {offsets = [0, 0, 0], sizes = [1, 1, 128], strides = [1, 1, 1]} : vector<2x1x128xf32> to vector<1x1x128xf32>
    %44 = vector.shape_cast %43 : vector<1x1x128xf32> to vector<1x128xf32>
    %45 = arith.mulf %41, %44 : vector<1x128xf32>
    %46 = arith.addf %37, %45 : vector<1x128xf32>
    %47 = vector.extract_strided_slice %29 {offsets = [1, 0, 0], sizes = [1, 1, 128], strides = [1, 1, 1]} : vector<2x1x128xf32> to vector<1x1x128xf32>
    %48 = vector.shape_cast %47 : vector<1x1x128xf32> to vector<1x128xf32>
    %49 = arith.subf %48, %35 : vector<1x128xf32>
    %50 = math.exp %49 : vector<1x128xf32>
    %51 = arith.addf %42, %50 : vector<1x128xf32>
    %52 = vector.extract_strided_slice %30 {offsets = [1, 0, 0], sizes = [1, 1, 128], strides = [1, 1, 1]} : vector<2x1x128xf32> to vector<1x1x128xf32>
    %53 = vector.shape_cast %52 : vector<1x1x128xf32> to vector<1x128xf32>
    %54 = arith.mulf %50, %53 : vector<1x128xf32>
    %55 = arith.addf %46, %54 : vector<1x128xf32>
    %56 = arith.divf %55, %51 : vector<1x128xf32>
    %c0_16 = arith.constant 0 : index
    %c0_17 = arith.constant 0 : index
    %57 = vector.load %arg9[%c0_16, %c0_17] : memref<1x128xf32, #tpu.memory_space<vmem>>, vector<1x128xf32>
    tpu.vector_store %arg9[%c0_16, %c0_17], %56 {strides = array<i32>} : memref<1x128xf32, #tpu.memory_space<vmem>>, vector<1x128xf32>,
    %c0_18 = arith.constant 0 : index
    %c0_19 = arith.constant 0 : index
    %c1 = arith.constant 1 : index
    %c0_20 = arith.constant 0 : index
    %58 = vector.load %arg2[%c0_18, %c0_19, %c1, %c0_20] : memref<1x34x34x128xf32, #tpu.memory_space<vmem>>, vector<1x8x32x128xf32>
    %59 = vector.shape_cast %58 : vector<1x8x32x128xf32> to vector<8x32x128xf32>
    %c0_21 = arith.constant 0 : index
    %c0_22 = arith.constant 0 : index
    %c0_23 = arith.constant 0 : index
    %60 = vector.load %arg10[%c0_21, %c0_22, %c0_23] : memref<34x32x128xf32, #tpu.memory_space<vmem>>, vector<8x32x128xf32>
    tpu.vector_store %arg10[%c0_21, %c0_22, %c0_23], %59 {strides = array<i32>} : memref<34x32x128xf32, #tpu.memory_space<vmem>>, vector<8x32x128xf32>,
    %c0_24 = arith.constant 0 : index
    %c8 = arith.constant 8 : index
    %c1_25 = arith.constant 1 : index
    %c0_26 = arith.constant 0 : index
    %61 = vector.load %arg2[%c0_24, %c8, %c1_25, %c0_26] : memref<1x34x34x128xf32, #tpu.memory_space<vmem>>, vector<1x8x32x128xf32>
    %62 = vector.shape_cast %61 : vector<1x8x32x128xf32> to vector<8x32x128xf32>
    %c8_27 = arith.constant 8 : index
    %c0_28 = arith.constant 0 : index
    %c0_29 = arith.constant 0 : index
    %63 = vector.load %arg10[%c8_27, %c0_28, %c0_29] : memref<34x32x128xf32, #tpu.memory_space<vmem>>, vector<8x32x128xf32>
    tpu.vector_store %arg10[%c8_27, %c0_28, %c0_29], %62 {strides = array<i32>} : memref<34x32x128xf32, #tpu.memory_space<vmem>>, vector<8x32x128xf32>,
    %c0_30 = arith.constant 0 : index
    %c16 = arith.constant 16 : index
    %c1_31 = arith.constant 1 : index
    %c0_32 = arith.constant 0 : index
    %64 = vector.load %arg2[%c0_30, %c16, %c1_31, %c0_32] : memref<1x34x34x128xf32, #tpu.memory_space<vmem>>, vector<1x8x32x128xf32>
    %65 = vector.shape_cast %64 : vector<1x8x32x128xf32> to vector<8x32x128xf32>
    %c16_33 = arith.constant 16 : index
    %c0_34 = arith.constant 0 : index
    %c0_35 = arith.constant 0 : index
    %66 = vector.load %arg10[%c16_33, %c0_34, %c0_35] : memref<34x32x128xf32, #tpu.memory_space<vmem>>, vector<8x32x128xf32>
    tpu.vector_store %arg10[%c16_33, %c0_34, %c0_35], %65 {strides = array<i32>} : memref<34x32x128xf32, #tpu.memory_space<vmem>>, vector<8x32x128xf32>,
    %c0_36 = arith.constant 0 : index
    %c24 = arith.constant 24 : index
    %c1_37 = arith.constant 1 : index
    %c0_38 = arith.constant 0 : index
    %67 = vector.load %arg2[%c0_36, %c24, %c1_37, %c0_38] : memref<1x34x34x128xf32, #tpu.memory_space<vmem>>, vector<1x8x32x128xf32>
    %68 = vector.shape_cast %67 : vector<1x8x32x128xf32> to vector<8x32x128xf32>
    %c24_39 = arith.constant 24 : index
    %c0_40 = arith.constant 0 : index
    %c0_41 = arith.constant 0 : index
    %69 = vector.load %arg10[%c24_39, %c0_40, %c0_41] : memref<34x32x128xf32, #tpu.memory_space<vmem>>, vector<8x32x128xf32>
    tpu.vector_store %arg10[%c24_39, %c0_40, %c0_41], %68 {strides = array<i32>} : memref<34x32x128xf32, #tpu.memory_space<vmem>>, vector<8x32x128xf32>,
    %c0_42 = arith.constant 0 : index
    %c32 = arith.constant 32 : index
    %c1_43 = arith.constant 1 : index
    %c0_44 = arith.constant 0 : index
    %70 = vector.load %arg2[%c0_42, %c32, %c1_43, %c0_44] : memref<1x34x34x128xf32, #tpu.memory_space<vmem>>, vector<1x2x32x128xf32>
    %71 = vector.shape_cast %70 : vector<1x2x32x128xf32> to vector<2x32x128xf32>
    %c32_45 = arith.constant 32 : index
    %c0_46 = arith.constant 0 : index
    %c0_47 = arith.constant 0 : index
    %72 = vector.load %arg10[%c32_45, %c0_46, %c0_47] : memref<34x32x128xf32, #tpu.memory_space<vmem>>, vector<2x32x128xf32>
    tpu.vector_store %arg10[%c32_45, %c0_46, %c0_47], %71 {strides = array<i32>} : memref<34x32x128xf32, #tpu.memory_space<vmem>>, vector<2x32x128xf32>,
    %c0_48 = arith.constant 0 : index
    %c0_49 = arith.constant 0 : index
    %c2 = arith.constant 2 : index
    %c0_50 = arith.constant 0 : index
    %73 = vector.load %arg2[%c0_48, %c0_49, %c2, %c0_50] : memref<1x34x34x128xf32, #tpu.memory_space<vmem>>, vector<1x8x32x128xf32>
    %74 = vector.shape_cast %73 : vector<1x8x32x128xf32> to vector<8x32x128xf32>
    %c0_51 = arith.constant 0 : index
    %c0_52 = arith.constant 0 : index
    %c0_53 = arith.constant 0 : index
    %75 = vector.load %arg11[%c0_51, %c0_52, %c0_53] : memref<34x32x128xf32, #tpu.memory_space<vmem>>, vector<8x32x128xf32>
    tpu.vector_store %arg11[%c0_51, %c0_52, %c0_53], %74 {strides = array<i32>} : memref<34x32x128xf32, #tpu.memory_space<vmem>>, vector<8x32x128xf32>,
    %c0_54 = arith.constant 0 : index
    %c8_55 = arith.constant 8 : index
    %c2_56 = arith.constant 2 : index
    %c0_57 = arith.constant 0 : index
    %76 = vector.load %arg2[%c0_54, %c8_55, %c2_56, %c0_57] : memref<1x34x34x128xf32, #tpu.memory_space<vmem>>, vector<1x8x32x128xf32>
    %77 = vector.shape_cast %76 : vector<1x8x32x128xf32> to vector<8x32x128xf32>
    %c8_58 = arith.constant 8 : index
    %c0_59 = arith.constant 0 : index
    %c0_60 = arith.constant 0 : index
    %78 = vector.load %arg11[%c8_58, %c0_59, %c0_60] : memref<34x32x128xf32, #tpu.memory_space<vmem>>, vector<8x32x128xf32>
    tpu.vector_store %arg11[%c8_58, %c0_59, %c0_60], %77 {strides = array<i32>} : memref<34x32x128xf32, #tpu.memory_space<vmem>>, vector<8x32x128xf32>,
    %c0_61 = arith.constant 0 : index
    %c16_62 = arith.constant 16 : index
    %c2_63 = arith.constant 2 : index
    %c0_64 = arith.constant 0 : index
    %79 = vector.load %arg2[%c0_61, %c16_62, %c2_63, %c0_64] : memref<1x34x34x128xf32, #tpu.memory_space<vmem>>, vector<1x8x32x128xf32>
    %80 = vector.shape_cast %79 : vector<1x8x32x128xf32> to vector<8x32x128xf32>
    %c16_65 = arith.constant 16 : index
    %c0_66 = arith.constant 0 : index
    %c0_67 = arith.constant 0 : index
    %81 = vector.load %arg11[%c16_65, %c0_66, %c0_67] : memref<34x32x128xf32, #tpu.memory_space<vmem>>, vector<8x32x128xf32>
    tpu.vector_store %arg11[%c16_65, %c0_66, %c0_67], %80 {strides = array<i32>} : memref<34x32x128xf32, #tpu.memory_space<vmem>>, vector<8x32x128xf32>,
    %c0_68 = arith.constant 0 : index
    %c24_69 = arith.constant 24 : index
    %c2_70 = arith.constant 2 : index
    %c0_71 = arith.constant 0 : index
    %82 = vector.load %arg2[%c0_68, %c24_69, %c2_70, %c0_71] : memref<1x34x34x128xf32, #tpu.memory_space<vmem>>, vector<1x8x32x128xf32>
    %83 = vector.shape_cast %82 : vector<1x8x32x128xf32> to vector<8x32x128xf32>
    %c24_72 = arith.constant 24 : index
    %c0_73 = arith.constant 0 : index
    %c0_74 = arith.constant 0 : index
    %84 = vector.load %arg11[%c24_72, %c0_73, %c0_74] : memref<34x32x128xf32, #tpu.memory_space<vmem>>, vector<8x32x128xf32>
    tpu.vector_store %arg11[%c24_72, %c0_73, %c0_74], %83 {strides = array<i32>} : memref<34x32x128xf32, #tpu.memory_space<vmem>>, vector<8x32x128xf32>,
    %c0_75 = arith.constant 0 : index
    %c32_76 = arith.constant 32 : index
    %c2_77 = arith.constant 2 : index
    %c0_78 = arith.constant 0 : index
    %85 = vector.load %arg2[%c0_75, %c32_76, %c2_77, %c0_78] : memref<1x34x34x128xf32, #tpu.memory_space<vmem>>, vector<1x2x32x128xf32>
    %86 = vector.shape_cast %85 : vector<1x2x32x128xf32> to vector<2x32x128xf32>
    %c32_79 = arith.constant 32 : index
    %c0_80 = arith.constant 0 : index
    %c0_81 = arith.constant 0 : index
    %87 = vector.load %arg11[%c32_79, %c0_80, %c0_81] : memref<34x32x128xf32, #tpu.memory_space<vmem>>, vector<2x32x128xf32>
    tpu.vector_store %arg11[%c32_79, %c0_80, %c0_81], %86 {strides = array<i32>} : memref<34x32x128xf32, #tpu.memory_space<vmem>>, vector<2x32x128xf32>,
    %c0_82 = arith.constant 0 : index
    %c0_83 = arith.constant 0 : index
    %88 = vector.load %arg8[%c0_82, %c0_83] : memref<9x128xf32, #tpu.memory_space<vmem>>, vector<9x128xf32>
    %c0_84 = arith.constant 0 : index
    %c0_85 = arith.constant 0 : index
    %89 = vector.load %arg9[%c0_84, %c0_85] : memref<1x128xf32, #tpu.memory_space<vmem>>, vector<1x128xf32>
    %90 = vector.extract_strided_slice %88 {offsets = [0, 0], sizes = [1, 128], strides = [1, 1]} : vector<9x128xf32> to vector<1x128xf32>
    %c0_86 = arith.constant 0 : index
    %c0_87 = arith.constant 0 : index
    %c0_88 = arith.constant 0 : index
    %c0_89 = arith.constant 0 : index
    %91 = vector.load %arg2[%c0_86, %c0_87, %c0_88, %c0_89] : memref<1x34x34x128xf32, #tpu.memory_space<vmem>>, vector<1x4x32x128xf32>
    %92 = vector.shape_cast %91 : vector<1x4x32x128xf32> to vector<4x32x128xf32>
    %93 = vector.shape_cast %90 : vector<1x128xf32> to vector<1x1x128xf32>
    %94 = vector.broadcast %93 : vector<1x1x128xf32> to vector<4x32x128xf32>
    %95 = arith.mulf %92, %94 : vector<4x32x128xf32>
    %96 = vector.extract_strided_slice %88 {offsets = [1, 0], sizes = [1, 128], strides = [1, 1]} : vector<9x128xf32> to vector<1x128xf32>
    %c0_90 = arith.constant 0 : index
    %c0_91 = arith.constant 0 : index
    %c0_92 = arith.constant 0 : index
    %97 = vector.load %arg10[%c0_90, %c0_91, %c0_92] : memref<34x32x128xf32, #tpu.memory_space<vmem>>, vector<4x32x128xf32>
    %98 = vector.shape_cast %96 : vector<1x128xf32> to vector<1x1x128xf32>
    %99 = vector.broadcast %98 : vector<1x1x128xf32> to vector<4x32x128xf32>
    %100 = arith.mulf %97, %99 : vector<4x32x128xf32>
    %101 = arith.addf %95, %100 : vector<4x32x128xf32>
    %102 = vector.extract_strided_slice %88 {offsets = [2, 0], sizes = [1, 128], strides = [1, 1]} : vector<9x128xf32> to vector<1x128xf32>
    %c0_93 = arith.constant 0 : index
    %c0_94 = arith.constant 0 : index
    %c0_95 = arith.constant 0 : index
    %103 = vector.load %arg11[%c0_93, %c0_94, %c0_95] : memref<34x32x128xf32, #tpu.memory_space<vmem>>, vector<4x32x128xf32>
    %104 = vector.shape_cast %102 : vector<1x128xf32> to vector<1x1x128xf32>
    %105 = vector.broadcast %104 : vector<1x1x128xf32> to vector<4x32x128xf32>
    %106 = arith.mulf %103, %105 : vector<4x32x128xf32>
    %107 = arith.addf %101, %106 : vector<4x32x128xf32>
    %108 = vector.extract_strided_slice %88 {offsets = [3, 0], sizes = [1, 128], strides = [1, 1]} : vector<9x128xf32> to vector<1x128xf32>
    %c0_96 = arith.constant 0 : index
    %c1_97 = arith.constant 1 : index
    %c0_98 = arith.constant 0 : index
    %c0_99 = arith.constant 0 : index
    %109 = vector.load %arg2[%c0_96, %c1_97, %c0_98, %c0_99] : memref<1x34x34x128xf32, #tpu.memory_space<vmem>>, vector<1x4x32x128xf32>
    %110 = vector.shape_cast %109 : vector<1x4x32x128xf32> to vector<4x32x128xf32>
    %111 = vector.shape_cast %108 : vector<1x128xf32> to vector<1x1x128xf32>
    %112 = vector.broadcast %111 : vector<1x1x128xf32> to vector<4x32x128xf32>
    %113 = arith.mulf %110, %112 : vector<4x32x128xf32>
    %114 = arith.addf %107, %113 : vector<4x32x128xf32>
    %115 = vector.extract_strided_slice %88 {offsets = [4, 0], sizes = [1, 128], strides = [1, 1]} : vector<9x128xf32> to vector<1x128xf32>
    %c1_100 = arith.constant 1 : index
    %c0_101 = arith.constant 0 : index
    %c0_102 = arith.constant 0 : index
    %116 = vector.load %arg10[%c1_100, %c0_101, %c0_102] : memref<34x32x128xf32, #tpu.memory_space<vmem>>, vector<4x32x128xf32>
    %117 = vector.shape_cast %115 : vector<1x128xf32> to vector<1x1x128xf32>
    %118 = vector.broadcast %117 : vector<1x1x128xf32> to vector<4x32x128xf32>
    %119 = arith.mulf %116, %118 : vector<4x32x128xf32>
    %120 = arith.addf %114, %119 : vector<4x32x128xf32>
    %121 = vector.extract_strided_slice %88 {offsets = [5, 0], sizes = [1, 128], strides = [1, 1]} : vector<9x128xf32> to vector<1x128xf32>
    %c1_103 = arith.constant 1 : index
    %c0_104 = arith.constant 0 : index
    %c0_105 = arith.constant 0 : index
    %122 = vector.load %arg11[%c1_103, %c0_104, %c0_105] : memref<34x32x128xf32, #tpu.memory_space<vmem>>, vector<4x32x128xf32>
    %123 = vector.shape_cast %121 : vector<1x128xf32> to vector<1x1x128xf32>
    %124 = vector.broadcast %123 : vector<1x1x128xf32> to vector<4x32x128xf32>
    %125 = arith.mulf %122, %124 : vector<4x32x128xf32>
    %126 = arith.addf %120, %125 : vector<4x32x128xf32>
    %127 = vector.extract_strided_slice %88 {offsets = [6, 0], sizes = [1, 128], strides = [1, 1]} : vector<9x128xf32> to vector<1x128xf32>
    %c0_106 = arith.constant 0 : index
    %c2_107 = arith.constant 2 : index
    %c0_108 = arith.constant 0 : index
    %c0_109 = arith.constant 0 : index
    %128 = vector.load %arg2[%c0_106, %c2_107, %c0_108, %c0_109] : memref<1x34x34x128xf32, #tpu.memory_space<vmem>>, vector<1x4x32x128xf32>
    %129 = vector.shape_cast %128 : vector<1x4x32x128xf32> to vector<4x32x128xf32>
    %130 = vector.shape_cast %127 : vector<1x128xf32> to vector<1x1x128xf32>
    %131 = vector.broadcast %130 : vector<1x1x128xf32> to vector<4x32x128xf32>
    %132 = arith.mulf %129, %131 : vector<4x32x128xf32>
    %133 = arith.addf %126, %132 : vector<4x32x128xf32>
    %134 = vector.extract_strided_slice %88 {offsets = [7, 0], sizes = [1, 128], strides = [1, 1]} : vector<9x128xf32> to vector<1x128xf32>
    %c2_110 = arith.constant 2 : index
    %c0_111 = arith.constant 0 : index
    %c0_112 = arith.constant 0 : index
    %135 = vector.load %arg10[%c2_110, %c0_111, %c0_112] : memref<34x32x128xf32, #tpu.memory_space<vmem>>, vector<4x32x128xf32>
    %136 = vector.shape_cast %134 : vector<1x128xf32> to vector<1x1x128xf32>
    %137 = vector.broadcast %136 : vector<1x1x128xf32> to vector<4x32x128xf32>
    %138 = arith.mulf %135, %137 : vector<4x32x128xf32>
    %139 = arith.addf %133, %138 : vector<4x32x128xf32>
    %140 = vector.extract_strided_slice %88 {offsets = [8, 0], sizes = [1, 128], strides = [1, 1]} : vector<9x128xf32> to vector<1x128xf32>
    %c2_113 = arith.constant 2 : index
    %c0_114 = arith.constant 0 : index
    %c0_115 = arith.constant 0 : index
    %141 = vector.load %arg11[%c2_113, %c0_114, %c0_115] : memref<34x32x128xf32, #tpu.memory_space<vmem>>, vector<4x32x128xf32>
    %142 = vector.shape_cast %140 : vector<1x128xf32> to vector<1x1x128xf32>
    %143 = vector.broadcast %142 : vector<1x1x128xf32> to vector<4x32x128xf32>
    %144 = arith.mulf %141, %143 : vector<4x32x128xf32>
    %145 = arith.addf %139, %144 : vector<4x32x128xf32>
    %146 = vector.shape_cast %89 : vector<1x128xf32> to vector<1x1x128xf32>
    %147 = vector.broadcast %146 : vector<1x1x128xf32> to vector<4x32x128xf32>
    %148 = arith.addf %145, %147 : vector<4x32x128xf32>
    %c0_116 = arith.constant 0 : index
    %c0_117 = arith.constant 0 : index
    %c0_118 = arith.constant 0 : index
    %c0_119 = arith.constant 0 : index
    %149 = vector.load %arg7[%c0_116, %c0_117, %c0_118, %c0_119] : memref<1x32x32x128xf32, #tpu.memory_space<vmem>>, vector<1x4x32x128xf32>
    %150 = vector.shape_cast %149 : vector<1x4x32x128xf32> to vector<4x32x128xf32>
    %151 = vector.shape_cast %148 : vector<4x32x128xf32> to vector<1x4x32x128xf32>
    tpu.vector_store %arg7[%c0_116, %c0_117, %c0_118, %c0_119], %151 {strides = array<i32>} : memref<1x32x32x128xf32, #tpu.memory_space<vmem>>, vector<1x4x32x128xf32>,
    %152 = vector.extract_strided_slice %88 {offsets = [0, 0], sizes = [1, 128], strides = [1, 1]} : vector<9x128xf32> to vector<1x128xf32>
    %c0_120 = arith.constant 0 : index
    %c4 = arith.constant 4 : index
    %c0_121 = arith.constant 0 : index
    %c0_122 = arith.constant 0 : index
    %153 = vector.load %arg2[%c0_120, %c4, %c0_121, %c0_122] : memref<1x34x34x128xf32, #tpu.memory_space<vmem>>, vector<1x4x32x128xf32>
    %154 = vector.shape_cast %153 : vector<1x4x32x128xf32> to vector<4x32x128xf32>
    %155 = vector.shape_cast %152 : vector<1x128xf32> to vector<1x1x128xf32>
    %156 = vector.broadcast %155 : vector<1x1x128xf32> to vector<4x32x128xf32>
    %157 = arith.mulf %154, %156 : vector<4x32x128xf32>
    %158 = vector.extract_strided_slice %88 {offsets = [1, 0], sizes = [1, 128], strides = [1, 1]} : vector<9x128xf32> to vector<1x128xf32>
    %c4_123 = arith.constant 4 : index
    %c0_124 = arith.constant 0 : index
    %c0_125 = arith.constant 0 : index
    %159 = vector.load %arg10[%c4_123, %c0_124, %c0_125] : memref<34x32x128xf32, #tpu.memory_space<vmem>>, vector<4x32x128xf32>
    %160 = vector.shape_cast %158 : vector<1x128xf32> to vector<1x1x128xf32>
    %161 = vector.broadcast %160 : vector<1x1x128xf32> to vector<4x32x128xf32>
    %162 = arith.mulf %159, %161 : vector<4x32x128xf32>
    %163 = arith.addf %157, %162 : vector<4x32x128xf32>
    %164 = vector.extract_strided_slice %88 {offsets = [2, 0], sizes = [1, 128], strides = [1, 1]} : vector<9x128xf32> to vector<1x128xf32>
    %c4_126 = arith.constant 4 : index
    %c0_127 = arith.constant 0 : index
    %c0_128 = arith.constant 0 : index
    %165 = vector.load %arg11[%c4_126, %c0_127, %c0_128] : memref<34x32x128xf32, #tpu.memory_space<vmem>>, vector<4x32x128xf32>
    %166 = vector.shape_cast %164 : vector<1x128xf32> to vector<1x1x128xf32>
    %167 = vector.broadcast %166 : vector<1x1x128xf32> to vector<4x32x128xf32>
    %168 = arith.mulf %165, %167 : vector<4x32x128xf32>
    %169 = arith.addf %163, %168 : vector<4x32x128xf32>
    %170 = vector.extract_strided_slice %88 {offsets = [3, 0], sizes = [1, 128], strides = [1, 1]} : vector<9x128xf32> to vector<1x128xf32>
    %c0_129 = arith.constant 0 : index
    %c5 = arith.constant 5 : index
    %c0_130 = arith.constant 0 : index
    %c0_131 = arith.constant 0 : index
    %171 = vector.load %arg2[%c0_129, %c5, %c0_130, %c0_131] : memref<1x34x34x128xf32, #tpu.memory_space<vmem>>, vector<1x4x32x128xf32>
    %172 = vector.shape_cast %171 : vector<1x4x32x128xf32> to vector<4x32x128xf32>
    %173 = vector.shape_cast %170 : vector<1x128xf32> to vector<1x1x128xf32>
    %174 = vector.broadcast %173 : vector<1x1x128xf32> to vector<4x32x128xf32>
    %175 = arith.mulf %172, %174 : vector<4x32x128xf32>
    %176 = arith.addf %169, %175 : vector<4x32x128xf32>
    %177 = vector.extract_strided_slice %88 {offsets = [4, 0], sizes = [1, 128], strides = [1, 1]} : vector<9x128xf32> to vector<1x128xf32>
    %c5_132 = arith.constant 5 : index
    %c0_133 = arith.constant 0 : index
    %c0_134 = arith.constant 0 : index
    %178 = vector.load %arg10[%c5_132, %c0_133, %c0_134] : memref<34x32x128xf32, #tpu.memory_space<vmem>>, vector<4x32x128xf32>
    %179 = vector.shape_cast %177 : vector<1x128xf32> to vector<1x1x128xf32>
    %180 = vector.broadcast %179 : vector<1x1x128xf32> to vector<4x32x128xf32>
    %181 = arith.mulf %178, %180 : vector<4x32x128xf32>
    %182 = arith.addf %176, %181 : vector<4x32x128xf32>
    %183 = vector.extract_strided_slice %88 {offsets = [5, 0], sizes = [1, 128], strides = [1, 1]} : vector<9x128xf32> to vector<1x128xf32>
    %c5_135 = arith.constant 5 : index
    %c0_136 = arith.constant 0 : index
    %c0_137 = arith.constant 0 : index
    %184 = vector.load %arg11[%c5_135, %c0_136, %c0_137] : memref<34x32x128xf32, #tpu.memory_space<vmem>>, vector<4x32x128xf32>
    %185 = vector.shape_cast %183 : vector<1x128xf32> to vector<1x1x128xf32>
    %186 = vector.broadcast %185 : vector<1x1x128xf32> to vector<4x32x128xf32>
    %187 = arith.mulf %184, %186 : vector<4x32x128xf32>
    %188 = arith.addf %182, %187 : vector<4x32x128xf32>
    %189 = vector.extract_strided_slice %88 {offsets = [6, 0], sizes = [1, 128], strides = [1, 1]} : vector<9x128xf32> to vector<1x128xf32>
    %c0_138 = arith.constant 0 : index
    %c6 = arith.constant 6 : index
    %c0_139 = arith.constant 0 : index
    %c0_140 = arith.constant 0 : index
    %190 = vector.load %arg2[%c0_138, %c6, %c0_139, %c0_140] : memref<1x34x34x128xf32, #tpu.memory_space<vmem>>, vector<1x4x32x128xf32>
    %191 = vector.shape_cast %190 : vector<1x4x32x128xf32> to vector<4x32x128xf32>
    %192 = vector.shape_cast %189 : vector<1x128xf32> to vector<1x1x128xf32>
    %193 = vector.broadcast %192 : vector<1x1x128xf32> to vector<4x32x128xf32>
    %194 = arith.mulf %191, %193 : vector<4x32x128xf32>
    %195 = arith.addf %188, %194 : vector<4x32x128xf32>
    %196 = vector.extract_strided_slice %88 {offsets = [7, 0], sizes = [1, 128], strides = [1, 1]} : vector<9x128xf32> to vector<1x128xf32>
    %c6_141 = arith.constant 6 : index
    %c0_142 = arith.constant 0 : index
    %c0_143 = arith.constant 0 : index
    %197 = vector.load %arg10[%c6_141, %c0_142, %c0_143] : memref<34x32x128xf32, #tpu.memory_space<vmem>>, vector<4x32x128xf32>
    %198 = vector.shape_cast %196 : vector<1x128xf32> to vector<1x1x128xf32>
    %199 = vector.broadcast %198 : vector<1x1x128xf32> to vector<4x32x128xf32>
    %200 = arith.mulf %197, %199 : vector<4x32x128xf32>
    %201 = arith.addf %195, %200 : vector<4x32x128xf32>
    %202 = vector.extract_strided_slice %88 {offsets = [8, 0], sizes = [1, 128], strides = [1, 1]} : vector<9x128xf32> to vector<1x128xf32>
    %c6_144 = arith.constant 6 : index
    %c0_145 = arith.constant 0 : index
    %c0_146 = arith.constant 0 : index
    %203 = vector.load %arg11[%c6_144, %c0_145, %c0_146] : memref<34x32x128xf32, #tpu.memory_space<vmem>>, vector<4x32x128xf32>
    %204 = vector.shape_cast %202 : vector<1x128xf32> to vector<1x1x128xf32>
    %205 = vector.broadcast %204 : vector<1x1x128xf32> to vector<4x32x128xf32>
    %206 = arith.mulf %203, %205 : vector<4x32x128xf32>
    %207 = arith.addf %201, %206 : vector<4x32x128xf32>
    %208 = vector.shape_cast %89 : vector<1x128xf32> to vector<1x1x128xf32>
    %209 = vector.broadcast %208 : vector<1x1x128xf32> to vector<4x32x128xf32>
    %210 = arith.addf %207, %209 : vector<4x32x128xf32>
    %c0_147 = arith.constant 0 : index
    %c4_148 = arith.constant 4 : index
    %c0_149 = arith.constant 0 : index
    %c0_150 = arith.constant 0 : index
    %211 = vector.load %arg7[%c0_147, %c4_148, %c0_149, %c0_150] : memref<1x32x32x128xf32, #tpu.memory_space<vmem>>, vector<1x4x32x128xf32>
    %212 = vector.shape_cast %211 : vector<1x4x32x128xf32> to vector<4x32x128xf32>
    %213 = vector.shape_cast %210 : vector<4x32x128xf32> to vector<1x4x32x128xf32>
    tpu.vector_store %arg7[%c0_147, %c4_148, %c0_149, %c0_150], %213 {strides = array<i32>} : memref<1x32x32x128xf32, #tpu.memory_space<vmem>>, vector<1x4x32x128xf32>,
    %214 = vector.extract_strided_slice %88 {offsets = [0, 0], sizes = [1, 128], strides = [1, 1]} : vector<9x128xf32> to vector<1x128xf32>
    %c0_151 = arith.constant 0 : index
    %c8_152 = arith.constant 8 : index
    %c0_153 = arith.constant 0 : index
    %c0_154 = arith.constant 0 : index
    %215 = vector.load %arg2[%c0_151, %c8_152, %c0_153, %c0_154] : memref<1x34x34x128xf32, #tpu.memory_space<vmem>>, vector<1x4x32x128xf32>
    %216 = vector.shape_cast %215 : vector<1x4x32x128xf32> to vector<4x32x128xf32>
    %217 = vector.shape_cast %214 : vector<1x128xf32> to vector<1x1x128xf32>
    %218 = vector.broadcast %217 : vector<1x1x128xf32> to vector<4x32x128xf32>
    %219 = arith.mulf %216, %218 : vector<4x32x128xf32>
    %220 = vector.extract_strided_slice %88 {offsets = [1, 0], sizes = [1, 128], strides = [1, 1]} : vector<9x128xf32> to vector<1x128xf32>
    %c8_155 = arith.constant 8 : index
    %c0_156 = arith.constant 0 : index
    %c0_157 = arith.constant 0 : index
    %221 = vector.load %arg10[%c8_155, %c0_156, %c0_157] : memref<34x32x128xf32, #tpu.memory_space<vmem>>, vector<4x32x128xf32>
    %222 = vector.shape_cast %220 : vector<1x128xf32> to vector<1x1x128xf32>
    %223 = vector.broadcast %222 : vector<1x1x128xf32> to vector<4x32x128xf32>
    %224 = arith.mulf %221, %223 : vector<4x32x128xf32>
    %225 = arith.addf %219, %224 : vector<4x32x128xf32>
    %226 = vector.extract_strided_slice %88 {offsets = [2, 0], sizes = [1, 128], strides = [1, 1]} : vector<9x128xf32> to vector<1x128xf32>
    %c8_158 = arith.constant 8 : index
    %c0_159 = arith.constant 0 : index
    %c0_160 = arith.constant 0 : index
    %227 = vector.load %arg11[%c8_158, %c0_159, %c0_160] : memref<34x32x128xf32, #tpu.memory_space<vmem>>, vector<4x32x128xf32>
    %228 = vector.shape_cast %226 : vector<1x128xf32> to vector<1x1x128xf32>
    %229 = vector.broadcast %228 : vector<1x1x128xf32> to vector<4x32x128xf32>
    %230 = arith.mulf %227, %229 : vector<4x32x128xf32>
    %231 = arith.addf %225, %230 : vector<4x32x128xf32>
    %232 = vector.extract_strided_slice %88 {offsets = [3, 0], sizes = [1, 128], strides = [1, 1]} : vector<9x128xf32> to vector<1x128xf32>
    %c0_161 = arith.constant 0 : index
    %c9 = arith.constant 9 : index
    %c0_162 = arith.constant 0 : index
    %c0_163 = arith.constant 0 : index
    %233 = vector.load %arg2[%c0_161, %c9, %c0_162, %c0_163] : memref<1x34x34x128xf32, #tpu.memory_space<vmem>>, vector<1x4x32x128xf32>
    %234 = vector.shape_cast %233 : vector<1x4x32x128xf32> to vector<4x32x128xf32>
    %235 = vector.shape_cast %232 : vector<1x128xf32> to vector<1x1x128xf32>
    %236 = vector.broadcast %235 : vector<1x1x128xf32> to vector<4x32x128xf32>
    %237 = arith.mulf %234, %236 : vector<4x32x128xf32>
    %238 = arith.addf %231, %237 : vector<4x32x128xf32>
    %239 = vector.extract_strided_slice %88 {offsets = [4, 0], sizes = [1, 128], strides = [1, 1]} : vector<9x128xf32> to vector<1x128xf32>
    %c9_164 = arith.constant 9 : index
    %c0_165 = arith.constant 0 : index
    %c0_166 = arith.constant 0 : index
    %240 = vector.load %arg10[%c9_164, %c0_165, %c0_166] : memref<34x32x128xf32, #tpu.memory_space<vmem>>, vector<4x32x128xf32>
    %241 = vector.shape_cast %239 : vector<1x128xf32> to vector<1x1x128xf32>
    %242 = vector.broadcast %241 : vector<1x1x128xf32> to vector<4x32x128xf32>
    %243 = arith.mulf %240, %242 : vector<4x32x128xf32>
    %244 = arith.addf %238, %243 : vector<4x32x128xf32>
    %245 = vector.extract_strided_slice %88 {offsets = [5, 0], sizes = [1, 128], strides = [1, 1]} : vector<9x128xf32> to vector<1x128xf32>
    %c9_167 = arith.constant 9 : index
    %c0_168 = arith.constant 0 : index
    %c0_169 = arith.constant 0 : index
    %246 = vector.load %arg11[%c9_167, %c0_168, %c0_169] : memref<34x32x128xf32, #tpu.memory_space<vmem>>, vector<4x32x128xf32>
    %247 = vector.shape_cast %245 : vector<1x128xf32> to vector<1x1x128xf32>
    %248 = vector.broadcast %247 : vector<1x1x128xf32> to vector<4x32x128xf32>
    %249 = arith.mulf %246, %248 : vector<4x32x128xf32>
    %250 = arith.addf %244, %249 : vector<4x32x128xf32>
    %251 = vector.extract_strided_slice %88 {offsets = [6, 0], sizes = [1, 128], strides = [1, 1]} : vector<9x128xf32> to vector<1x128xf32>
    %c0_170 = arith.constant 0 : index
    %c10 = arith.constant 10 : index
    %c0_171 = arith.constant 0 : index
    %c0_172 = arith.constant 0 : index
    %252 = vector.load %arg2[%c0_170, %c10, %c0_171, %c0_172] : memref<1x34x34x128xf32, #tpu.memory_space<vmem>>, vector<1x4x32x128xf32>
    %253 = vector.shape_cast %252 : vector<1x4x32x128xf32> to vector<4x32x128xf32>
    %254 = vector.shape_cast %251 : vector<1x128xf32> to vector<1x1x128xf32>
    %255 = vector.broadcast %254 : vector<1x1x128xf32> to vector<4x32x128xf32>
    %256 = arith.mulf %253, %255 : vector<4x32x128xf32>
    %257 = arith.addf %250, %256 : vector<4x32x128xf32>
    %258 = vector.extract_strided_slice %88 {offsets = [7, 0], sizes = [1, 128], strides = [1, 1]} : vector<9x128xf32> to vector<1x128xf32>
    %c10_173 = arith.constant 10 : index
    %c0_174 = arith.constant 0 : index
    %c0_175 = arith.constant 0 : index
    %259 = vector.load %arg10[%c10_173, %c0_174, %c0_175] : memref<34x32x128xf32, #tpu.memory_space<vmem>>, vector<4x32x128xf32>
    %260 = vector.shape_cast %258 : vector<1x128xf32> to vector<1x1x128xf32>
    %261 = vector.broadcast %260 : vector<1x1x128xf32> to vector<4x32x128xf32>
    %262 = arith.mulf %259, %261 : vector<4x32x128xf32>
    %263 = arith.addf %257, %262 : vector<4x32x128xf32>
    %264 = vector.extract_strided_slice %88 {offsets = [8, 0], sizes = [1, 128], strides = [1, 1]} : vector<9x128xf32> to vector<1x128xf32>
    %c10_176 = arith.constant 10 : index
    %c0_177 = arith.constant 0 : index
    %c0_178 = arith.constant 0 : index
    %265 = vector.load %arg11[%c10_176, %c0_177, %c0_178] : memref<34x32x128xf32, #tpu.memory_space<vmem>>, vector<4x32x128xf32>
    %266 = vector.shape_cast %264 : vector<1x128xf32> to vector<1x1x128xf32>
    %267 = vector.broadcast %266 : vector<1x1x128xf32> to vector<4x32x128xf32>
    %268 = arith.mulf %265, %267 : vector<4x32x128xf32>
    %269 = arith.addf %263, %268 : vector<4x32x128xf32>
    %270 = vector.shape_cast %89 : vector<1x128xf32> to vector<1x1x128xf32>
    %271 = vector.broadcast %270 : vector<1x1x128xf32> to vector<4x32x128xf32>
    %272 = arith.addf %269, %271 : vector<4x32x128xf32>
    %c0_179 = arith.constant 0 : index
    %c8_180 = arith.constant 8 : index
    %c0_181 = arith.constant 0 : index
    %c0_182 = arith.constant 0 : index
    %273 = vector.load %arg7[%c0_179, %c8_180, %c0_181, %c0_182] : memref<1x32x32x128xf32, #tpu.memory_space<vmem>>, vector<1x4x32x128xf32>
    %274 = vector.shape_cast %273 : vector<1x4x32x128xf32> to vector<4x32x128xf32>
    %275 = vector.shape_cast %272 : vector<4x32x128xf32> to vector<1x4x32x128xf32>
    tpu.vector_store %arg7[%c0_179, %c8_180, %c0_181, %c0_182], %275 {strides = array<i32>} : memref<1x32x32x128xf32, #tpu.memory_space<vmem>>, vector<1x4x32x128xf32>,
    %276 = vector.extract_strided_slice %88 {offsets = [0, 0], sizes = [1, 128], strides = [1, 1]} : vector<9x128xf32> to vector<1x128xf32>
    %c0_183 = arith.constant 0 : index
    %c12 = arith.constant 12 : index
    %c0_184 = arith.constant 0 : index
    %c0_185 = arith.constant 0 : index
    %277 = vector.load %arg2[%c0_183, %c12, %c0_184, %c0_185] : memref<1x34x34x128xf32, #tpu.memory_space<vmem>>, vector<1x4x32x128xf32>
    %278 = vector.shape_cast %277 : vector<1x4x32x128xf32> to vector<4x32x128xf32>
    %279 = vector.shape_cast %276 : vector<1x128xf32> to vector<1x1x128xf32>
    %280 = vector.broadcast %279 : vector<1x1x128xf32> to vector<4x32x128xf32>
    %281 = arith.mulf %278, %280 : vector<4x32x128xf32>
    %282 = vector.extract_strided_slice %88 {offsets = [1, 0], sizes = [1, 128], strides = [1, 1]} : vector<9x128xf32> to vector<1x128xf32>
    %c12_186 = arith.constant 12 : index
    %c0_187 = arith.constant 0 : index
    %c0_188 = arith.constant 0 : index
    %283 = vector.load %arg10[%c12_186, %c0_187, %c0_188] : memref<34x32x128xf32, #tpu.memory_space<vmem>>, vector<4x32x128xf32>
    %284 = vector.shape_cast %282 : vector<1x128xf32> to vector<1x1x128xf32>
    %285 = vector.broadcast %284 : vector<1x1x128xf32> to vector<4x32x128xf32>
    %286 = arith.mulf %283, %285 : vector<4x32x128xf32>
    %287 = arith.addf %281, %286 : vector<4x32x128xf32>
    %288 = vector.extract_strided_slice %88 {offsets = [2, 0], sizes = [1, 128], strides = [1, 1]} : vector<9x128xf32> to vector<1x128xf32>
    %c12_189 = arith.constant 12 : index
    %c0_190 = arith.constant 0 : index
    %c0_191 = arith.constant 0 : index
    %289 = vector.load %arg11[%c12_189, %c0_190, %c0_191] : memref<34x32x128xf32, #tpu.memory_space<vmem>>, vector<4x32x128xf32>
    %290 = vector.shape_cast %288 : vector<1x128xf32> to vector<1x1x128xf32>
    %291 = vector.broadcast %290 : vector<1x1x128xf32> to vector<4x32x128xf32>
    %292 = arith.mulf %289, %291 : vector<4x32x128xf32>
    %293 = arith.addf %287, %292 : vector<4x32x128xf32>
    %294 = vector.extract_strided_slice %88 {offsets = [3, 0], sizes = [1, 128], strides = [1, 1]} : vector<9x128xf32> to vector<1x128xf32>
    %c0_192 = arith.constant 0 : index
    %c13 = arith.constant 13 : index
    %c0_193 = arith.constant 0 : index
    %c0_194 = arith.constant 0 : index
    %295 = vector.load %arg2[%c0_192, %c13, %c0_193, %c0_194] : memref<1x34x34x128xf32, #tpu.memory_space<vmem>>, vector<1x4x32x128xf32>
    %296 = vector.shape_cast %295 : vector<1x4x32x128xf32> to vector<4x32x128xf32>
    %297 = vector.shape_cast %294 : vector<1x128xf32> to vector<1x1x128xf32>
    %298 = vector.broadcast %297 : vector<1x1x128xf32> to vector<4x32x128xf32>
    %299 = arith.mulf %296, %298 : vector<4x32x128xf32>
    %300 = arith.addf %293, %299 : vector<4x32x128xf32>
    %301 = vector.extract_strided_slice %88 {offsets = [4, 0], sizes = [1, 128], strides = [1, 1]} : vector<9x128xf32> to vector<1x128xf32>
    %c13_195 = arith.constant 13 : index
    %c0_196 = arith.constant 0 : index
    %c0_197 = arith.constant 0 : index
    %302 = vector.load %arg10[%c13_195, %c0_196, %c0_197] : memref<34x32x128xf32, #tpu.memory_space<vmem>>, vector<4x32x128xf32>
    %303 = vector.shape_cast %301 : vector<1x128xf32> to vector<1x1x128xf32>
    %304 = vector.broadcast %303 : vector<1x1x128xf32> to vector<4x32x128xf32>
    %305 = arith.mulf %302, %304 : vector<4x32x128xf32>
    %306 = arith.addf %300, %305 : vector<4x32x128xf32>
    %307 = vector.extract_strided_slice %88 {offsets = [5, 0], sizes = [1, 128], strides = [1, 1]} : vector<9x128xf32> to vector<1x128xf32>
    %c13_198 = arith.constant 13 : index
    %c0_199 = arith.constant 0 : index
    %c0_200 = arith.constant 0 : index
    %308 = vector.load %arg11[%c13_198, %c0_199, %c0_200] : memref<34x32x128xf32, #tpu.memory_space<vmem>>, vector<4x32x128xf32>
    %309 = vector.shape_cast %307 : vector<1x128xf32> to vector<1x1x128xf32>
    %310 = vector.broadcast %309 : vector<1x1x128xf32> to vector<4x32x128xf32>
    %311 = arith.mulf %308, %310 : vector<4x32x128xf32>
    %312 = arith.addf %306, %311 : vector<4x32x128xf32>
    %313 = vector.extract_strided_slice %88 {offsets = [6, 0], sizes = [1, 128], strides = [1, 1]} : vector<9x128xf32> to vector<1x128xf32>
    %c0_201 = arith.constant 0 : index
    %c14 = arith.constant 14 : index
    %c0_202 = arith.constant 0 : index
    %c0_203 = arith.constant 0 : index
    %314 = vector.load %arg2[%c0_201, %c14, %c0_202, %c0_203] : memref<1x34x34x128xf32, #tpu.memory_space<vmem>>, vector<1x4x32x128xf32>
    %315 = vector.shape_cast %314 : vector<1x4x32x128xf32> to vector<4x32x128xf32>
    %316 = vector.shape_cast %313 : vector<1x128xf32> to vector<1x1x128xf32>
    %317 = vector.broadcast %316 : vector<1x1x128xf32> to vector<4x32x128xf32>
    %318 = arith.mulf %315, %317 : vector<4x32x128xf32>
    %319 = arith.addf %312, %318 : vector<4x32x128xf32>
    %320 = vector.extract_strided_slice %88 {offsets = [7, 0], sizes = [1, 128], strides = [1, 1]} : vector<9x128xf32> to vector<1x128xf32>
    %c14_204 = arith.constant 14 : index
    %c0_205 = arith.constant 0 : index
    %c0_206 = arith.constant 0 : index
    %321 = vector.load %arg10[%c14_204, %c0_205, %c0_206] : memref<34x32x128xf32, #tpu.memory_space<vmem>>, vector<4x32x128xf32>
    %322 = vector.shape_cast %320 : vector<1x128xf32> to vector<1x1x128xf32>
    %323 = vector.broadcast %322 : vector<1x1x128xf32> to vector<4x32x128xf32>
    %324 = arith.mulf %321, %323 : vector<4x32x128xf32>
    %325 = arith.addf %319, %324 : vector<4x32x128xf32>
    %326 = vector.extract_strided_slice %88 {offsets = [8, 0], sizes = [1, 128], strides = [1, 1]} : vector<9x128xf32> to vector<1x128xf32>
    %c14_207 = arith.constant 14 : index
    %c0_208 = arith.constant 0 : index
    %c0_209 = arith.constant 0 : index
    %327 = vector.load %arg11[%c14_207, %c0_208, %c0_209] : memref<34x32x128xf32, #tpu.memory_space<vmem>>, vector<4x32x128xf32>
    %328 = vector.shape_cast %326 : vector<1x128xf32> to vector<1x1x128xf32>
    %329 = vector.broadcast %328 : vector<1x1x128xf32> to vector<4x32x128xf32>
    %330 = arith.mulf %327, %329 : vector<4x32x128xf32>
    %331 = arith.addf %325, %330 : vector<4x32x128xf32>
    %332 = vector.shape_cast %89 : vector<1x128xf32> to vector<1x1x128xf32>
    %333 = vector.broadcast %332 : vector<1x1x128xf32> to vector<4x32x128xf32>
    %334 = arith.addf %331, %333 : vector<4x32x128xf32>
    %c0_210 = arith.constant 0 : index
    %c12_211 = arith.constant 12 : index
    %c0_212 = arith.constant 0 : index
    %c0_213 = arith.constant 0 : index
    %335 = vector.load %arg7[%c0_210, %c12_211, %c0_212, %c0_213] : memref<1x32x32x128xf32, #tpu.memory_space<vmem>>, vector<1x4x32x128xf32>
    %336 = vector.shape_cast %335 : vector<1x4x32x128xf32> to vector<4x32x128xf32>
    %337 = vector.shape_cast %334 : vector<4x32x128xf32> to vector<1x4x32x128xf32>
    tpu.vector_store %arg7[%c0_210, %c12_211, %c0_212, %c0_213], %337 {strides = array<i32>} : memref<1x32x32x128xf32, #tpu.memory_space<vmem>>, vector<1x4x32x128xf32>,
    %338 = vector.extract_strided_slice %88 {offsets = [0, 0], sizes = [1, 128], strides = [1, 1]} : vector<9x128xf32> to vector<1x128xf32>
    %c0_214 = arith.constant 0 : index
    %c16_215 = arith.constant 16 : index
    %c0_216 = arith.constant 0 : index
    %c0_217 = arith.constant 0 : index
    %339 = vector.load %arg2[%c0_214, %c16_215, %c0_216, %c0_217] : memref<1x34x34x128xf32, #tpu.memory_space<vmem>>, vector<1x4x32x128xf32>
    %340 = vector.shape_cast %339 : vector<1x4x32x128xf32> to vector<4x32x128xf32>
    %341 = vector.shape_cast %338 : vector<1x128xf32> to vector<1x1x128xf32>
    %342 = vector.broadcast %341 : vector<1x1x128xf32> to vector<4x32x128xf32>
    %343 = arith.mulf %340, %342 : vector<4x32x128xf32>
    %344 = vector.extract_strided_slice %88 {offsets = [1, 0], sizes = [1, 128], strides = [1, 1]} : vector<9x128xf32> to vector<1x128xf32>
    %c16_218 = arith.constant 16 : index
    %c0_219 = arith.constant 0 : index
    %c0_220 = arith.constant 0 : index
    %345 = vector.load %arg10[%c16_218, %c0_219, %c0_220] : memref<34x32x128xf32, #tpu.memory_space<vmem>>, vector<4x32x128xf32>
    %346 = vector.shape_cast %344 : vector<1x128xf32> to vector<1x1x128xf32>
    %347 = vector.broadcast %346 : vector<1x1x128xf32> to vector<4x32x128xf32>
    %348 = arith.mulf %345, %347 : vector<4x32x128xf32>
    %349 = arith.addf %343, %348 : vector<4x32x128xf32>
    %350 = vector.extract_strided_slice %88 {offsets = [2, 0], sizes = [1, 128], strides = [1, 1]} : vector<9x128xf32> to vector<1x128xf32>
    %c16_221 = arith.constant 16 : index
    %c0_222 = arith.constant 0 : index
    %c0_223 = arith.constant 0 : index
    %351 = vector.load %arg11[%c16_221, %c0_222, %c0_223] : memref<34x32x128xf32, #tpu.memory_space<vmem>>, vector<4x32x128xf32>
    %352 = vector.shape_cast %350 : vector<1x128xf32> to vector<1x1x128xf32>
    %353 = vector.broadcast %352 : vector<1x1x128xf32> to vector<4x32x128xf32>
    %354 = arith.mulf %351, %353 : vector<4x32x128xf32>
    %355 = arith.addf %349, %354 : vector<4x32x128xf32>
    %356 = vector.extract_strided_slice %88 {offsets = [3, 0], sizes = [1, 128], strides = [1, 1]} : vector<9x128xf32> to vector<1x128xf32>
    %c0_224 = arith.constant 0 : index
    %c17 = arith.constant 17 : index
    %c0_225 = arith.constant 0 : index
    %c0_226 = arith.constant 0 : index
    %357 = vector.load %arg2[%c0_224, %c17, %c0_225, %c0_226] : memref<1x34x34x128xf32, #tpu.memory_space<vmem>>, vector<1x4x32x128xf32>
    %358 = vector.shape_cast %357 : vector<1x4x32x128xf32> to vector<4x32x128xf32>
    %359 = vector.shape_cast %356 : vector<1x128xf32> to vector<1x1x128xf32>
    %360 = vector.broadcast %359 : vector<1x1x128xf32> to vector<4x32x128xf32>
    %361 = arith.mulf %358, %360 : vector<4x32x128xf32>
    %362 = arith.addf %355, %361 : vector<4x32x128xf32>
    %363 = vector.extract_strided_slice %88 {offsets = [4, 0], sizes = [1, 128], strides = [1, 1]} : vector<9x128xf32> to vector<1x128xf32>
    %c17_227 = arith.constant 17 : index
    %c0_228 = arith.constant 0 : index
    %c0_229 = arith.constant 0 : index
    %364 = vector.load %arg10[%c17_227, %c0_228, %c0_229] : memref<34x32x128xf32, #tpu.memory_space<vmem>>, vector<4x32x128xf32>
    %365 = vector.shape_cast %363 : vector<1x128xf32> to vector<1x1x128xf32>
    %366 = vector.broadcast %365 : vector<1x1x128xf32> to vector<4x32x128xf32>
    %367 = arith.mulf %364, %366 : vector<4x32x128xf32>
    %368 = arith.addf %362, %367 : vector<4x32x128xf32>
    %369 = vector.extract_strided_slice %88 {offsets = [5, 0], sizes = [1, 128], strides = [1, 1]} : vector<9x128xf32> to vector<1x128xf32>
    %c17_230 = arith.constant 17 : index
    %c0_231 = arith.constant 0 : index
    %c0_232 = arith.constant 0 : index
    %370 = vector.load %arg11[%c17_230, %c0_231, %c0_232] : memref<34x32x128xf32, #tpu.memory_space<vmem>>, vector<4x32x128xf32>
    %371 = vector.shape_cast %369 : vector<1x128xf32> to vector<1x1x128xf32>
    %372 = vector.broadcast %371 : vector<1x1x128xf32> to vector<4x32x128xf32>
    %373 = arith.mulf %370, %372 : vector<4x32x128xf32>
    %374 = arith.addf %368, %373 : vector<4x32x128xf32>
    %375 = vector.extract_strided_slice %88 {offsets = [6, 0], sizes = [1, 128], strides = [1, 1]} : vector<9x128xf32> to vector<1x128xf32>
    %c0_233 = arith.constant 0 : index
    %c18 = arith.constant 18 : index
    %c0_234 = arith.constant 0 : index
    %c0_235 = arith.constant 0 : index
    %376 = vector.load %arg2[%c0_233, %c18, %c0_234, %c0_235] : memref<1x34x34x128xf32, #tpu.memory_space<vmem>>, vector<1x4x32x128xf32>
    %377 = vector.shape_cast %376 : vector<1x4x32x128xf32> to vector<4x32x128xf32>
    %378 = vector.shape_cast %375 : vector<1x128xf32> to vector<1x1x128xf32>
    %379 = vector.broadcast %378 : vector<1x1x128xf32> to vector<4x32x128xf32>
    %380 = arith.mulf %377, %379 : vector<4x32x128xf32>
    %381 = arith.addf %374, %380 : vector<4x32x128xf32>
    %382 = vector.extract_strided_slice %88 {offsets = [7, 0], sizes = [1, 128], strides = [1, 1]} : vector<9x128xf32> to vector<1x128xf32>
    %c18_236 = arith.constant 18 : index
    %c0_237 = arith.constant 0 : index
    %c0_238 = arith.constant 0 : index
    %383 = vector.load %arg10[%c18_236, %c0_237, %c0_238] : memref<34x32x128xf32, #tpu.memory_space<vmem>>, vector<4x32x128xf32>
    %384 = vector.shape_cast %382 : vector<1x128xf32> to vector<1x1x128xf32>
    %385 = vector.broadcast %384 : vector<1x1x128xf32> to vector<4x32x128xf32>
    %386 = arith.mulf %383, %385 : vector<4x32x128xf32>
    %387 = arith.addf %381, %386 : vector<4x32x128xf32>
    %388 = vector.extract_strided_slice %88 {offsets = [8, 0], sizes = [1, 128], strides = [1, 1]} : vector<9x128xf32> to vector<1x128xf32>
    %c18_239 = arith.constant 18 : index
    %c0_240 = arith.constant 0 : index
    %c0_241 = arith.constant 0 : index
    %389 = vector.load %arg11[%c18_239, %c0_240, %c0_241] : memref<34x32x128xf32, #tpu.memory_space<vmem>>, vector<4x32x128xf32>
    %390 = vector.shape_cast %388 : vector<1x128xf32> to vector<1x1x128xf32>
    %391 = vector.broadcast %390 : vector<1x1x128xf32> to vector<4x32x128xf32>
    %392 = arith.mulf %389, %391 : vector<4x32x128xf32>
    %393 = arith.addf %387, %392 : vector<4x32x128xf32>
    %394 = vector.shape_cast %89 : vector<1x128xf32> to vector<1x1x128xf32>
    %395 = vector.broadcast %394 : vector<1x1x128xf32> to vector<4x32x128xf32>
    %396 = arith.addf %393, %395 : vector<4x32x128xf32>
    %c0_242 = arith.constant 0 : index
    %c16_243 = arith.constant 16 : index
    %c0_244 = arith.constant 0 : index
    %c0_245 = arith.constant 0 : index
    %397 = vector.load %arg7[%c0_242, %c16_243, %c0_244, %c0_245] : memref<1x32x32x128xf32, #tpu.memory_space<vmem>>, vector<1x4x32x128xf32>
    %398 = vector.shape_cast %397 : vector<1x4x32x128xf32> to vector<4x32x128xf32>
    %399 = vector.shape_cast %396 : vector<4x32x128xf32> to vector<1x4x32x128xf32>
    tpu.vector_store %arg7[%c0_242, %c16_243, %c0_244, %c0_245], %399 {strides = array<i32>} : memref<1x32x32x128xf32, #tpu.memory_space<vmem>>, vector<1x4x32x128xf32>,
    %400 = vector.extract_strided_slice %88 {offsets = [0, 0], sizes = [1, 128], strides = [1, 1]} : vector<9x128xf32> to vector<1x128xf32>
    %c0_246 = arith.constant 0 : index
    %c20 = arith.constant 20 : index
    %c0_247 = arith.constant 0 : index
    %c0_248 = arith.constant 0 : index
    %401 = vector.load %arg2[%c0_246, %c20, %c0_247, %c0_248] : memref<1x34x34x128xf32, #tpu.memory_space<vmem>>, vector<1x4x32x128xf32>
    %402 = vector.shape_cast %401 : vector<1x4x32x128xf32> to vector<4x32x128xf32>
    %403 = vector.shape_cast %400 : vector<1x128xf32> to vector<1x1x128xf32>
    %404 = vector.broadcast %403 : vector<1x1x128xf32> to vector<4x32x128xf32>
    %405 = arith.mulf %402, %404 : vector<4x32x128xf32>
    %406 = vector.extract_strided_slice %88 {offsets = [1, 0], sizes = [1, 128], strides = [1, 1]} : vector<9x128xf32> to vector<1x128xf32>
    %c20_249 = arith.constant 20 : index
    %c0_250 = arith.constant 0 : index
    %c0_251 = arith.constant 0 : index
    %407 = vector.load %arg10[%c20_249, %c0_250, %c0_251] : memref<34x32x128xf32, #tpu.memory_space<vmem>>, vector<4x32x128xf32>
    %408 = vector.shape_cast %406 : vector<1x128xf32> to vector<1x1x128xf32>
    %409 = vector.broadcast %408 : vector<1x1x128xf32> to vector<4x32x128xf32>
    %410 = arith.mulf %407, %409 : vector<4x32x128xf32>
    %411 = arith.addf %405, %410 : vector<4x32x128xf32>
    %412 = vector.extract_strided_slice %88 {offsets = [2, 0], sizes = [1, 128], strides = [1, 1]} : vector<9x128xf32> to vector<1x128xf32>
    %c20_252 = arith.constant 20 : index
    %c0_253 = arith.constant 0 : index
    %c0_254 = arith.constant 0 : index
    %413 = vector.load %arg11[%c20_252, %c0_253, %c0_254] : memref<34x32x128xf32, #tpu.memory_space<vmem>>, vector<4x32x128xf32>
    %414 = vector.shape_cast %412 : vector<1x128xf32> to vector<1x1x128xf32>
    %415 = vector.broadcast %414 : vector<1x1x128xf32> to vector<4x32x128xf32>
    %416 = arith.mulf %413, %415 : vector<4x32x128xf32>
    %417 = arith.addf %411, %416 : vector<4x32x128xf32>
    %418 = vector.extract_strided_slice %88 {offsets = [3, 0], sizes = [1, 128], strides = [1, 1]} : vector<9x128xf32> to vector<1x128xf32>
    %c0_255 = arith.constant 0 : index
    %c21 = arith.constant 21 : index
    %c0_256 = arith.constant 0 : index
    %c0_257 = arith.constant 0 : index
    %419 = vector.load %arg2[%c0_255, %c21, %c0_256, %c0_257] : memref<1x34x34x128xf32, #tpu.memory_space<vmem>>, vector<1x4x32x128xf32>
    %420 = vector.shape_cast %419 : vector<1x4x32x128xf32> to vector<4x32x128xf32>
    %421 = vector.shape_cast %418 : vector<1x128xf32> to vector<1x1x128xf32>
    %422 = vector.broadcast %421 : vector<1x1x128xf32> to vector<4x32x128xf32>
    %423 = arith.mulf %420, %422 : vector<4x32x128xf32>
    %424 = arith.addf %417, %423 : vector<4x32x128xf32>
    %425 = vector.extract_strided_slice %88 {offsets = [4, 0], sizes = [1, 128], strides = [1, 1]} : vector<9x128xf32> to vector<1x128xf32>
    %c21_258 = arith.constant 21 : index
    %c0_259 = arith.constant 0 : index
    %c0_260 = arith.constant 0 : index
    %426 = vector.load %arg10[%c21_258, %c0_259, %c0_260] : memref<34x32x128xf32, #tpu.memory_space<vmem>>, vector<4x32x128xf32>
    %427 = vector.shape_cast %425 : vector<1x128xf32> to vector<1x1x128xf32>
    %428 = vector.broadcast %427 : vector<1x1x128xf32> to vector<4x32x128xf32>
    %429 = arith.mulf %426, %428 : vector<4x32x128xf32>
    %430 = arith.addf %424, %429 : vector<4x32x128xf32>
    %431 = vector.extract_strided_slice %88 {offsets = [5, 0], sizes = [1, 128], strides = [1, 1]} : vector<9x128xf32> to vector<1x128xf32>
    %c21_261 = arith.constant 21 : index
    %c0_262 = arith.constant 0 : index
    %c0_263 = arith.constant 0 : index
    %432 = vector.load %arg11[%c21_261, %c0_262, %c0_263] : memref<34x32x128xf32, #tpu.memory_space<vmem>>, vector<4x32x128xf32>
    %433 = vector.shape_cast %431 : vector<1x128xf32> to vector<1x1x128xf32>
    %434 = vector.broadcast %433 : vector<1x1x128xf32> to vector<4x32x128xf32>
    %435 = arith.mulf %432, %434 : vector<4x32x128xf32>
    %436 = arith.addf %430, %435 : vector<4x32x128xf32>
    %437 = vector.extract_strided_slice %88 {offsets = [6, 0], sizes = [1, 128], strides = [1, 1]} : vector<9x128xf32> to vector<1x128xf32>
    %c0_264 = arith.constant 0 : index
    %c22 = arith.constant 22 : index
    %c0_265 = arith.constant 0 : index
    %c0_266 = arith.constant 0 : index
    %438 = vector.load %arg2[%c0_264, %c22, %c0_265, %c0_266] : memref<1x34x34x128xf32, #tpu.memory_space<vmem>>, vector<1x4x32x128xf32>
    %439 = vector.shape_cast %438 : vector<1x4x32x128xf32> to vector<4x32x128xf32>
    %440 = vector.shape_cast %437 : vector<1x128xf32> to vector<1x1x128xf32>
    %441 = vector.broadcast %440 : vector<1x1x128xf32> to vector<4x32x128xf32>
    %442 = arith.mulf %439, %441 : vector<4x32x128xf32>
    %443 = arith.addf %436, %442 : vector<4x32x128xf32>
    %444 = vector.extract_strided_slice %88 {offsets = [7, 0], sizes = [1, 128], strides = [1, 1]} : vector<9x128xf32> to vector<1x128xf32>
    %c22_267 = arith.constant 22 : index
    %c0_268 = arith.constant 0 : index
    %c0_269 = arith.constant 0 : index
    %445 = vector.load %arg10[%c22_267, %c0_268, %c0_269] : memref<34x32x128xf32, #tpu.memory_space<vmem>>, vector<4x32x128xf32>
    %446 = vector.shape_cast %444 : vector<1x128xf32> to vector<1x1x128xf32>
    %447 = vector.broadcast %446 : vector<1x1x128xf32> to vector<4x32x128xf32>
    %448 = arith.mulf %445, %447 : vector<4x32x128xf32>
    %449 = arith.addf %443, %448 : vector<4x32x128xf32>
    %450 = vector.extract_strided_slice %88 {offsets = [8, 0], sizes = [1, 128], strides = [1, 1]} : vector<9x128xf32> to vector<1x128xf32>
    %c22_270 = arith.constant 22 : index
    %c0_271 = arith.constant 0 : index
    %c0_272 = arith.constant 0 : index
    %451 = vector.load %arg11[%c22_270, %c0_271, %c0_272] : memref<34x32x128xf32, #tpu.memory_space<vmem>>, vector<4x32x128xf32>
    %452 = vector.shape_cast %450 : vector<1x128xf32> to vector<1x1x128xf32>
    %453 = vector.broadcast %452 : vector<1x1x128xf32> to vector<4x32x128xf32>
    %454 = arith.mulf %451, %453 : vector<4x32x128xf32>
    %455 = arith.addf %449, %454 : vector<4x32x128xf32>
    %456 = vector.shape_cast %89 : vector<1x128xf32> to vector<1x1x128xf32>
    %457 = vector.broadcast %456 : vector<1x1x128xf32> to vector<4x32x128xf32>
    %458 = arith.addf %455, %457 : vector<4x32x128xf32>
    %c0_273 = arith.constant 0 : index
    %c20_274 = arith.constant 20 : index
    %c0_275 = arith.constant 0 : index
    %c0_276 = arith.constant 0 : index
    %459 = vector.load %arg7[%c0_273, %c20_274, %c0_275, %c0_276] : memref<1x32x32x128xf32, #tpu.memory_space<vmem>>, vector<1x4x32x128xf32>
    %460 = vector.shape_cast %459 : vector<1x4x32x128xf32> to vector<4x32x128xf32>
    %461 = vector.shape_cast %458 : vector<4x32x128xf32> to vector<1x4x32x128xf32>
    tpu.vector_store %arg7[%c0_273, %c20_274, %c0_275, %c0_276], %461 {strides = array<i32>} : memref<1x32x32x128xf32, #tpu.memory_space<vmem>>, vector<1x4x32x128xf32>,
    %462 = vector.extract_strided_slice %88 {offsets = [0, 0], sizes = [1, 128], strides = [1, 1]} : vector<9x128xf32> to vector<1x128xf32>
    %c0_277 = arith.constant 0 : index
    %c24_278 = arith.constant 24 : index
    %c0_279 = arith.constant 0 : index
    %c0_280 = arith.constant 0 : index
    %463 = vector.load %arg2[%c0_277, %c24_278, %c0_279, %c0_280] : memref<1x34x34x128xf32, #tpu.memory_space<vmem>>, vector<1x4x32x128xf32>
    %464 = vector.shape_cast %463 : vector<1x4x32x128xf32> to vector<4x32x128xf32>
    %465 = vector.shape_cast %462 : vector<1x128xf32> to vector<1x1x128xf32>
    %466 = vector.broadcast %465 : vector<1x1x128xf32> to vector<4x32x128xf32>
    %467 = arith.mulf %464, %466 : vector<4x32x128xf32>
    %468 = vector.extract_strided_slice %88 {offsets = [1, 0], sizes = [1, 128], strides = [1, 1]} : vector<9x128xf32> to vector<1x128xf32>
    %c24_281 = arith.constant 24 : index
    %c0_282 = arith.constant 0 : index
    %c0_283 = arith.constant 0 : index
    %469 = vector.load %arg10[%c24_281, %c0_282, %c0_283] : memref<34x32x128xf32, #tpu.memory_space<vmem>>, vector<4x32x128xf32>
    %470 = vector.shape_cast %468 : vector<1x128xf32> to vector<1x1x128xf32>
    %471 = vector.broadcast %470 : vector<1x1x128xf32> to vector<4x32x128xf32>
    %472 = arith.mulf %469, %471 : vector<4x32x128xf32>
    %473 = arith.addf %467, %472 : vector<4x32x128xf32>
    %474 = vector.extract_strided_slice %88 {offsets = [2, 0], sizes = [1, 128], strides = [1, 1]} : vector<9x128xf32> to vector<1x128xf32>
    %c24_284 = arith.constant 24 : index
    %c0_285 = arith.constant 0 : index
    %c0_286 = arith.constant 0 : index
    %475 = vector.load %arg11[%c24_284, %c0_285, %c0_286] : memref<34x32x128xf32, #tpu.memory_space<vmem>>, vector<4x32x128xf32>
    %476 = vector.shape_cast %474 : vector<1x128xf32> to vector<1x1x128xf32>
    %477 = vector.broadcast %476 : vector<1x1x128xf32> to vector<4x32x128xf32>
    %478 = arith.mulf %475, %477 : vector<4x32x128xf32>
    %479 = arith.addf %473, %478 : vector<4x32x128xf32>
    %480 = vector.extract_strided_slice %88 {offsets = [3, 0], sizes = [1, 128], strides = [1, 1]} : vector<9x128xf32> to vector<1x128xf32>
    %c0_287 = arith.constant 0 : index
    %c25 = arith.constant 25 : index
    %c0_288 = arith.constant 0 : index
    %c0_289 = arith.constant 0 : index
    %481 = vector.load %arg2[%c0_287, %c25, %c0_288, %c0_289] : memref<1x34x34x128xf32, #tpu.memory_space<vmem>>, vector<1x4x32x128xf32>
    %482 = vector.shape_cast %481 : vector<1x4x32x128xf32> to vector<4x32x128xf32>
    %483 = vector.shape_cast %480 : vector<1x128xf32> to vector<1x1x128xf32>
    %484 = vector.broadcast %483 : vector<1x1x128xf32> to vector<4x32x128xf32>
    %485 = arith.mulf %482, %484 : vector<4x32x128xf32>
    %486 = arith.addf %479, %485 : vector<4x32x128xf32>
    %487 = vector.extract_strided_slice %88 {offsets = [4, 0], sizes = [1, 128], strides = [1, 1]} : vector<9x128xf32> to vector<1x128xf32>
    %c25_290 = arith.constant 25 : index
    %c0_291 = arith.constant 0 : index
    %c0_292 = arith.constant 0 : index
    %488 = vector.load %arg10[%c25_290, %c0_291, %c0_292] : memref<34x32x128xf32, #tpu.memory_space<vmem>>, vector<4x32x128xf32>
    %489 = vector.shape_cast %487 : vector<1x128xf32> to vector<1x1x128xf32>
    %490 = vector.broadcast %489 : vector<1x1x128xf32> to vector<4x32x128xf32>
    %491 = arith.mulf %488, %490 : vector<4x32x128xf32>
    %492 = arith.addf %486, %491 : vector<4x32x128xf32>
    %493 = vector.extract_strided_slice %88 {offsets = [5, 0], sizes = [1, 128], strides = [1, 1]} : vector<9x128xf32> to vector<1x128xf32>
    %c25_293 = arith.constant 25 : index
    %c0_294 = arith.constant 0 : index
    %c0_295 = arith.constant 0 : index
    %494 = vector.load %arg11[%c25_293, %c0_294, %c0_295] : memref<34x32x128xf32, #tpu.memory_space<vmem>>, vector<4x32x128xf32>
    %495 = vector.shape_cast %493 : vector<1x128xf32> to vector<1x1x128xf32>
    %496 = vector.broadcast %495 : vector<1x1x128xf32> to vector<4x32x128xf32>
    %497 = arith.mulf %494, %496 : vector<4x32x128xf32>
    %498 = arith.addf %492, %497 : vector<4x32x128xf32>
    %499 = vector.extract_strided_slice %88 {offsets = [6, 0], sizes = [1, 128], strides = [1, 1]} : vector<9x128xf32> to vector<1x128xf32>
    %c0_296 = arith.constant 0 : index
    %c26 = arith.constant 26 : index
    %c0_297 = arith.constant 0 : index
    %c0_298 = arith.constant 0 : index
    %500 = vector.load %arg2[%c0_296, %c26, %c0_297, %c0_298] : memref<1x34x34x128xf32, #tpu.memory_space<vmem>>, vector<1x4x32x128xf32>
    %501 = vector.shape_cast %500 : vector<1x4x32x128xf32> to vector<4x32x128xf32>
    %502 = vector.shape_cast %499 : vector<1x128xf32> to vector<1x1x128xf32>
    %503 = vector.broadcast %502 : vector<1x1x128xf32> to vector<4x32x128xf32>
    %504 = arith.mulf %501, %503 : vector<4x32x128xf32>
    %505 = arith.addf %498, %504 : vector<4x32x128xf32>
    %506 = vector.extract_strided_slice %88 {offsets = [7, 0], sizes = [1, 128], strides = [1, 1]} : vector<9x128xf32> to vector<1x128xf32>
    %c26_299 = arith.constant 26 : index
    %c0_300 = arith.constant 0 : index
    %c0_301 = arith.constant 0 : index
    %507 = vector.load %arg10[%c26_299, %c0_300, %c0_301] : memref<34x32x128xf32, #tpu.memory_space<vmem>>, vector<4x32x128xf32>
    %508 = vector.shape_cast %506 : vector<1x128xf32> to vector<1x1x128xf32>
    %509 = vector.broadcast %508 : vector<1x1x128xf32> to vector<4x32x128xf32>
    %510 = arith.mulf %507, %509 : vector<4x32x128xf32>
    %511 = arith.addf %505, %510 : vector<4x32x128xf32>
    %512 = vector.extract_strided_slice %88 {offsets = [8, 0], sizes = [1, 128], strides = [1, 1]} : vector<9x128xf32> to vector<1x128xf32>
    %c26_302 = arith.constant 26 : index
    %c0_303 = arith.constant 0 : index
    %c0_304 = arith.constant 0 : index
    %513 = vector.load %arg11[%c26_302, %c0_303, %c0_304] : memref<34x32x128xf32, #tpu.memory_space<vmem>>, vector<4x32x128xf32>
    %514 = vector.shape_cast %512 : vector<1x128xf32> to vector<1x1x128xf32>
    %515 = vector.broadcast %514 : vector<1x1x128xf32> to vector<4x32x128xf32>
    %516 = arith.mulf %513, %515 : vector<4x32x128xf32>
    %517 = arith.addf %511, %516 : vector<4x32x128xf32>
    %518 = vector.shape_cast %89 : vector<1x128xf32> to vector<1x1x128xf32>
    %519 = vector.broadcast %518 : vector<1x1x128xf32> to vector<4x32x128xf32>
    %520 = arith.addf %517, %519 : vector<4x32x128xf32>
    %c0_305 = arith.constant 0 : index
    %c24_306 = arith.constant 24 : index
    %c0_307 = arith.constant 0 : index
    %c0_308 = arith.constant 0 : index
    %521 = vector.load %arg7[%c0_305, %c24_306, %c0_307, %c0_308] : memref<1x32x32x128xf32, #tpu.memory_space<vmem>>, vector<1x4x32x128xf32>
    %522 = vector.shape_cast %521 : vector<1x4x32x128xf32> to vector<4x32x128xf32>
    %523 = vector.shape_cast %520 : vector<4x32x128xf32> to vector<1x4x32x128xf32>
    tpu.vector_store %arg7[%c0_305, %c24_306, %c0_307, %c0_308], %523 {strides = array<i32>} : memref<1x32x32x128xf32, #tpu.memory_space<vmem>>, vector<1x4x32x128xf32>,
    %524 = vector.extract_strided_slice %88 {offsets = [0, 0], sizes = [1, 128], strides = [1, 1]} : vector<9x128xf32> to vector<1x128xf32>
    %c0_309 = arith.constant 0 : index
    %c28 = arith.constant 28 : index
    %c0_310 = arith.constant 0 : index
    %c0_311 = arith.constant 0 : index
    %525 = vector.load %arg2[%c0_309, %c28, %c0_310, %c0_311] : memref<1x34x34x128xf32, #tpu.memory_space<vmem>>, vector<1x4x32x128xf32>
    %526 = vector.shape_cast %525 : vector<1x4x32x128xf32> to vector<4x32x128xf32>
    %527 = vector.shape_cast %524 : vector<1x128xf32> to vector<1x1x128xf32>
    %528 = vector.broadcast %527 : vector<1x1x128xf32> to vector<4x32x128xf32>
    %529 = arith.mulf %526, %528 : vector<4x32x128xf32>
    %530 = vector.extract_strided_slice %88 {offsets = [1, 0], sizes = [1, 128], strides = [1, 1]} : vector<9x128xf32> to vector<1x128xf32>
    %c28_312 = arith.constant 28 : index
    %c0_313 = arith.constant 0 : index
    %c0_314 = arith.constant 0 : index
    %531 = vector.load %arg10[%c28_312, %c0_313, %c0_314] : memref<34x32x128xf32, #tpu.memory_space<vmem>>, vector<4x32x128xf32>
    %532 = vector.shape_cast %530 : vector<1x128xf32> to vector<1x1x128xf32>
    %533 = vector.broadcast %532 : vector<1x1x128xf32> to vector<4x32x128xf32>
    %534 = arith.mulf %531, %533 : vector<4x32x128xf32>
    %535 = arith.addf %529, %534 : vector<4x32x128xf32>
    %536 = vector.extract_strided_slice %88 {offsets = [2, 0], sizes = [1, 128], strides = [1, 1]} : vector<9x128xf32> to vector<1x128xf32>
    %c28_315 = arith.constant 28 : index
    %c0_316 = arith.constant 0 : index
    %c0_317 = arith.constant 0 : index
    %537 = vector.load %arg11[%c28_315, %c0_316, %c0_317] : memref<34x32x128xf32, #tpu.memory_space<vmem>>, vector<4x32x128xf32>
    %538 = vector.shape_cast %536 : vector<1x128xf32> to vector<1x1x128xf32>
    %539 = vector.broadcast %538 : vector<1x1x128xf32> to vector<4x32x128xf32>
    %540 = arith.mulf %537, %539 : vector<4x32x128xf32>
    %541 = arith.addf %535, %540 : vector<4x32x128xf32>
    %542 = vector.extract_strided_slice %88 {offsets = [3, 0], sizes = [1, 128], strides = [1, 1]} : vector<9x128xf32> to vector<1x128xf32>
    %c0_318 = arith.constant 0 : index
    %c29 = arith.constant 29 : index
    %c0_319 = arith.constant 0 : index
    %c0_320 = arith.constant 0 : index
    %543 = vector.load %arg2[%c0_318, %c29, %c0_319, %c0_320] : memref<1x34x34x128xf32, #tpu.memory_space<vmem>>, vector<1x4x32x128xf32>
    %544 = vector.shape_cast %543 : vector<1x4x32x128xf32> to vector<4x32x128xf32>
    %545 = vector.shape_cast %542 : vector<1x128xf32> to vector<1x1x128xf32>
    %546 = vector.broadcast %545 : vector<1x1x128xf32> to vector<4x32x128xf32>
    %547 = arith.mulf %544, %546 : vector<4x32x128xf32>
    %548 = arith.addf %541, %547 : vector<4x32x128xf32>
    %549 = vector.extract_strided_slice %88 {offsets = [4, 0], sizes = [1, 128], strides = [1, 1]} : vector<9x128xf32> to vector<1x128xf32>
    %c29_321 = arith.constant 29 : index
    %c0_322 = arith.constant 0 : index
    %c0_323 = arith.constant 0 : index
    %550 = vector.load %arg10[%c29_321, %c0_322, %c0_323] : memref<34x32x128xf32, #tpu.memory_space<vmem>>, vector<4x32x128xf32>
    %551 = vector.shape_cast %549 : vector<1x128xf32> to vector<1x1x128xf32>
    %552 = vector.broadcast %551 : vector<1x1x128xf32> to vector<4x32x128xf32>
    %553 = arith.mulf %550, %552 : vector<4x32x128xf32>
    %554 = arith.addf %548, %553 : vector<4x32x128xf32>
    %555 = vector.extract_strided_slice %88 {offsets = [5, 0], sizes = [1, 128], strides = [1, 1]} : vector<9x128xf32> to vector<1x128xf32>
    %c29_324 = arith.constant 29 : index
    %c0_325 = arith.constant 0 : index
    %c0_326 = arith.constant 0 : index
    %556 = vector.load %arg11[%c29_324, %c0_325, %c0_326] : memref<34x32x128xf32, #tpu.memory_space<vmem>>, vector<4x32x128xf32>
    %557 = vector.shape_cast %555 : vector<1x128xf32> to vector<1x1x128xf32>
    %558 = vector.broadcast %557 : vector<1x1x128xf32> to vector<4x32x128xf32>
    %559 = arith.mulf %556, %558 : vector<4x32x128xf32>
    %560 = arith.addf %554, %559 : vector<4x32x128xf32>
    %561 = vector.extract_strided_slice %88 {offsets = [6, 0], sizes = [1, 128], strides = [1, 1]} : vector<9x128xf32> to vector<1x128xf32>
    %c0_327 = arith.constant 0 : index
    %c30 = arith.constant 30 : index
    %c0_328 = arith.constant 0 : index
    %c0_329 = arith.constant 0 : index
    %562 = vector.load %arg2[%c0_327, %c30, %c0_328, %c0_329] : memref<1x34x34x128xf32, #tpu.memory_space<vmem>>, vector<1x4x32x128xf32>
    %563 = vector.shape_cast %562 : vector<1x4x32x128xf32> to vector<4x32x128xf32>
    %564 = vector.shape_cast %561 : vector<1x128xf32> to vector<1x1x128xf32>
    %565 = vector.broadcast %564 : vector<1x1x128xf32> to vector<4x32x128xf32>
    %566 = arith.mulf %563, %565 : vector<4x32x128xf32>
    %567 = arith.addf %560, %566 : vector<4x32x128xf32>
    %568 = vector.extract_strided_slice %88 {offsets = [7, 0], sizes = [1, 128], strides = [1, 1]} : vector<9x128xf32> to vector<1x128xf32>
    %c30_330 = arith.constant 30 : index
    %c0_331 = arith.constant 0 : index
    %c0_332 = arith.constant 0 : index
    %569 = vector.load %arg10[%c30_330, %c0_331, %c0_332] : memref<34x32x128xf32, #tpu.memory_space<vmem>>, vector<4x32x128xf32>
    %570 = vector.shape_cast %568 : vector<1x128xf32> to vector<1x1x128xf32>
    %571 = vector.broadcast %570 : vector<1x1x128xf32> to vector<4x32x128xf32>
    %572 = arith.mulf %569, %571 : vector<4x32x128xf32>
    %573 = arith.addf %567, %572 : vector<4x32x128xf32>
    %574 = vector.extract_strided_slice %88 {offsets = [8, 0], sizes = [1, 128], strides = [1, 1]} : vector<9x128xf32> to vector<1x128xf32>
    %c30_333 = arith.constant 30 : index
    %c0_334 = arith.constant 0 : index
    %c0_335 = arith.constant 0 : index
    %575 = vector.load %arg11[%c30_333, %c0_334, %c0_335] : memref<34x32x128xf32, #tpu.memory_space<vmem>>, vector<4x32x128xf32>
    %576 = vector.shape_cast %574 : vector<1x128xf32> to vector<1x1x128xf32>
    %577 = vector.broadcast %576 : vector<1x1x128xf32> to vector<4x32x128xf32>
    %578 = arith.mulf %575, %577 : vector<4x32x128xf32>
    %579 = arith.addf %573, %578 : vector<4x32x128xf32>
    %580 = vector.shape_cast %89 : vector<1x128xf32> to vector<1x1x128xf32>
    %581 = vector.broadcast %580 : vector<1x1x128xf32> to vector<4x32x128xf32>
    %582 = arith.addf %579, %581 : vector<4x32x128xf32>
    %c0_336 = arith.constant 0 : index
    %c28_337 = arith.constant 28 : index
    %c0_338 = arith.constant 0 : index
    %c0_339 = arith.constant 0 : index
    %583 = vector.load %arg7[%c0_336, %c28_337, %c0_338, %c0_339] : memref<1x32x32x128xf32, #tpu.memory_space<vmem>>, vector<1x4x32x128xf32>
    %584 = vector.shape_cast %583 : vector<1x4x32x128xf32> to vector<4x32x128xf32>
    %585 = vector.shape_cast %582 : vector<4x32x128xf32> to vector<1x4x32x128xf32>
    tpu.vector_store %arg7[%c0_336, %c28_337, %c0_338, %c0_339], %585 {strides = array<i32>} : memref<1x32x32x128xf32, #tpu.memory_space<vmem>>, vector<1x4x32x128xf32>,
    return
  }
  func.func @transform_0(%arg0: i32, %arg1: i32) -> (i32, i32, i32, i32) {
    %c0_i32 = arith.constant 0 : i32
    %c0_i32_0 = arith.constant 0 : i32
    %c0_i32_1 = arith.constant 0 : i32
    %c0_i32_2 = arith.constant 0 : i32
    return %arg0, %c0_i32, %c0_i32_0, %c0_i32_1 : i32, i32, i32, i32
  }
  func.func @transform_1(%arg0: i32, %arg1: i32) -> (i32, i32, i32) {
    %c0_i32 = arith.constant 0 : i32
    %c0_i32_0 = arith.constant 0 : i32
    %c0_i32_1 = arith.constant 0 : i32
    return %c0_i32, %c0_i32_0, %arg0 : i32, i32, i32
  }
  func.func @transform_2(%arg0: i32, %arg1: i32) -> (i32, i32, i32) {
    %c1_i32 = arith.constant 1 : i32
    %c0_i32 = arith.constant 0 : i32
    %0 = arith.cmpi eq, %c1_i32, %c0_i32 : i32
    %c1_i32_0 = arith.constant 1 : i32
    %1 = arith.select %0, %c1_i32_0, %c1_i32 : i32
    %2 = arith.remsi %arg0, %1 : i32
    %c0_i32_1 = arith.constant 0 : i32
    %3 = arith.cmpi ne, %2, %c0_i32_1 : i32
    %c0_i32_2 = arith.constant 0 : i32
    %4 = arith.cmpi slt, %2, %c0_i32_2 : i32
    %c0_i32_3 = arith.constant 0 : i32
    %5 = arith.cmpi slt, %1, %c0_i32_3 : i32
    %6 = arith.xori %4, %5 : i1
    %7 = arith.andi %6, %3 : i1
    %8 = arith.addi %2, %1 : i32
    %9 = arith.select %7, %8, %2 : i32
    %c0_i32_4 = arith.constant 0 : i32
    %c0_i32_5 = arith.constant 0 : i32
    %c0_i32_6 = arith.constant 0 : i32
    return %c0_i32_4, %c0_i32_5, %9 : i32, i32, i32
  }
  func.func @transform_3(%arg0: i32, %arg1: i32) -> (i32, i32, i32) {
    %c0_i32 = arith.constant 0 : i32
    %c0_i32_0 = arith.constant 0 : i32
    %c0_i32_1 = arith.constant 0 : i32
    return %c0_i32, %c0_i32_0, %arg0 : i32, i32, i32
  }
  func.func @transform_4(%arg0: i32, %arg1: i32) -> (i32, i32, i32) {
    %c1_i32 = arith.constant 1 : i32
    %c0_i32 = arith.constant 0 : i32
    %0 = arith.cmpi eq, %c1_i32, %c0_i32 : i32
    %c1_i32_0 = arith.constant 1 : i32
    %1 = arith.select %0, %c1_i32_0, %c1_i32 : i32
    %2 = arith.remsi %arg0, %1 : i32
    %c0_i32_1 = arith.constant 0 : i32
    %3 = arith.cmpi ne, %2, %c0_i32_1 : i32
    %c0_i32_2 = arith.constant 0 : i32
    %4 = arith.cmpi slt, %2, %c0_i32_2 : i32
    %c0_i32_3 = arith.constant 0 : i32
    %5 = arith.cmpi slt, %1, %c0_i32_3 : i32
    %6 = arith.xori %4, %5 : i1
    %7 = arith.andi %6, %3 : i1
    %8 = arith.addi %2, %1 : i32
    %9 = arith.select %7, %8, %2 : i32
    %c0_i32_4 = arith.constant 0 : i32
    %c0_i32_5 = arith.constant 0 : i32
    %c0_i32_6 = arith.constant 0 : i32
    return %c0_i32_4, %c0_i32_5, %9 : i32, i32, i32
  }
  func.func @transform_5(%arg0: i32, %arg1: i32) -> (i32, i32, i32, i32) {
    %c0_i32 = arith.constant 0 : i32
    %c0_i32_0 = arith.constant 0 : i32
    %c0_i32_1 = arith.constant 0 : i32
    return %arg0, %arg1, %c0_i32, %c0_i32_0 : i32, i32, i32, i32
  }
}

</mosaic_0001>

<bundles_post_ra>
// kernel: _lambda_.1
= control target key start
LH: loop header
LB: loop body
LE: loop exit
PB: predicated region body
PF: predicated region fallthrough
CT: control target
= control target key end

     0   :  { %10 = vsyncpa [#allocation9], 0  ;;  %s9458_s0 = inlined_call_operand.vmem [shape: f32[2,34,34,128], index: 0, kind: input, shape index: {}]   ;;  %s9459_s1 = inlined_call_operand.vmem [shape: f32[2,9,256], index: 1, kind: input, shape index: {}]   ;;  %s9460_s2 = inlined_call_operand.vmem [shape: f32[2,9,128], index: 2, kind: input, shape index: {}]   ;;  %s9461_s3 = inlined_call_operand.vmem [shape: f32[2,1,256], index: 3, kind: input, shape index: {}]   ;;  %s9462_s4 = inlined_call_operand.vmem [shape: f32[2,1,128], index: 4, kind: input, shape index: {}]   ;;  %s9463_s5 = inlined_call_operand.hbm [shape: f32[2,32,32,128], index: 5, kind: output, shape index: {}]  }
   0x1   :  { %12 = vsyncpa [#allocation9 + $0x1], 0  ;;  %s5704_s18 = smov 0   ;;  %s5706_s19 = smov 0  }
   0x2   :  { %s5708_s20 = smov 0   ;;  %s5710_s21 = smov 0  }
   0x3   :  { %s5712_s22 = smov 0   ;;  %s5714_s23 = smov 0  }
   0x4 LB: > { %s4797_s24 = sadd.s32 4294967295, %s5669_s23   ;;  %s4798_s25 = sadd.s32 4294967294, %s5669_s23   ;;  %s5669_s23 = sphi %s5714_s23, %s18_s23   ;;  %s5665_s22 = sphi %s5712_s22, %s9471_s22   ;;  %s5661_s21 = sphi %s5710_s21, %s9470_s21   ;;  %s5657_s20 = sphi %s5708_s20, %s9469_s20   ;;  %s5653_s19 = sphi %s5706_s19, %s9468_s19   ;;  %s5649_s18 = sphi %s5704_s18, %s9467_s18  }
   0x5   : > { %s30_s26 = sadd.s32 1, %s5665_s22  ;;  %s63_s27 = sadd.s32 1, %s5657_s20 }
   0x6   : > { %p32_p0 = scmp.ge.s32.totalorder %s30_s26, 2  ;;  %p70_p1 = scmp.ne.s32.totalorder %s5657_s20, %s5653_s19 }
   0x7   : > { %p71_p2 = scmp.eq.s32.totalorder %s5669_s23, 0  ;;  %p170_p3 = scmp.eq.s32.totalorder %s4797_s24, 1 }
   0x8   : > { %s9473_s26 = smov (%p32_p0, %s30_s26), 0  ;;  %p175_p6 = scmp.ne.s32.totalorder %s5653_s19, %s5649_s18 }
   0x9   : > { %p5743_p4 = por %p71_p2, %p70_p1  ;;  %p5747_p5 = por %p170_p3, %p70_p1 }
   0xa   : > { %s60_s30 = ssub.s32 %s5665_s22, %s9473_s26  ;;  %p176_p8 = scmp.eq.s32.totalorder %s4798_s25, 1 }
   0xb   : > { %p61_p7 = scmp.eq.s32.totalorder %s60_s30, 0  ;;  %p4800_p10 = scmp.ge.s32.totalorder %s5669_s23, 2 }
   0xc   : > { %p5758_p9 = por %p176_p8, %p175_p6 }
   0xd   : > { %s5756_s6 = scalar_select %p61_p7, %s5657_s20, %s63_s27  }
   0xe   : > { %198 = sbr.rel (%p4800_p10) target bundleno = 35 (0x23), region = 24 }
  0x15   : > { %209 = sbr.rel (!%p5743_p4) target bundleno = 28 (0x1c), region = 32  ;;  %s211_s8 = sand.u32 (%p5743_p4), 1, %s5657_s20  }
  0x16   : > { %s4802_s9 = sshll.u32 (%p5743_p4), %s5665_s22, 3  ;;  %s4801_s10 = sshll.u32 (%p5743_p4), %s211_s8, 5 }
  0x17   : > { %s215_s13 = scalar_lea.vmem (%p5743_p4), %s9459_s1, %s4802_s9  ;;  %s213_s14 = scalar_lea.vmem (%p5743_p4), [#allocation6], %s4801_s10 }
  0x18   : > { %v249_v0 = vld [vmem:[%s215_s13] sm:$0xff] (%p5743_p4)  ;;  %v251_v1 = vld [vmem:[%s215_s13 + $0x10] sm:$0xff] (%p5743_p4) }
  0x19   : > { %v253_v2 = vld [vmem:[%s215_s13 + $0x20] sm:$0xff] (%p5743_p4)  ;;  %250 = vst [vmem:[%s213_s14] sm:$0xff] (%p5743_p4), %v249_v0  ;;  %252 = vst [vmem:[%s213_s14 + $0x8] sm:$0xff] (%p5743_p4), %v251_v1  ;;  %v255_v3 = vld [vmem:[%s215_s13 + $0x30] sm:$0xff] (%p5743_p4) }
  0x1a   : > { %254 = vst [vmem:[%s213_s14 + $0x10] sm:$0xff] (%p5743_p4), %v253_v2  ;;  %256 = vst [vmem:[%s213_s14 + $0x18] sm:$0xff] (%p5743_p4), %v255_v3 }
  0x1c PF: > { %262 = sbr.rel (!%p5743_p4) target bundleno = 35 (0x23), region = 70  ;;  %s264_s15 = sand.u32 (%p5743_p4), 1, %s5657_s20  }
  0x1d   : > { %s267_s24 = scalar_lea.vmem (%p5743_p4), %s9461_s3, %s5665_s22  ;;  %s4803_s25 = sshll.u32 (%p5743_p4), %s264_s15, 1 }
  0x1e   : > { %v283_v4 = vld [vmem:[%s267_s24] sm:$0x1] (%p5743_p4)  ;;  %v285_v5 = vld [vmem:[%s267_s24 + $0x2] sm:$0x1] (%p5743_p4)  ;;  %s266_s27 = scalar_lea.vmem (%p5743_p4), [#allocation7], %s4803_s25 }
  0x1f   : > { %284 = vst [vmem:[%s266_s27] sm:$0x1] (%p5743_p4), %v283_v4  ;;  %286 = vst [vmem:[%s266_s27 + $0x1] sm:$0x1] (%p5743_p4), %v285_v5 }
  0x23 PF: > { %p4804_p11 = scmp.ge.s32.totalorder %s5669_s23, 1  ;;  %p304_p12 = scmp.lt.s32.totalorder %s5669_s23, 3 }
  0x25   : > { %p305_p13 = pnand %p4804_p11, %p304_p12 }
  0x26   : > { %s5782_s28 = sand.u32 (!%p305_p13), 1, %s5653_s19   ;;  %p354_p0 = scmp.lt.s32.totalorder (!%p305_p13), %s5661_s21, 1  ;;  %v364_v33 = vld [vmem:[%s9460_s2] sm:$0xff] (!%p305_p13)  ;;  %v366_v34 = vld [vmem:[%s9460_s2 + $0x10] sm:$0xff] (!%p305_p13)  ;;  %v995_v37 = vlaneseq (!%p305_p13)  ;;  %v365_v41 = vld [vmem:[%s9460_s2 + $0x8] sm:$0x1] (!%p305_p13) }
  0x27   : > { %308 = sbr.rel (%p305_p13) target bundleno = 675 (0x2a3), region = 104  ;;  %s4805_s30 = sshll.u32 (!%p305_p13), %s5782_s28, 5  ;;  %v367_v42 = vld [vmem:[%s9460_s2 + $0x18] sm:$0x1] (!%p305_p13)  ;;  %v402_v43 = vld [vmem:[%s9462_s4] sm:$0x1] (!%p305_p13) }
  0x28   : > { %s313_s8 = scalar_lea.vmem (!%p305_p13), [#allocation6], %s4805_s30  ;;  %s4806_s9 = sshll.u32 (!%p305_p13), %s5782_s28, 1  ;;  %v403_v44 = vld [vmem:[%s9462_s4 + $0x1] sm:$0x1] (!%p305_p13)  ;;  %v996_v45 = vshrl.u32 (!%p305_p13), %v995_v37, 7 }
  0x29   : > { %v360_v6 = vld [vmem:[%s313_s8] sm:$0xff] (!%p305_p13)  ;;  %v362_v7 = vld [vmem:[%s313_s8 + $0x10] sm:$0xff] (!%p305_p13)  ;;  %v361_v8 = vld [vmem:[%s313_s8 + $0x8] sm:$0x1] (!%p305_p13)  ;;  %s320_s10 = scalar_lea.vmem (!%p305_p13), [#allocation7], %s4806_s9  ;;  %s4807_s14 = sshll.u32 (!%p305_p13), %s5782_s28, 10 }
  0x2a   : > { %v368_v9 = vmax.f32 (!%p305_p13), %v360_v6, %v362_v7  ;;  %v363_v10 = vld [vmem:[%s313_s8 + $0x18] sm:$0x1] (!%p305_p13)  ;;  %v400_v11 = vld [vmem:[%s320_s10] sm:$0x1] (!%p305_p13)  ;;  %v401_v15 = vld [vmem:[%s320_s10 + $0x1] sm:$0x1] (!%p305_p13) }
  0x2b   : > { %v369_v14 = vmax.f32 (!%p305_p13), %v361_v8, %v363_v10  ;;  %v404_v16 = vmax.f32 (!%p305_p13), %v400_v11, %v401_v15  ;;  %v997_v51 = vsub.s32 (!%p305_p13), 0, %v996_v45  ;;  %v1033_v52 = vsub.s32 (!%p305_p13), 1, %v996_v45  ;;  %s5504_s16 = sshll.u32 (!%p305_p13), %s5661_s21, 14  ;;  %s5671_s8 = smov (!%p305_p13), [#allocation8]  }
  0x2c   : > { %v370_v12 = vsub.f32 (!%p305_p13), %v360_v6, %v368_v9  ;;  %v382_v13 = vsub.f32 (!%p305_p13), %v362_v7, %v368_v9  ;;  %v1085_v53 = vsub.s32 (!%p305_p13), 2, %v996_v45  ;;  %v1138_v55 = vsub.s32 (!%p305_p13), 3, %v996_v45  ;;  %s9404_s27 = scalar_lea.hbm (!%p305_p13), %s9463_s5, %s5504_s16  ;;  %s5595_s9 = sshll.u32 (!%p305_p13), %s5671_s8, 4  ;;  %s5596_s9 = int_to_ptr.vmem [resolvable:$false] %s5595_s9 }
  0x2d   : > { %v371_v19 = vsub.f32 (!%p305_p13), %v361_v8, %v369_v14  ;;  %v383_v20 = vsub.f32 (!%p305_p13), %v363_v10, %v369_v14  ;;  %v405_v21 = vsub.f32 (!%p305_p13), %v400_v11, %v404_v16  ;;  %v411_v22 = vsub.f32 (!%p305_p13), %v401_v15, %v404_v16 }
  0x2e   : > { %v372_v17 = vmul.f32 1.442695, %v370_v12  ;;  %v384_v18 = vmul.f32 1.442695, %v382_v13  ;;  %s355_s15 = scalar_select %p354_p0, %s5661_s21, 1  ;;  %v1191_v60 = vsub.s32 4, %v996_v45 }
  0x2f   : > { %v374_v23 = vmul.f32 1.442695, %v371_v19  ;;  %v386_v24 = vmul.f32 1.442695, %v383_v20  ;;  %v406_v25 = vmul.f32 1.442695, %v405_v21 }
  0x30   : > { %5563 = vpow2.f32 %v372_v17  ;;  %v412_v26 = vmul.f32 1.442695, %v411_v22  ;;  %s5505_s10 = smul.u32 1360, %s355_s15  ;;  %v1244_v2 = vsub.s32 5, %v996_v45  ;;  %v1297_v8 = vsub.s32 6, %v996_v45  ;;  %s5976_s15 = scalar_lea.vmem [#allocation8], %s4807_s14 }
  0x31   : > { %5565 = vpow2.f32 %v384_v18  ;;  %v1350_v9 = vsub.s32 7, %v996_v45  ;;  %s4689_s17 = sshll.u32 %s5976_s15, 4  ;;  %s4673_s21 = scalar_lea.sflag [#allocation9], %s5782_s28  ;;  %s9406_s17 = int_to_ptr.vmem [resolvable:$true] %s4689_s17 }
  0x32   : > { %5567 = vpow2.f32 %v374_v23  ;;  %s5809_s13 = scalar_lea.vmem %s9458_s0, %s5505_s10  ;;  %s5591_s30 = scalar_lea.vmem %s9406_s17, 16384 }
  0x33   : > { %5569 = vpow2.f32 %v386_v24  ;;  %v979_v61 = vld [vmem:[%s5809_s13] sm:$0xff]  ;;  %v5813_v62 = vld [vmem:[%s5809_s13 + $0x50] sm:$0xff]  ;;  %v980_v20 = vld [vmem:[%s5809_s13 + $0x8] sm:$0xff]  ;;  %p5592_p1 = scmp.ne.s32.totalorder %s9406_s17, %s5591_s30  ;;  %s5597_s10 = scalar_lea.vmem %s5596_s9, 32768 }
  0x34   : > { %5571 = vpow2.f32 %v406_v25  ;;  %v420_v3 = vld [vmem:[%s5809_s13 + $0x1] sm:$0xff]  ;;  %v428_v4 = vld [vmem:[%s5809_s13 + $0x51] sm:$0xff]  ;;  %v424_v15 = vld [vmem:[%s5809_s13 + $0x29] sm:$0xff]  ;;  %p5598_p4 = scmp.lt.s32.totalorder %s9406_s17, %s5596_s9  ;;  %p5599_p6 = scmp.lt.s32.totalorder %s5597_s10, %s5591_s30 }
  0x35   : > { %5573 = vpow2.f32 %v412_v26  ;;  %v700_v5 = vld [vmem:[%s5809_s13 + $0x2] sm:$0xff]  ;;  %v708_v16 = vld [vmem:[%s5809_s13 + $0x52] sm:$0xff]  ;;  %v704_v22 = vld [vmem:[%s5809_s13 + $0x2a] sm:$0xff]  ;;  %p5593_p2 = pnand %p5592_p1, %p5747_p5 }
  0x36   : > { %v5841_v23 = vld [vmem:[%s5809_s13 + $0x28] sm:$0xff]  ;;  %v5877_v45 = vld [vmem:[%s5809_s13 + $0x30] sm:$0xff]  ;;  %p5600_p7 = por %p5599_p6, %p5598_p4 }
  0x37   : > { %v421_v24 = vld [vmem:[%s5809_s13 + $0x9] sm:$0xff]  ;;  %p5594_p3 = pneg %p5593_p2 }
  0x39   : > { %p5601_p8 = pnand %p5600_p7, %p5594_p3 }
  0x3a   : > { %v5564_v27 = vpop.eup %5563 }
  0x3b   : > { %v5566_v28 = vpop.eup %5565  ;;  %v378_v39 = vmul.f32 %v5564_v27, %v364_v33 }
  0x3c   : > { %v5568_v29 = vpop.eup %5567  ;;  %v388_v30 = vadd.f32 %v5566_v28, %v5564_v27  ;;  %v390_v40 = vmul.f32 %v5566_v28, %v366_v34 }
  0x3d   : > { %v5570_v31 = vpop.eup %5569  ;;  %v379_v46 = vmul.f32 %v5568_v29, %v365_v41  ;;  %v425_v41 = vld [vmem:[%s5809_s13 + $0x31] sm:$0xff] }
  0x3e   : > { %v5572_v32 = vpop.eup %5571  ;;  %5575 = vrcp.f32 %v388_v30  ;;  %v389_v35 = vadd.f32 %v5570_v31, %v5568_v29  ;;  %v392_v47 = vadd.f32 %v390_v40, %v378_v39  ;;  %v391_v48 = vmul.f32 %v5570_v31, %v367_v42  ;;  %v5851_v29 = vld [vmem:[%s5809_s13 + $0x59] sm:$0xff]  ;;  %v701_v30 = vld [vmem:[%s5809_s13 + $0xa] sm:$0xff] }
  0x3f   : > { %v5574_v36 = vpop.eup %5573  ;;  %v409_v49 = vmul.f32 %v5572_v32, %v402_v43  ;;  %v5855_v31 = vld [vmem:[%s5809_s13 + $0x58] sm:$0xff] }
  0x40   : > { %5577 = vrcp.f32 %v389_v35  ;;  %v414_v38 = vadd.f32 %v5574_v36, %v5572_v32  ;;  %v415_v50 = vmul.f32 %v5574_v36, %v403_v44  ;;  %v393_v57 = vadd.f32 %v391_v48, %v379_v46  ;;  %v705_v48 = vld [vmem:[%s5809_s13 + $0x32] sm:$0xff] }
  0x42   : > { %5579 = vrcp.f32 %v414_v38  ;;  %v416_v58 = vadd.f32 %v415_v50, %v409_v49  ;;  %v709_v49 = vld [vmem:[%s5809_s13 + $0x5a] sm:$0xff] }
  0x48   : > { %v5576_v54 = vpop.eup %5575 }
  0x49   : > { %v395_v56 = vmul.f32 %v5576_v54, %v392_v47 }
  0x4a   : > { %v5578_v59 = vpop.eup %5577 }
  0x4b   : > { %v5815_v63 = vrot.slane %v395_v56, %v997_v51  ;;  %v5817_v0 = vrot.slane %v395_v56, %v1033_v52  ;;  %v5819_v1 = vrot.slane %v395_v56, %v1085_v53  ;;  %v5824_v7 = vrot.slane %v395_v56, %v1138_v55 }
  0x4c   : > { %v5580_v6 = vpop.eup %5579  ;;  %v397_v10 = vmul.f32 %v5578_v59, %v393_v57  ;;  %v5829_v14 = vrot.slane %v395_v56, %v1191_v60  ;;  %v5837_v21 = vrot.slane %v395_v56, %v1244_v2  ;;  %v5844_v25 = vrot.slane %v395_v56, %v1297_v8  ;;  %v422_v2 = vld [vmem:[%s5809_s13 + $0x11] sm:$0xff] }
  0x4d   : > { %v418_v11 = vmul.f32 %v5580_v6, %v416_v58  ;;  %v999_v12 = vmul.f32 %v5815_v63, %v979_v61  ;;  %v1007_v13 = vmul.f32 %v5815_v63, %v5813_v62  ;;  %v1035_v17 = vmul.f32 %v5817_v0, %v420_v3  ;;  %v702_v3 = vld [vmem:[%s5809_s13 + $0x12] sm:$0xff] }
  0x4e   : > { %v1043_v18 = vmul.f32 %v5817_v0, %v428_v4  ;;  %v1087_v19 = vmul.f32 %v5819_v1, %v700_v5  ;;  %399 = vst [vmem:[#allocation2 + $0x8] sm:$0x1] %v397_v10  ;;  %v5846_v26 = vrot.slane %v395_v56, %v1350_v9  ;;  %v1140_v28 = vmul.f32 %v5841_v23, %v5824_v7  ;;  %v981_v56 = vld [vmem:[%s5809_s13 + $0x10] sm:$0xff]  ;;  %v5910_v9 = vld [vmem:[%s5809_s13 + $0x61] sm:$0xff] }
  0x4f   : > { %419 = vst [vmem:[#allocation3] sm:$0x1] %v418_v11  ;;  %v1051_v27 = vadd.f32 %v1035_v17, %v999_v12  ;;  %v5858_v32 = vmul.f32 %v5817_v0, %v424_v15  ;;  %v1095_v34 = vmul.f32 %v5819_v1, %v708_v16  ;;  %v1000_v35 = vmul.f32 %v5815_v63, %v980_v20  ;;  %v5913_v10 = vld [vmem:[%s5809_s13 + $0x60] sm:$0xff] }
  0x50   : > { %v1059_v33 = vadd.f32 %v1043_v18, %v1007_v13  ;;  %v5863_v36 = vmul.f32 %v5819_v1, %v704_v22  ;;  %v1193_v38 = vmul.f32 %v5829_v14, %v424_v15  ;;  %v1036_v39 = vmul.f32 %v5817_v0, %v421_v24 }
  0x51   : > { %v1103_v37 = vadd.f32 %v1087_v19, %v1051_v27  ;;  %v5868_v40 = vmul.f32 %v5829_v14, %v428_v4  ;;  %v1008_v42 = vmul.f32 %v5815_v63, %v5855_v31  ;;  %v1044_v43 = vmul.f32 %v5817_v0, %v5851_v29  ;;  %v426_v27 = vld [vmem:[%s5809_s13 + $0x39] sm:$0xff] }
  0x52   : > { %v1088_v44 = vmul.f32 %v5819_v1, %v701_v30  ;;  %v1246_v47 = vmul.f32 %v5837_v21, %v704_v22  ;;  %v1052_v50 = vadd.f32 %v1036_v39, %v1000_v35  ;;  %v1141_v51 = vmul.f32 %v5877_v45, %v5824_v7 }
  0x53   : > { %v1156_v46 = vadd.f32 %v1140_v28, %v1103_v37  ;;  %v5884_v52 = vadd.f32 %v1095_v34, %v1059_v33  ;;  %v5887_v53 = vmul.f32 %v5837_v21, %v708_v16  ;;  %v1299_v54 = vmul.f32 %v5844_v25, %v5813_v62  ;;  %v706_v28 = vld [vmem:[%s5809_s13 + $0x3a] sm:$0xff]  ;;  %v710_v37 = vld [vmem:[%s5809_s13 + $0x62] sm:$0xff] }
  0x54   : > { %v1352_v55 = vmul.f32 %v5846_v26, %v428_v4  ;;  %v5896_v59 = vmul.f32 %v5817_v0, %v425_v41  ;;  %v1104_v60 = vadd.f32 %v1088_v44, %v1052_v50  ;;  %v1194_v61 = vmul.f32 %v5829_v14, %v425_v41  ;;  %v5929_v33 = vld [vmem:[%s5809_s13 + $0x38] sm:$0xff] }
  0x55   : > { %v5893_v57 = vld [vmem:[#allocation2 + $0x8] ss:$0 sm:$0xff]  ;;  %v1209_v58 = vadd.f32 %v1193_v38, %v1156_v46  ;;  %v1060_v5 = vadd.f32 %v1044_v43, %v1008_v42  ;;  %v5902_v6 = vmul.f32 %v5819_v1, %v705_v48  ;;  %v1096_v4 = vmul.f32 %v5819_v1, %v709_v49  ;;  %v423_v46 = vld [vmem:[%s5809_s13 + $0x19] sm:$0xff] }
  0x56   : > { %v5907_v8 = vmul.f32 %v5829_v14, %v5851_v29  ;;  %v1157_v12 = vadd.f32 %v1141_v51, %v1104_v60  ;;  %v1247_v13 = vmul.f32 %v5837_v21, %v705_v48  ;;  %v1001_v15 = vmul.f32 %v5815_v63, %v981_v56  ;;  %v5945_v48 = vld [vmem:[#allocation3] ss:$0 sm:$0xff] }
  0x57   : > { %v1262_v11 = vadd.f32 %v1246_v47, %v1209_v58  ;;  %v1405_v17 = vmul.f32 %v5893_v57, %v708_v16  ;;  %v1300_v18 = vmul.f32 %v5844_v25, %v5855_v31  ;;  %v1037_v19 = vmul.f32 %v5817_v0, %v422_v2  ;;  %v982_v47 = vld [vmem:[%s5809_s13 + $0x18] sm:$0xff]  ;;  %v431_v56 = vld [vmem:[%s5809_s13 + $0x69] sm:$0xff] }
  0x58   : > { %v1089_v20 = vmul.f32 %v5819_v1, %v702_v3  ;;  %v1210_v24 = vadd.f32 %v1194_v61, %v1157_v12  ;;  %v1009_v30 = vmul.f32 %v5815_v63, %v5913_v10  ;;  %v1045_v16 = vmul.f32 %v5817_v0, %v5910_v9  ;;  %v5956_v58 = vld [vmem:[%s5809_s13 + $0x68] sm:$0xff]  ;;  %v703_v2 = vld [vmem:[%s5809_s13 + $0x1a] sm:$0xff] }
  0x59   : > { %v1315_v22 = vadd.f32 %v1299_v54, %v1262_v11  ;;  %v5931_v34 = vadd.f32 %v1096_v4, %v1060_v5  ;;  %v5934_v35 = vmul.f32 %v5837_v21, %v709_v49  ;;  %v1053_v38 = vadd.f32 %v1037_v19, %v1001_v15 }
  0x5a   : > { %v1142_v39 = vmul.f32 %v5929_v33, %v5824_v7  ;;  %v1263_v42 = vadd.f32 %v1247_v13, %v1210_v24  ;;  %v1353_v43 = vmul.f32 %v5846_v26, %v5851_v29  ;;  %v1406_v44 = vmul.f32 %v5893_v57, %v709_v49 }
  0x5b   : > { %v1368_v41 = vadd.f32 %v1352_v55, %v1315_v22  ;;  %v5948_v50 = vmul.f32 %v5817_v0, %v426_v27  ;;  %v5951_v51 = vmul.f32 %v5819_v1, %v706_v28  ;;  %v1105_v54 = vadd.f32 %v1089_v20, %v1053_v38  ;;  %v711_v20 = vld [vmem:[%s5809_s13 + $0x6a] sm:$0xff]  ;;  %v427_v38 = vld [vmem:[%s5809_s13 + $0x41] sm:$0xff] }
  0x5c   : > { %v1195_v55 = vmul.f32 %v5829_v14, %v426_v27  ;;  %v1316_v60 = vadd.f32 %v1300_v18, %v1263_v42  ;;  %v1061_v49 = vadd.f32 %v1045_v16, %v1009_v30  ;;  %v1097_v61 = vmul.f32 %v5819_v1, %v710_v37  ;;  %v5972_v27 = vld [vmem:[%s5809_s13 + $0x40] sm:$0xff] }
  0x5d   : > { %v1421_v29 = vadd.f32 %v1405_v17, %v1368_v41  ;;  %v1158_v3 = vadd.f32 %v1142_v39, %v1105_v54  ;;  %v1248_v5 = vmul.f32 %v5837_v21, %v706_v28  ;;  %v1002_v4 = vmul.f32 %v5815_v63, %v982_v47  ;;  %v432_v47 = vld [vmem:[%s5809_s13 + $0x79] sm:$0xff] }
  0x5e   : > { %v1038_v11 = vmul.f32 %v5817_v0, %v423_v46  ;;  %v1369_v13 = vadd.f32 %v1353_v43, %v1316_v60  ;;  %v1010_v15 = vmul.f32 %v5815_v63, %v5956_v58  ;;  %v1046_v17 = vmul.f32 %v5817_v0, %v431_v56 }
  0x5f   : > { %v1443_v12 = vadd.f32 %v5945_v48, %v1421_v29  ;;  %v1211_v18 = vadd.f32 %v1195_v55, %v1158_v3  ;;  %v1301_v19 = vmul.f32 %v5844_v25, %v5913_v10  ;;  %v1090_v24 = vmul.f32 %v5819_v1, %v703_v2  ;;  %v707_v29 = vld [vmem:[%s5809_s13 + $0x42] sm:$0xff] }
  0x60   : > { %v1054_v22 = vadd.f32 %v1038_v11, %v1002_v4  ;;  %v1422_v28 = vadd.f32 %v1406_v44, %v1369_v13  ;;  %v5979_v30 = vadd.f32 %v1097_v61, %v1061_v49  ;;  %v5983_v16 = vmul.f32 %v5829_v14, %v5910_v9  ;;  %v5993_v44 = vld [vmem:[%s5809_s13 + $0x78] sm:$0xff] }
  0x61   : > { %1459 = vst [vmem:[%s5976_s15] sm:$0xff] %v1443_v12  ;;  %v1143_v39 = vmul.f32 %v5972_v27, %v5824_v7  ;;  %v1264_v41 = vadd.f32 %v1248_v5, %v1211_v18  ;;  %v1354_v42 = vmul.f32 %v5846_v26, %v5910_v9  ;;  %v1196_v46 = vmul.f32 %v5829_v14, %v427_v38  ;;  %v712_v18 = vld [vmem:[%s5809_s13 + $0x7a] sm:$0xff] }
  0x62   : > { %v1106_v43 = vadd.f32 %v1090_v24, %v1054_v22  ;;  %v1444_v54 = vadd.f32 %v5945_v48, %v1422_v28  ;;  %v5997_v55 = vmul.f32 %v5837_v21, %v710_v37  ;;  %v1062_v60 = vadd.f32 %v1046_v17, %v1010_v15  ;;  %v433_v28 = vld [vmem:[%s5809_s13 + $0x81] sm:$0xff] }
  0x63   : > { %v1098_v49 = vmul.f32 %v5819_v1, %v711_v20  ;;  %v1317_v61 = vadd.f32 %v1301_v19, %v1264_v41  ;;  %v1407_v2 = vmul.f32 %v5893_v57, %v710_v37  ;;  %v1249_v3 = vmul.f32 %v5837_v21, %v707_v29 }
  0x64   : > { %v1159_v9 = vadd.f32 %v1143_v39, %v1106_v43  ;;  %1460 = vst [vmem:[%s5976_s15 + $0x8] sm:$0xff] %v1444_v54  ;;  %v6005_v5 = vmul.f32 %v5817_v0, %v427_v38  ;;  %v1003_v4 = vmul.f32 %v5841_v23, %v5815_v63  ;;  %v1011_v11 = vmul.f32 %v5815_v63, %v5993_v44  ;;  %v6028_v38 = vld [vmem:[%s5809_s13 + $0x80] sm:$0xff] }
  0x65   : > { %v1047_v12 = vmul.f32 %v5817_v0, %v432_v47  ;;  %v1370_v13 = vadd.f32 %v1354_v42, %v1317_v61  ;;  %v6013_v37 = vmul.f32 %v5819_v1, %v707_v29  ;;  %v1302_v17 = vmul.f32 %v5844_v25, %v5956_v58 }
  0x66   : > { %v1212_v15 = vadd.f32 %v1196_v46, %v1159_v9  ;;  %v6018_v19 = vadd.f32 %v1098_v49, %v1062_v60  ;;  %v6021_v22 = vmul.f32 %v5829_v14, %v431_v56  ;;  %v1055_v23 = vadd.f32 %v5858_v32, %v1003_v4  ;;  %v713_v9 = vld [vmem:[%s5809_s13 + $0x82] sm:$0xff] }
  0x67   : > { %v1144_v24 = vmul.f32 %v5824_v7, %v5813_v62  ;;  %v1423_v39 = vadd.f32 %v1407_v2, %v1370_v13  ;;  %v1355_v42 = vmul.f32 %v5846_v26, %v431_v56  ;;  %v1408_v43 = vmul.f32 %v5893_v57, %v711_v20 }
  0x68   : > { %v1265_v41 = vadd.f32 %v1249_v3, %v1212_v15  ;;  %v1063_v46 = vadd.f32 %v1047_v12, %v1011_v11  ;;  %v1099_v54 = vmul.f32 %v5819_v1, %v712_v18  ;;  %v1107_v29 = vadd.f32 %v5863_v36, %v1055_v23 }
  0x69   : > { %v1004_v32 = vmul.f32 %v5877_v45, %v5815_v63  ;;  %v1445_v62 = vadd.f32 %v5945_v48, %v1423_v39  ;;  %v1012_v49 = vmul.f32 %v5815_v63, %v6028_v38  ;;  %v1048_v61 = vmul.f32 %v5817_v0, %v433_v28  ;;  %v6064_v39 = vld [vmem:[%s5809_s13 + $0x88] sm:$0xff] }
  0x6a   : > { %v1318_v60 = vadd.f32 %v1302_v17, %v1265_v41  ;;  %v6041_v56 = vmul.f32 %v5837_v21, %v711_v20  ;;  %v1160_v2 = vadd.f32 %v1144_v24, %v1107_v29  ;;  %v1145_v45 = vmul.f32 %v5824_v7, %v5855_v31  ;;  %v434_v24 = vld [vmem:[%s5809_s13 + $0x89] sm:$0xff] }
  0x6b   : > { %v1056_v36 = vadd.f32 %v5896_v59, %v1004_v32  ;;  %1461 = vst [vmem:[%s5976_s15 + $0x10] sm:$0xff] %v1445_v62  ;;  %v6049_v4 = vmul.f32 %v5829_v14, %v432_v47  ;;  %v6052_v11 = vmul.f32 %v5837_v21, %v712_v18  ;;  %v1303_v20 = vmul.f32 %v5844_v25, %v5993_v44 }
  0x6c   : > { %v1371_v3 = vadd.f32 %v1355_v42, %v1318_v60  ;;  %v6056_v12 = vadd.f32 %v1099_v54, %v1063_v46  ;;  %v1213_v13 = vadd.f32 %v5868_v40, %v1160_v2  ;;  %v1356_v59 = vmul.f32 %v5846_v26, %v432_v47  ;;  %v714_v54 = vld [vmem:[%s5809_s13 + $0x8a] sm:$0xff] }
  0x6d   : > { %v1108_v31 = vadd.f32 %v5902_v6, %v1056_v36  ;;  %v1064_v17 = vadd.f32 %v1048_v61, %v1012_v49  ;;  %v1100_v23 = vmul.f32 %v5819_v1, %v713_v9  ;;  %v1005_v41 = vmul.f32 %v5929_v33, %v5815_v63  ;;  %v435_v60 = vld [vmem:[%s5809_s13 + $0x91] sm:$0xff] }
  0x6e   : > { %v1424_v15 = vadd.f32 %v1408_v43, %v1371_v3  ;;  %v1266_v42 = vadd.f32 %v5887_v53, %v1213_v13  ;;  %v1409_v40 = vmul.f32 %v5893_v57, %v712_v18  ;;  %v6071_v6 = vmul.f32 %v5829_v14, %v433_v28  ;;  %v6086_v49 = vld [vmem:[%s5809_s13 + $0x90] sm:$0xff] }
  0x6f   : > { %v1161_v47 = vadd.f32 %v1145_v45, %v1108_v31  ;;  %v1304_v46 = vmul.f32 %v5844_v25, %v6028_v38  ;;  %v1057_v29 = vadd.f32 %v5948_v50, %v1005_v41  ;;  %v1146_v33 = vmul.f32 %v5824_v7, %v5913_v10  ;;  %v715_v13 = vld [vmem:[%s5809_s13 + $0x92] sm:$0xff] }
  0x70   : > { %v1446_v43 = vadd.f32 %v5945_v48, %v1424_v15  ;;  %v1319_v32 = vadd.f32 %v1303_v20, %v1266_v42  ;;  %v1013_v18 = vmul.f32 %v5815_v63, %v6064_v39  ;;  %v1049_v62 = vmul.f32 %v5817_v0, %v434_v24 }
  0x71   : > { %v1214_v53 = vadd.f32 %v5907_v8, %v1161_v47  ;;  %v6089_v61 = vadd.f32 %v1100_v23, %v1064_v17  ;;  %v6092_v50 = vmul.f32 %v5837_v21, %v713_v9  ;;  %v1357_v10 = vmul.f32 %v5846_v26, %v433_v28 }
  0x72   : > { %1462 = vst [vmem:[%s5976_s15 + $0x18] sm:$0xff] %v1446_v43  ;;  %v1109_v2 = vadd.f32 %v5951_v51, %v1057_v29  ;;  %v1372_v36 = vadd.f32 %v1356_v59, %v1319_v32  ;;  %v1410_v45 = vmul.f32 %v5893_v57, %v713_v9  ;;  %v1101_v3 = vmul.f32 %v5819_v1, %v714_v54 }
  0x73   : > { %v1267_v8 = vadd.f32 %v5934_v35, %v1214_v53  ;;  %v1006_v31 = vmul.f32 %v5972_v27, %v5815_v63  ;;  %v1014_v15 = vmul.f32 %v5815_v63, %v6086_v49  ;;  %v1050_v17 = vmul.f32 %v5817_v0, %v435_v60  ;;  %v436_v53 = vld [vmem:[%s5809_s13 + $0xa1] sm:$0xff] }
  0x74   : > { %v1162_v20 = vadd.f32 %v1146_v33, %v1109_v2  ;;  %v1425_v28 = vadd.f32 %v1409_v40, %v1372_v36  ;;  %v1065_v59 = vadd.f32 %v1049_v62, %v1013_v18  ;;  %v6106_v35 = vmul.f32 %v5829_v14, %v434_v24  ;;  %v6130_v62 = vld [vmem:[%s5809_s13 + $0xa0] sm:$0xff] }
  0x75   : > { %v1320_v51 = vadd.f32 %v1304_v46, %v1267_v8  ;;  %v1305_v23 = vmul.f32 %v5844_v25, %v6064_v39  ;;  %v1058_v27 = vadd.f32 %v6005_v5, %v1006_v31  ;;  %v1147_v41 = vmul.f32 %v5824_v7, %v5956_v58 }
  0x76   : > { %v1215_v9 = vadd.f32 %v5983_v16, %v1162_v20  ;;  %v1447_v42 = vadd.f32 %v5945_v48, %v1425_v28  ;;  %v1066_v47 = vadd.f32 %v1050_v17, %v1014_v15  ;;  %v1102_v43 = vmul.f32 %v5819_v1, %v715_v13 }
  0x77   : > { %v1373_v40 = vadd.f32 %v1357_v10, %v1320_v51  ;;  %v6117_v46 = vmul.f32 %v5837_v21, %v714_v54  ;;  %v1358_v29 = vmul.f32 %v5846_v26, %v434_v24  ;;  %v1110_v33 = vadd.f32 %v6013_v37, %v1058_v27 }
  0x78   : > { %v1268_v16 = vadd.f32 %v5997_v55, %v1215_v9  ;;  %1463 = vst [vmem:[%s5976_s15 + $0x20] sm:$0xff] %v1447_v42  ;;  %v6123_v32 = vadd.f32 %v1101_v3, %v1065_v59  ;;  %v1411_v58 = vmul.f32 %v5893_v57, %v714_v54  ;;  %v1148_v18 = vmul.f32 %v5824_v7, %v5993_v44  ;;  %v716_v3 = vld [vmem:[%s5809_s13 + $0xa2] sm:$0xff] }
  0x79   : > { %v1426_v5 = vadd.f32 %v1410_v45, %v1373_v40  ;;  %v1163_v55 = vadd.f32 %v1147_v41, %v1110_v33  ;;  %v6133_v24 = vmul.f32 %v5829_v14, %v435_v60  ;;  %v6136_v37 = vmul.f32 %v5837_v21, %v715_v13 }
  0x7a   : > { %v1321_v10 = vadd.f32 %v1305_v23, %v1268_v16  ;;  %v6139_v36 = vadd.f32 %v1102_v43, %v1066_v47  ;;  %v1306_v54 = vmul.f32 %v5844_v25, %v6086_v49  ;;  %v1164_v8 = vadd.f32 %v1148_v18, %v5884_v52  ;;  %v437_v47 = vld [vmem:[%s5809_s13 + $0xa9] sm:$0xff] }
  0x7b   : > { %v1448_v2 = vadd.f32 %v5945_v48, %v1426_v5  ;;  %v1216_v45 = vadd.f32 %v6021_v22, %v1163_v55  ;;  %v1492_v20 = vmul.f32 %v6130_v62, %v5815_v63  ;;  %v1525_v31 = vmul.f32 %v5817_v0, %v436_v53  ;;  %v717_v43 = vld [vmem:[%s5809_s13 + $0xaa] sm:$0xff] }
  0x7c   : > { %v1374_v44 = vadd.f32 %v1358_v29, %v1321_v10  ;;  %v1359_v15 = vmul.f32 %v5846_v26, %v435_v60  ;;  %v1217_v17 = vadd.f32 %v6049_v4, %v1164_v8  ;;  %v1307_v28 = vmul.f32 %v6130_v62, %v5844_v25  ;;  %v438_v55 = vld [vmem:[%s5809_s13 + $0xb1] sm:$0xff] }
  0x7d   : > { %1464 = vst [vmem:[%s5976_s15 + $0x28] sm:$0xff] %v1448_v2  ;;  %v1149_v52 = vmul.f32 %v5824_v7, %v6028_v38  ;;  %v1269_v51 = vadd.f32 %v6041_v56, %v1216_v45  ;;  %v1412_v59 = vmul.f32 %v5893_v57, %v715_v13  ;;  %v1360_v9 = vmul.f32 %v5846_v26, %v436_v53  ;;  %v6170_v13 = vld [vmem:[%s5809_s13 + $0xa8] sm:$0xff]  ;;  %v6193_v2 = vld [vmem:[%s5809_s13 + $0xb0] sm:$0xff] }
  0x7e   : > { %v1427_v22 = vadd.f32 %v1411_v58, %v1374_v44  ;;  %v1270_v60 = vadd.f32 %v6052_v11, %v1217_v17  ;;  %v1541_v23 = vadd.f32 %v1525_v31, %v1492_v20  ;;  %v1574_v4 = vmul.f32 %v5819_v1, %v716_v3 }
  0x7f   : > { %v1165_v27 = vadd.f32 %v1149_v52, %v5931_v34  ;;  %v1322_v38 = vadd.f32 %v1306_v54, %v1269_v51  ;;  %v6164_v42 = vmul.f32 %v5829_v14, %v436_v53  ;;  %v6167_v56 = vmul.f32 %v5837_v21, %v716_v3  ;;  %v718_v51 = vld [vmem:[%s5809_s13 + $0xb2] sm:$0xff] }
  0x80   : > { %v1449_v41 = vadd.f32 %v5945_v48, %v1427_v22  ;;  %v1323_v40 = vadd.f32 %v1307_v28, %v1270_v60  ;;  %v1413_v11 = vmul.f32 %v5893_v57, %v716_v3  ;;  %v1308_v16 = vmul.f32 %v6170_v13, %v5844_v25 }
  0x81   : > { %v1218_v34 = vadd.f32 %v6071_v6, %v1165_v27  ;;  %v1375_v29 = vadd.f32 %v1359_v15, %v1322_v38  ;;  %v6180_v33 = vmul.f32 %v5829_v14, %v437_v47  ;;  %v6183_v5 = vmul.f32 %v5837_v21, %v717_v43  ;;  %v439_v27 = vld [vmem:[%s5809_s13 + $0xb9] sm:$0xff] }
  0x82   : > { %1465 = vst [vmem:[%s5976_s15 + $0x30] sm:$0xff] %v1449_v41  ;;  %v1150_v58 = vmul.f32 %v5824_v7, %v6064_v39  ;;  %v1376_v53 = vadd.f32 %v1360_v9, %v1323_v40  ;;  %v6187_v18 = vadd.f32 %v1574_v4, %v1541_v23  ;;  %v1361_v6 = vmul.f32 %v5846_v26, %v437_v47  ;;  %v6213_v9 = vld [vmem:[%s5809_s13 + $0xb8] sm:$0xff] }
  0x83   : > { %v1271_v10 = vadd.f32 %v6092_v50, %v1218_v34  ;;  %v1428_v54 = vadd.f32 %v1412_v59, %v1375_v29  ;;  %v1493_v8 = vmul.f32 %v6170_v13, %v5815_v63  ;;  %v1526_v44 = vmul.f32 %v5817_v0, %v437_v47 }
  0x84   : > { %v1166_v39 = vadd.f32 %v1150_v58, %v5979_v30  ;;  %v1429_v45 = vadd.f32 %v1413_v11, %v1376_v53  ;;  %v1414_v50 = vmul.f32 %v5893_v57, %v717_v43  ;;  %v1309_v20 = vmul.f32 %v6193_v2, %v5844_v25 }
  0x85   : > { %v1324_v3 = vadd.f32 %v1308_v16, %v1271_v10  ;;  %v1450_v31 = vadd.f32 %v5945_v48, %v1428_v54  ;;  %v1494_v17 = vmul.f32 %v6193_v2, %v5815_v63  ;;  %v1527_v28 = vmul.f32 %v5817_v0, %v438_v55  ;;  %v6239_v10 = vld [vmem:[%s5809_s13 + $0xc8] sm:$0xff] }
  0x86   : > { %v1219_v15 = vadd.f32 %v6106_v35, %v1166_v39  ;;  %v1451_v30 = vadd.f32 %v5945_v48, %v1429_v45  ;;  %v1575_v22 = vmul.f32 %v5819_v1, %v717_v43  ;;  %v1151_v59 = vmul.f32 %v5824_v7, %v6086_v49 }
  0x87   : > { %v1377_v52 = vadd.f32 %v1361_v6, %v1324_v3  ;;  %1466 = vst [vmem:[%s5976_s15 + $0x38] sm:$0xff] %v1450_v31  ;;  %v1542_v60 = vadd.f32 %v1526_v44, %v1493_v8  ;;  %v6217_v35 = vmul.f32 %v5829_v14, %v438_v55  ;;  %v1362_v4 = vmul.f32 %v5846_v26, %v438_v55 }
  0x88   : > { %v1272_v23 = vadd.f32 %v6117_v46, %v1219_v15  ;;  %1467 = vst [vmem:[%s5976_s15 + $0x40] sm:$0xff] %v1451_v30  ;;  %v6224_v38 = vmul.f32 %v5837_v21, %v718_v51  ;;  %v1415_v49 = vmul.f32 %v5893_v57, %v718_v51  ;;  %v1167_v40 = vadd.f32 %v1151_v59, %v6018_v19  ;;  %v719_v46 = vld [vmem:[%s5809_s13 + $0xba] sm:$0xff]  ;;  %v440_v19 = vld [vmem:[%s5809_s13 + $0xc9] sm:$0xff] }
  0x89   : > { %v1430_v41 = vadd.f32 %v1414_v50, %v1377_v52  ;;  %v1543_v47 = vadd.f32 %v1527_v28, %v1494_v17  ;;  %v1576_v43 = vmul.f32 %v5819_v1, %v718_v51  ;;  %v1495_v34 = vmul.f32 %v6213_v9, %v5815_v63  ;;  %v720_v50 = vld [vmem:[%s5809_s13 + $0xca] sm:$0xff] }
  0x8a   : > { %v1325_v11 = vadd.f32 %v1309_v20, %v1272_v23  ;;  %v1220_v29 = vadd.f32 %v6133_v24, %v1167_v40  ;;  %v1310_v58 = vmul.f32 %v6213_v9, %v5844_v25  ;;  %v1528_v53 = vmul.f32 %v5817_v0, %v439_v27  ;;  %v6271_v59 = vld [vmem:[%s5809_s13 + $0xd0] sm:$0xff] }
  0x8b   : > { %v1452_v16 = vadd.f32 %v5945_v48, %v1430_v41  ;;  %v6241_v6 = vadd.f32 %v1575_v22, %v1542_v60  ;;  %v6244_v54 = vmul.f32 %v5829_v14, %v439_v27  ;;  %v1152_v8 = vmul.f32 %v6130_v62, %v5824_v7  ;;  %v441_v22 = vld [vmem:[%s5809_s13 + $0xd1] sm:$0xff] }
  0x8c   : > { %v1378_v55 = vadd.f32 %v1362_v4, %v1325_v11  ;;  %v1273_v24 = vadd.f32 %v6136_v37, %v1220_v29  ;;  %v1363_v44 = vmul.f32 %v5846_v26, %v439_v27  ;;  %v1544_v39 = vadd.f32 %v1528_v53, %v1495_v34  ;;  %v721_v34 = vld [vmem:[%s5809_s13 + $0xd2] sm:$0xff] }
  0x8d   : > { %1468 = vst [vmem:[%s5976_s15 + $0x48] sm:$0xff] %v1452_v16  ;;  %v1577_v45 = vmul.f32 %v5819_v1, %v719_v46  ;;  %v1168_v20 = vadd.f32 %v1152_v8, %v6056_v12  ;;  %v1496_v31 = vmul.f32 %v6239_v10, %v5815_v63  ;;  %v1529_v62 = vmul.f32 %v5817_v0, %v440_v19  ;;  %v442_v29 = vld [vmem:[%s5809_s13 + $0xd9] sm:$0xff] }
  0x8e   : > { %v1431_v3 = vadd.f32 %v1415_v49, %v1378_v55  ;;  %v6257_v15 = vadd.f32 %v1576_v43, %v1543_v47  ;;  %v6260_v37 = vmul.f32 %v5837_v21, %v719_v46  ;;  %v1326_v17 = vadd.f32 %v1310_v58, %v1273_v24  ;;  %v6295_v58 = vld [vmem:[%s5809_s13 + $0xd8] sm:$0xff] }
  0x8f   : > { %v1416_v28 = vmul.f32 %v5893_v57, %v719_v46  ;;  %v1221_v52 = vadd.f32 %v6164_v42, %v1168_v20  ;;  %v1311_v12 = vmul.f32 %v6239_v10, %v5844_v25  ;;  %v1153_v51 = vmul.f32 %v6170_v13, %v5824_v7 }
  0x90   : > { %v1453_v30 = vadd.f32 %v5945_v48, %v1431_v3  ;;  %v1379_v60 = vadd.f32 %v1363_v44, %v1326_v17  ;;  %v1364_v23 = vmul.f32 %v5846_v26, %v440_v19  ;;  %v1417_v4 = vmul.f32 %v5893_v57, %v720_v50 }
  0x91   : > { %v1578_v27 = vmul.f32 %v5819_v1, %v720_v50  ;;  %v6277_v42 = vadd.f32 %v1577_v45, %v1544_v39  ;;  %v1274_v41 = vadd.f32 %v6167_v56, %v1221_v52  ;;  %v1545_v49 = vadd.f32 %v1529_v62, %v1496_v31  ;;  %v722_v62 = vld [vmem:[%s5809_s13 + $0xda] sm:$0xff] }
  0x92   : > { %1469 = vst [vmem:[%s5976_s15 + $0x50] sm:$0xff] %v1453_v30  ;;  %v1169_v13 = vadd.f32 %v1153_v51, %v6089_v61  ;;  %v1432_v40 = vadd.f32 %v1416_v28, %v1379_v60  ;;  %v6282_v11 = vmul.f32 %v5829_v14, %v440_v19  ;;  %v1497_v47 = vmul.f32 %v6271_v59, %v5815_v63  ;;  %v443_v52 = vld [vmem:[%s5809_s13 + $0xe1] sm:$0xff] }
  0x93   : > { %v1530_v43 = vmul.f32 %v5817_v0, %v441_v22  ;;  %v1327_v46 = vadd.f32 %v1311_v12, %v1274_v41  ;;  %v1312_v56 = vmul.f32 %v6271_v59, %v5844_v25  ;;  %v1154_v61 = vmul.f32 %v6193_v2, %v5824_v7  ;;  %v6327_v51 = vld [vmem:[%s5809_s13 + $0xe0] sm:$0xff] }
  0x94   : > { %v1222_v16 = vadd.f32 %v6180_v33, %v1169_v13  ;;  %v1454_v53 = vadd.f32 %v5945_v48, %v1432_v40  ;;  %v6299_v19 = vmul.f32 %v5837_v21, %v720_v50  ;;  %v1365_v55 = vmul.f32 %v5846_v26, %v441_v22  ;;  %v444_v13 = vld [vmem:[%s5809_s13 + $0xf1] sm:$0xff] }
  0x95   : > { %v1418_v8 = vmul.f32 %v5893_v57, %v721_v34  ;;  %v1380_v33 = vadd.f32 %v1364_v23, %v1327_v46  ;;  %v6303_v24 = vadd.f32 %v1578_v27, %v1545_v49  ;;  %v1170_v2 = vadd.f32 %v1154_v61, %v6123_v32 }
  0x96   : > { %v1275_v44 = vadd.f32 %v6183_v5, %v1222_v16  ;;  %1470 = vst [vmem:[%s5976_s15 + $0x58] sm:$0xff] %v1454_v53  ;;  %v1546_v39 = vadd.f32 %v1530_v43, %v1497_v47  ;;  %v1579_v45 = vmul.f32 %v5819_v1, %v721_v34  ;;  %v1498_v3 = vmul.f32 %v6295_v58, %v5815_v63 }
  0x97   : > { %v1531_v50 = vmul.f32 %v5817_v0, %v442_v29  ;;  %v1433_v20 = vadd.f32 %v1417_v4, %v1380_v33  ;;  %v1223_v17 = vadd.f32 %v6217_v35, %v1170_v2  ;;  %v1313_v5 = vmul.f32 %v6295_v58, %v5844_v25  ;;  %v6333_v4 = vld [vmem:[%s5809_s13 + $0xf0] sm:$0xff] }
  0x98   : > { %v1328_v31 = vadd.f32 %v1312_v56, %v1275_v44  ;;  %v6317_v32 = vmul.f32 %v5829_v14, %v441_v22  ;;  %v6320_v28 = vmul.f32 %v5837_v21, %v721_v34  ;;  %v1366_v30 = vmul.f32 %v5846_v26, %v442_v29  ;;  %v723_v34 = vld [vmem:[%s5809_s13 + $0xe2] sm:$0xff] }
  0x99   : > { %v1155_v12 = vmul.f32 %v6213_v9, %v5824_v7  ;;  %v1455_v35 = vadd.f32 %v5945_v48, %v1433_v20  ;;  %v1276_v23 = vadd.f32 %v6224_v38, %v1223_v17  ;;  %v1419_v22 = vmul.f32 %v5893_v57, %v722_v62  ;;  %v445_v20 = vld [vmem:[%s5809_s13 + $0xf9] sm:$0xff] }
  0x9a   : > { %v1381_v60 = vadd.f32 %v1365_v55, %v1328_v31  ;;  %v6335_v27 = vadd.f32 %v1579_v45, %v1546_v39  ;;  %v1547_v41 = vadd.f32 %v1531_v50, %v1498_v3  ;;  %v1580_v49 = vmul.f32 %v5819_v1, %v722_v62  ;;  %v6370_v31 = vld [vmem:[%s5809_s13 + $0xf8] sm:$0xff] }
  0x9b   : > { %v1171_v9 = vadd.f32 %v1155_v12, %v6139_v36  ;;  %1471 = vst [vmem:[%s5976_s15 + $0x60] sm:$0xff] %v1455_v35  ;;  %v1329_v47 = vadd.f32 %v1313_v5, %v1276_v23  ;;  %v1499_v43 = vmul.f32 %v6327_v51, %v5815_v63  ;;  %v1532_v38 = vmul.f32 %v5817_v0, %v443_v52 }
  0x9c   : > { %v1434_v40 = vadd.f32 %v1418_v8, %v1381_v60  ;;  %v6345_v46 = vmul.f32 %v5829_v14, %v442_v29  ;;  %v1314_v56 = vmul.f32 %v6327_v51, %v5844_v25  ;;  %v1500_v36 = vmul.f32 %v6333_v4, %v5815_v63  ;;  %v724_v8 = vld [vmem:[%s5809_s13 + $0xf2] sm:$0xff] }
  0x9d   : > { %v1224_v16 = vadd.f32 %v6244_v54, %v1171_v9  ;;  %v1382_v53 = vadd.f32 %v1366_v30, %v1329_v47  ;;  %v6355_v55 = vmul.f32 %v5837_v21, %v722_v62  ;;  %v1533_v29 = vmul.f32 %v5817_v0, %v444_v13  ;;  %v725_v47 = vld [vmem:[%s5809_s13 + $0xfa] sm:$0xff] }
  0x9e   : > { %v1456_v61 = vadd.f32 %v5945_v48, %v1434_v40  ;;  %v6359_v33 = vadd.f32 %v1580_v49, %v1547_v41  ;;  %v1367_v44 = vmul.f32 %v5846_v26, %v443_v52  ;;  %v1623_v2 = vmul.f32 %v6239_v10, %v5824_v7  ;;  %v6389_v49 = vld [vmem:[%s5809_s13 + $0x100] sm:$0xff] }
  0x9f   : > { %v1277_v54 = vadd.f32 %v6260_v37, %v1224_v16  ;;  %v1435_v39 = vadd.f32 %v1419_v22, %v1382_v53  ;;  %v1420_v45 = vmul.f32 %v5893_v57, %v723_v34  ;;  %v1548_v3 = vadd.f32 %v1532_v38, %v1499_v43 }
  0xa0   : > { %1472 = vst [vmem:[%s5976_s15 + $0x68] sm:$0xff] %v1456_v61  ;;  %v1581_v50 = vmul.f32 %v5819_v1, %v723_v34  ;;  %v1549_v37 = vadd.f32 %v1533_v29, %v1500_v36  ;;  %v1582_v17 = vmul.f32 %v5819_v1, %v724_v8  ;;  %v1639_v10 = vadd.f32 %v1623_v2, %v6187_v18  ;;  %v446_v18 = vld [vmem:[%s5809_s13 + $0x101] sm:$0xff] }
  0xa1   : > { %v1330_v62 = vadd.f32 %v1314_v56, %v1277_v54  ;;  %v1457_v5 = vadd.f32 %v5945_v48, %v1435_v39  ;;  %v6376_v30 = vmul.f32 %v5829_v14, %v443_v52  ;;  %v6379_v12 = vmul.f32 %v5837_v21, %v723_v34  ;;  %v447_v39 = vld [vmem:[%s5809_s13 + $0x109] sm:$0xff] }
  0xa2   : > { %v1770_v35 = vmul.f32 %v6333_v4, %v5844_v25  ;;  %v1688_v23 = vadd.f32 %v6282_v11, %v1639_v10  ;;  %v1501_v22 = vmul.f32 %v6370_v31, %v5815_v63  ;;  %v1534_v41 = vmul.f32 %v5817_v0, %v445_v20 }
  0xa3   : > { %v1383_v60 = vadd.f32 %v1367_v44, %v1330_v62  ;;  %1473 = vst [vmem:[%s5976_s15 + $0x70] sm:$0xff] %v1457_v5  ;;  %v6392_v52 = vadd.f32 %v1581_v50, %v1548_v3  ;;  %v6395_v9 = vmul.f32 %v5829_v14, %v444_v13  ;;  %v6398_v40 = vmul.f32 %v5837_v21, %v724_v8 }
  0xa4   : > { %v1624_v11 = vmul.f32 %v6271_v59, %v5824_v7  ;;  %v6403_v38 = vadd.f32 %v1582_v17, %v1549_v37  ;;  %v1737_v34 = vadd.f32 %v6299_v19, %v1688_v23  ;;  %v1819_v16 = vmul.f32 %v5846_v26, %v444_v13  ;;  %v726_v19 = vld [vmem:[%s5809_s13 + $0x102] sm:$0xff] }
  0xa5   : > { %v1436_v43 = vadd.f32 %v1420_v45, %v1383_v60  ;;  %v1868_v56 = vmul.f32 %v5893_v57, %v724_v8  ;;  %v1502_v61 = vmul.f32 %v6389_v49, %v5815_v63  ;;  %v1535_v53 = vmul.f32 %v5817_v0, %v446_v18  ;;  %v6425_v45 = vld [vmem:[%s5809_s13 + $0x108] sm:$0xff] }
  0xa6   : > { %v1640_v36 = vadd.f32 %v1624_v11, %v6241_v6  ;;  %v1786_v29 = vadd.f32 %v1770_v35, %v1737_v34  ;;  %v1550_v54 = vadd.f32 %v1534_v41, %v1501_v22  ;;  %v1583_v44 = vmul.f32 %v5819_v1, %v725_v47  ;;  %v727_v41 = vld [vmem:[%s5809_s13 + $0x10a] sm:$0xff] }
  0xa7   : > { %v1458_v59 = vadd.f32 %v5945_v48, %v1436_v43  ;;  %v6416_v2 = vmul.f32 %v5829_v14, %v445_v20  ;;  %v1771_v6 = vmul.f32 %v6370_v31, %v5844_v25  ;;  %v1625_v8 = vmul.f32 %v6295_v58, %v5824_v7 }
  0xa8   : > { %v1689_v13 = vadd.f32 %v6317_v32, %v1640_v36  ;;  %v1835_v3 = vadd.f32 %v1819_v16, %v1786_v29  ;;  %v6429_v50 = vmul.f32 %v5837_v21, %v725_v47  ;;  %v1820_v62 = vmul.f32 %v5846_v26, %v445_v20 }
  0xa9   : > { %1474 = vst [vmem:[%s5976_s15 + $0x78] sm:$0xff] %v1458_v59  ;;  %v1869_v37 = vmul.f32 %v5893_v57, %v725_v47  ;;  %v1551_v17 = vadd.f32 %v1535_v53, %v1502_v61  ;;  %v1584_v10 = vmul.f32 %v5819_v1, %v726_v19  ;;  %v1641_v58 = vadd.f32 %v1625_v8, %v6257_v15  ;;  %v448_v61 = vld [vmem:[%s5809_s13 + $0x119] sm:$0xff] }
  0xaa   : > { %v1738_v32 = vadd.f32 %v6320_v28, %v1689_v13  ;;  %v1884_v5 = vadd.f32 %v1868_v56, %v1835_v3  ;;  %v6436_v35 = vadd.f32 %v1583_v44, %v1550_v54  ;;  %v1503_v60 = vmul.f32 %v6425_v45, %v5815_v63  ;;  %v728_v13 = vld [vmem:[%s5809_s13 + $0x11a] sm:$0xff] }
  0xab   : > { %v1536_v23 = vmul.f32 %v5817_v0, %v447_v39  ;;  %v1690_v22 = vadd.f32 %v6345_v46, %v1641_v58  ;;  %v1772_v28 = vmul.f32 %v6389_v49, %v5844_v25  ;;  %v1626_v15 = vmul.f32 %v6327_v51, %v5824_v7  ;;  %v6461_v51 = vld [vmem:[%s5809_s13 + $0x118] sm:$0xff] }
  0xac   : > { %v1787_v20 = vadd.f32 %v1771_v6, %v1738_v32  ;;  %v1900_v47 = vadd.f32 %v5945_v48, %v1884_v5  ;;  %v6449_v11 = vmul.f32 %v5829_v14, %v446_v18  ;;  %v6452_v43 = vmul.f32 %v5837_v21, %v726_v19 }
  0xad   : > { %v1821_v34 = vmul.f32 %v5846_v26, %v446_v18  ;;  %v6455_v46 = vadd.f32 %v1584_v10, %v1551_v17  ;;  %v1739_v56 = vadd.f32 %v6355_v55, %v1690_v22  ;;  %v1642_v36 = vadd.f32 %v1626_v15, %v6277_v42  ;;  %v729_v15 = vld [vmem:[%s5809_s13 + $0x122] sm:$0xff] }
  0xae   : > { %v1836_v16 = vadd.f32 %v1820_v62, %v1787_v20  ;;  %5099 = vst [vmem:[%s5976_s15 + $0x80] sm:$0xff] %v1900_v47  ;;  %v1870_v53 = vmul.f32 %v5893_v57, %v726_v19  ;;  %v1552_v59 = vadd.f32 %v1536_v23, %v1503_v60  ;;  %v1585_v29 = vmul.f32 %v5819_v1, %v727_v41  ;;  %v449_v62 = vld [vmem:[%s5809_s13 + $0x121] sm:$0xff] }
  0xaf   : > { %v6467_v18 = vmul.f32 %v5829_v14, %v447_v39  ;;  %v1788_v44 = vadd.f32 %v1772_v28, %v1739_v56  ;;  %v1691_v55 = vadd.f32 %v6376_v30, %v1642_v36  ;;  %v1773_v42 = vmul.f32 %v6425_v45, %v5844_v25  ;;  %v450_v36 = vld [vmem:[%s5809_s13 + $0x129] sm:$0xff] }
  0xb0   : > { %v1885_v54 = vadd.f32 %v1869_v37, %v1836_v16  ;;  %v6474_v6 = vmul.f32 %v5837_v21, %v727_v41  ;;  %v1504_v19 = vmul.f32 %v6461_v51, %v5815_v63  ;;  %v1537_v8 = vmul.f32 %v5817_v0, %v448_v61  ;;  %v6483_v37 = vld [vmem:[%s5809_s13 + $0x120] sm:$0xff] }
  0xb1   : > { %v1627_v3 = vmul.f32 %v6333_v4, %v5824_v7  ;;  %v1837_v32 = vadd.f32 %v1821_v34, %v1788_v44  ;;  %v1740_v17 = vadd.f32 %v6379_v12, %v1691_v55  ;;  %v1822_v10 = vmul.f32 %v5846_v26, %v447_v39 }
  0xb2   : > { %v1901_v30 = vadd.f32 %v5945_v48, %v1885_v54  ;;  %v6488_v58 = vadd.f32 %v1585_v29, %v1552_v59  ;;  %v1871_v5 = vmul.f32 %v5893_v57, %v727_v41  ;;  %v1586_v60 = vmul.f32 %v5819_v1, %v728_v13 }
  0xb3   : > { %v1643_v4 = vadd.f32 %v1627_v3, %v6303_v24  ;;  %v1886_v23 = vadd.f32 %v1870_v53, %v1837_v32  ;;  %v1789_v20 = vadd.f32 %v1773_v42, %v1740_v17  ;;  %v1505_v22 = vmul.f32 %v6483_v37, %v5815_v63  ;;  %v6512_v53 = vld [vmem:[%s5809_s13 + $0x128] sm:$0xff] }
  0xb4   : > { %5100 = vst [vmem:[%s5976_s15 + $0x88] sm:$0xff] %v1901_v30  ;;  %v1538_v12 = vmul.f32 %v5817_v0, %v449_v62  ;;  %v1553_v39 = vadd.f32 %v1537_v8, %v1504_v19  ;;  %v1774_v41 = vmul.f32 %v6461_v51, %v5844_v25  ;;  %v1628_v24 = vmul.f32 %v6370_v31, %v5824_v7  ;;  %v730_v8 = vld [vmem:[%s5809_s13 + $0x12a] sm:$0xff] }
  0xb5   : > { %v1692_v28 = vadd.f32 %v6395_v9, %v1643_v4  ;;  %v1902_v47 = vadd.f32 %v5945_v48, %v1886_v23  ;;  %v1838_v34 = vadd.f32 %v1822_v10, %v1789_v20  ;;  %v6505_v16 = vmul.f32 %v5829_v14, %v448_v61  ;;  %v6542_v4 = vld [vmem:[%s5809_s13 + $0x130] sm:$0xff]  ;;  %v6547_v23 = vld [vmem:[#allocation2 + $0x8] ss:$0 sm:$0xff] }
  0xb6   : > { %v6508_v56 = vmul.f32 %v5837_v21, %v728_v13  ;;  %v1823_v59 = vmul.f32 %v5846_v26, %v448_v61  ;;  %v1872_v29 = vmul.f32 %v5893_v57, %v728_v13  ;;  %v1644_v31 = vadd.f32 %v1628_v24, %v6335_v27 }
  0xb7   : > { %v1741_v9 = vadd.f32 %v6398_v40, %v1692_v28  ;;  %5101 = vst [vmem:[%s5976_s15 + $0x90] sm:$0xff] %v1902_v47  ;;  %v1887_v54 = vadd.f32 %v1871_v5, %v1838_v34  ;;  %v1554_v44 = vadd.f32 %v1538_v12, %v1505_v22  ;;  %v1587_v55 = vmul.f32 %v5819_v1, %v729_v15  ;;  %v451_v5 = vld [vmem:[%s5809_s13 + $0x131] sm:$0xff] }
  0xb8   : > { %v1775_v42 = vmul.f32 %v6483_v37, %v5844_v25  ;;  %v1693_v40 = vadd.f32 %v6416_v2, %v1644_v31  ;;  %v1506_v57 = vmul.f32 %v6512_v53, %v5815_v63  ;;  %v1539_v27 = vmul.f32 %v5817_v0, %v450_v36 }
  0xb9   : > { %v1790_v19 = vadd.f32 %v1774_v41, %v1741_v9  ;;  %v1903_v61 = vadd.f32 %v5945_v48, %v1887_v54  ;;  %v6528_v13 = vadd.f32 %v1586_v60, %v1553_v39  ;;  %v6531_v3 = vmul.f32 %v5829_v14, %v449_v62  ;;  %v731_v41 = vld [vmem:[%s5809_s13 + $0x132] sm:$0xff] }
  0xba   : > { %v1629_v30 = vmul.f32 %v6389_v49, %v5824_v7  ;;  %v6536_v17 = vmul.f32 %v5837_v21, %v729_v15  ;;  %v1742_v2 = vadd.f32 %v6429_v50, %v1693_v40  ;;  %v1824_v10 = vmul.f32 %v5846_v26, %v449_v62 }
  0xbb   : > { %v1839_v32 = vadd.f32 %v1823_v59, %v1790_v19  ;;  %5102 = vst [vmem:[%s5976_s15 + $0x98] sm:$0xff] %v1903_v61  ;;  %v6545_v60 = vadd.f32 %v1587_v55, %v1554_v44  ;;  %v1873_v20 = vmul.f32 %v6547_v23, %v729_v15  ;;  %v1588_v49 = vmul.f32 %v5819_v1, %v730_v8 }
  0xbc   : > { %v1645_v22 = vadd.f32 %v1629_v30, %v6359_v33  ;;  %v1791_v39 = vadd.f32 %v1775_v42, %v1742_v2  ;;  %v1555_v50 = vadd.f32 %v1539_v27, %v1506_v57  ;;  %v1776_v62 = vmul.f32 %v6512_v53, %v5844_v25 }
  0xbd   : > { %v1888_v12 = vadd.f32 %v1872_v29, %v1839_v32  ;;  %v1507_v24 = vmul.f32 %v6542_v4, %v5815_v63  ;;  %v1540_v47 = vmul.f32 %v5817_v0, %v451_v5  ;;  %v1630_v15 = vmul.f32 %v6425_v45, %v5824_v7 }
  0xbe   : > { %v1694_v28 = vadd.f32 %v6449_v11, %v1645_v22  ;;  %v1840_v34 = vadd.f32 %v1824_v10, %v1791_v39  ;;  %v6563_v9 = vmul.f32 %v5829_v14, %v450_v36  ;;  %v6566_v59 = vmul.f32 %v5837_v21, %v730_v8  ;;  %v4913_v10 = vld [vmem:[%s5809_s13 + $0x142] sm:$0xff] }
  0xbf   : > { %v1904_v33 = vadd.f32 %v5945_v48, %v1888_v12  ;;  %v1825_v29 = vmul.f32 %v5846_v26, %v450_v36  ;;  %v1874_v31 = vmul.f32 %v6547_v23, %v730_v8  ;;  %v1646_v54 = vadd.f32 %v1630_v15, %v6392_v52  ;;  %v4809_v8 = vld [vmem:[%s5809_s13 + $0x141] sm:$0xff] }
  0xc0   : > { %v1743_v11 = vadd.f32 %v6452_v43, %v1694_v28  ;;  %v1889_v45 = vadd.f32 %v1873_v20, %v1840_v34  ;;  %v6573_v44 = vadd.f32 %v1588_v49, %v1555_v50  ;;  %v1589_v55 = vmul.f32 %v5819_v1, %v731_v41  ;;  %v6583_v52 = vld [vmem:[%s5809_s13 + $0x140] sm:$0xff]  ;;  %v6614_v28 = vld [vmem:[#allocation3] ss:$0 sm:$0xff]  ;;  %v6620_v15 = vld [vmem:[%s5809_s13 + $0x148] sm:$0xff] }
  0xc1   : > { %5103 = vst [vmem:[%s5976_s15 + $0xa0] sm:$0xff] %v1904_v33  ;;  %v1631_v42 = vmul.f32 %v6461_v51, %v5824_v7  ;;  %v1556_v40 = vadd.f32 %v1540_v47, %v1507_v24  ;;  %v1695_v43 = vadd.f32 %v6467_v18, %v1646_v54  ;;  %v1777_v36 = vmul.f32 %v6542_v4, %v5844_v25  ;;  %v4810_v34 = vld [vmem:[%s5809_s13 + $0x149] sm:$0xff] }
  0xc2   : > { %v1792_v19 = vadd.f32 %v1776_v62, %v1743_v11  ;;  %v1905_v57 = vadd.f32 %v5945_v48, %v1889_v45  ;;  %v6587_v27 = vmul.f32 %v5829_v14, %v451_v5  ;;  %v6590_v61 = vmul.f32 %v5837_v21, %v731_v41  ;;  %v4914_v54 = vld [vmem:[%s5809_s13 + $0x14a] sm:$0xff] }
  0xc3   : > { %v1647_v51 = vadd.f32 %v1631_v42, %v6403_v38  ;;  %v1744_v32 = vadd.f32 %v6474_v6, %v1695_v43  ;;  %v1826_v18 = vmul.f32 %v5846_v26, %v451_v5  ;;  %v1778_v2 = vmul.f32 %v6583_v52, %v5844_v25  ;;  %v4811_v43 = vld [vmem:[%s5809_s13 + $0x151] sm:$0xff] }
  0xc4   : > { %v1841_v30 = vadd.f32 %v1825_v29, %v1792_v19  ;;  %5104 = vst [vmem:[%s5976_s15 + $0xa8] sm:$0xff] %v1905_v57  ;;  %v1949_v20 = vmul.f32 %v6583_v52, %v5815_v63  ;;  %v1981_v49 = vmul.f32 %v4809_v8, %v5817_v0  ;;  %v1632_v38 = vmul.f32 %v6483_v37, %v5824_v7 }
  0xc5   : > { %v1696_v48 = vadd.f32 %v6505_v16, %v1647_v51  ;;  %v6605_v6 = vadd.f32 %v1589_v55, %v1556_v40  ;;  %v1793_v5 = vadd.f32 %v1777_v36, %v1744_v32  ;;  %v1875_v12 = vmul.f32 %v6547_v23, %v731_v41  ;;  %v6643_v36 = vld [vmem:[%s5809_s13 + $0x150] sm:$0xff] }
  0xc6   : > { %v1890_v22 = vadd.f32 %v1874_v31, %v1841_v30  ;;  %v6609_v39 = vmul.f32 %v4809_v8, %v5829_v14  ;;  %v1827_v50 = vmul.f32 %v4809_v8, %v5846_v26  ;;  %v1648_v62 = vadd.f32 %v1632_v38, %v6436_v35 }
  0xc7   : > { %v1745_v16 = vadd.f32 %v6508_v56, %v1696_v48  ;;  %v1842_v24 = vadd.f32 %v1826_v18, %v1793_v5  ;;  %v1876_v47 = vmul.f32 %v6547_v23, %v4913_v10  ;;  %v2029_v41 = vmul.f32 %v4913_v10, %v5819_v1 }
  0xc8   : > { %v1906_v37 = vadd.f32 %v6614_v28, %v1890_v22  ;;  %v1997_v56 = vadd.f32 %v1981_v49, %v1949_v20  ;;  %v1697_v11 = vadd.f32 %v6531_v3, %v1648_v62  ;;  %v1779_v35 = vmul.f32 %v6620_v15, %v5844_v25  ;;  %v4915_v22 = vld [vmem:[%s5809_s13 + $0x152] sm:$0xff] }
  0xc9   : > { %v1794_v33 = vadd.f32 %v1778_v2, %v1745_v16  ;;  %v1891_v29 = vadd.f32 %v1875_v12, %v1842_v24  ;;  %v6628_v31 = vmul.f32 %v4913_v10, %v5837_v21  ;;  %v6632_v45 = vmul.f32 %v4810_v34, %v5829_v14  ;;  %v6666_v12 = vld [vmem:[%s5809_s13 + $0x158] sm:$0xff] }
  0xca   : > { %5105 = vst [vmem:[%s5976_s15 + $0xb0] sm:$0xff] %v1906_v37  ;;  %v1633_v55 = vmul.f32 %v6512_v53, %v5824_v7  ;;  %v6637_v19 = vmul.f32 %v4914_v54, %v5837_v21  ;;  %v1746_v3 = vadd.f32 %v6536_v17, %v1697_v11  ;;  %v1828_v40 = vmul.f32 %v4810_v34, %v5846_v26  ;;  %v4812_v37 = vld [vmem:[%s5809_s13 + $0x159] sm:$0xff] }
  0xcb   : > { %v1843_v42 = vadd.f32 %v1827_v50, %v1794_v33  ;;  %v1907_v8 = vadd.f32 %v6614_v28, %v1891_v29  ;;  %v1950_v57 = vmul.f32 %v6620_v15, %v5815_v63  ;;  %v1982_v51 = vmul.f32 %v4810_v34, %v5817_v0 }
  0xcc   : > { %v1649_v53 = vadd.f32 %v1633_v55, %v6455_v46  ;;  %v6650_v32 = vadd.f32 %v2029_v41, %v1997_v56  ;;  %v1795_v17 = vadd.f32 %v1779_v35, %v1746_v3  ;;  %v1877_v18 = vmul.f32 %v6547_v23, %v4914_v54 }
  0xcd   : > { %v1892_v30 = vadd.f32 %v1876_v47, %v1843_v42  ;;  %5106 = vst [vmem:[%s5976_s15 + $0xb8] sm:$0xff] %v1907_v8  ;;  %v1780_v10 = vmul.f32 %v6643_v36, %v5844_v25  ;;  %v1951_v48 = vmul.f32 %v6643_v36, %v5815_v63  ;;  %v1983_v20 = vmul.f32 %v4811_v43, %v5817_v0  ;;  %v6691_v42 = vld [vmem:[%s5809_s13 + $0x168] sm:$0xff] }
  0xce   : > { %v1698_v2 = vadd.f32 %v6563_v9, %v1649_v53  ;;  %v1844_v49 = vadd.f32 %v1828_v40, %v1795_v17  ;;  %v2030_v38 = vmul.f32 %v4914_v54, %v5819_v1  ;;  %v1634_v5 = vmul.f32 %v6542_v4, %v5824_v7  ;;  %v4917_v17 = vld [vmem:[%s5809_s13 + $0x16a] sm:$0xff] }
  0xcf   : > { %v1908_v46 = vadd.f32 %v6614_v28, %v1892_v30  ;;  %v1998_v9 = vadd.f32 %v1982_v51, %v1950_v57  ;;  %v6669_v16 = vmul.f32 %v4811_v43, %v5829_v14  ;;  %v1829_v62 = vmul.f32 %v4811_v43, %v5846_v26 }
  0xd0   : > { %v1747_v50 = vadd.f32 %v6566_v59, %v1698_v2  ;;  %v1893_v24 = vadd.f32 %v1877_v18, %v1844_v49  ;;  %v6676_v47 = vmul.f32 %v4915_v22, %v5837_v21  ;;  %v1878_v4 = vmul.f32 %v6547_v23, %v4915_v22  ;;  %v4916_v59 = vld [vmem:[%s5809_s13 + $0x15a] sm:$0xff] }
  0xd1   : > { %5107 = vst [vmem:[%s5976_s15 + $0xc0] sm:$0xff] %v1908_v46  ;;  %v1650_v41 = vadd.f32 %v1634_v5, %v6488_v58  ;;  %v1999_v56 = vadd.f32 %v1983_v20, %v1951_v48  ;;  %v2031_v34 = vmul.f32 %v4915_v22, %v5819_v1  ;;  %v1952_v11 = vmul.f32 %v6666_v12, %v5815_v63  ;;  %v4813_v58 = vld [vmem:[%s5809_s13 + $0x169] sm:$0xff] }
  0xd2   : > { %v1796_v33 = vadd.f32 %v1780_v10, %v1747_v50  ;;  %v1909_v35 = vadd.f32 %v6614_v28, %v1893_v24  ;;  %v1781_v54 = vmul.f32 %v6666_v12, %v5844_v25  ;;  %v1984_v55 = vmul.f32 %v4812_v37, %v5817_v0  ;;  %v6723_v5 = vld [vmem:[%s5809_s13 + $0x170] sm:$0xff] }
  0xd3   : > { %v1699_v29 = vadd.f32 %v6587_v27, %v1650_v41  ;;  %v6693_v3 = vadd.f32 %v2030_v38, %v1998_v9  ;;  %v6696_v43 = vmul.f32 %v4812_v37, %v5829_v14  ;;  %v1635_v8 = vmul.f32 %v6583_v52, %v5824_v7  ;;  %v4814_v38 = vld [vmem:[%s5809_s13 + $0x171] sm:$0xff] }
  0xd4   : > { %v1845_v40 = vadd.f32 %v1829_v62, %v1796_v33  ;;  %5108 = vst [vmem:[%s5976_s15 + $0xc8] sm:$0xff] %v1909_v35  ;;  %v1830_v57 = vmul.f32 %v4812_v37, %v5846_v26  ;;  %v2000_v51 = vadd.f32 %v1984_v55, %v1952_v11  ;;  %v2032_v53 = vmul.f32 %v4916_v59, %v5819_v1  ;;  %v4918_v11 = vld [vmem:[%s5809_s13 + $0x172] sm:$0xff] }
  0xd5   : > { %v1748_v27 = vadd.f32 %v6590_v61, %v1699_v29  ;;  %v1651_v18 = vadd.f32 %v1635_v8, %v6528_v13  ;;  %v1953_v2 = vmul.f32 %v6691_v42, %v5815_v63  ;;  %v1985_v52 = vmul.f32 %v4813_v58, %v5817_v0  ;;  %v4815_v29 = vld [vmem:[%s5809_s13 + $0x179] sm:$0xff] }
  0xd6   : > { %v1894_v30 = vadd.f32 %v1878_v4, %v1845_v40  ;;  %v6709_v10 = vadd.f32 %v2031_v34, %v1999_v56  ;;  %v6712_v61 = vmul.f32 %v4916_v59, %v5837_v21  ;;  %v1879_v20 = vmul.f32 %v6547_v23, %v4916_v59 }
  0xd7   : > { %v1797_v48 = vadd.f32 %v1781_v54, %v1748_v27  ;;  %v1700_v49 = vadd.f32 %v6609_v39, %v1651_v18  ;;  %v1782_v13 = vmul.f32 %v6691_v42, %v5844_v25  ;;  %v1636_v22 = vmul.f32 %v6620_v15, %v5824_v7  ;;  %v6747_v54 = vld [vmem:[%s5809_s13 + $0x178] sm:$0xff] }
  0xd8   : > { %v1910_v46 = vadd.f32 %v6614_v28, %v1894_v30  ;;  %v1831_v50 = vmul.f32 %v4813_v58, %v5846_v26  ;;  %v1880_v62 = vmul.f32 %v6547_v23, %v4917_v17  ;;  %v2033_v37 = vmul.f32 %v4917_v17, %v5819_v1 }
  0xd9   : > { %v1846_v9 = vadd.f32 %v1830_v57, %v1797_v48  ;;  %v6729_v39 = vadd.f32 %v2032_v53, %v2000_v51  ;;  %v1749_v24 = vadd.f32 %v6628_v31, %v1700_v49  ;;  %v2001_v4 = vadd.f32 %v1985_v52, %v1953_v2  ;;  %v4919_v52 = vld [vmem:[%s5809_s13 + $0x17a] sm:$0xff] }
  0xda   : > { %5109 = vst [vmem:[%s5976_s15 + $0xd0] sm:$0xff] %v1910_v46  ;;  %v1652_v15 = vadd.f32 %v1636_v22, %v6545_v60  ;;  %v6734_v33 = vmul.f32 %v4813_v58, %v5829_v14  ;;  %v1954_v56 = vmul.f32 %v6723_v5, %v5815_v63  ;;  %v1986_v34 = vmul.f32 %v4814_v38, %v5817_v0  ;;  %v4816_v49 = vld [vmem:[%s5809_s13 + $0x181] sm:$0xff] }
  0xdb   : > { %v1895_v41 = vadd.f32 %v1879_v20, %v1846_v9  ;;  %v1798_v59 = vadd.f32 %v1782_v13, %v1749_v24  ;;  %v1783_v31 = vmul.f32 %v6723_v5, %v5844_v25  ;;  %v1637_v60 = vmul.f32 %v6643_v36, %v5824_v7  ;;  %v6779_v22 = vld [vmem:[%s5809_s13 + $0x180] sm:$0xff] }
  0xdc   : > { %v1701_v35 = vadd.f32 %v6632_v45, %v1652_v15  ;;  %v6751_v58 = vmul.f32 %v4917_v17, %v5837_v21  ;;  %v1832_v40 = vmul.f32 %v4814_v38, %v5846_v26  ;;  %v1881_v8 = vmul.f32 %v6547_v23, %v4918_v11  ;;  %v4817_v15 = vld [vmem:[%s5809_s13 + $0x191] sm:$0xff] }
  0xdd   : > { %v1911_v55 = vadd.f32 %v6614_v28, %v1895_v41  ;;  %v1847_v45 = vadd.f32 %v1831_v50, %v1798_v59  ;;  %v6755_v27 = vadd.f32 %v2033_v37, %v2001_v4  ;;  %v1653_v36 = vadd.f32 %v1637_v60, %v6573_v44 }
  0xde   : > { %v1750_v57 = vadd.f32 %v6637_v19, %v1701_v35  ;;  %v2002_v51 = vadd.f32 %v1986_v34, %v1954_v56  ;;  %v2034_v53 = vmul.f32 %v4918_v11, %v5819_v1  ;;  %v1955_v30 = vmul.f32 %v6747_v54, %v5815_v63 }
  0xdf   : > { %5110 = vst [vmem:[%s5976_s15 + $0xd8] sm:$0xff] %v1911_v55  ;;  %v1987_v17 = vmul.f32 %v4815_v29, %v5817_v0  ;;  %v1896_v18 = vadd.f32 %v1880_v62, %v1847_v45  ;;  %v1702_v48 = vadd.f32 %v6669_v16, %v1653_v36  ;;  %v1784_v19 = vmul.f32 %v6747_v54, %v5844_v25  ;;  %v6785_v62 = vld [vmem:[%s5809_s13 + $0x190] sm:$0xff] }
  0xe0   : > { %v1799_v2 = vadd.f32 %v1783_v31, %v1750_v57  ;;  %v6769_v44 = vmul.f32 %v4814_v38, %v5829_v14  ;;  %v6772_v20 = vmul.f32 %v4918_v11, %v5837_v21  ;;  %v1833_v46 = vmul.f32 %v4815_v29, %v5846_v26  ;;  %v4920_v11 = vld [vmem:[%s5809_s13 + $0x182] sm:$0xff] }
  0xe1   : > { %v1638_v13 = vmul.f32 %v6666_v12, %v5824_v7  ;;  %v1912_v16 = vadd.f32 %v6614_v28, %v1896_v18  ;;  %v1751_v50 = vadd.f32 %v6676_v47, %v1702_v48  ;;  %v1882_v38 = vmul.f32 %v6547_v23, %v4919_v52  ;;  %v4818_v18 = vld [vmem:[%s5809_s13 + $0x199] sm:$0xff] }
  0xe2   : > { %v1848_v9 = vadd.f32 %v1832_v40, %v1799_v2  ;;  %v6787_v37 = vadd.f32 %v2034_v53, %v2002_v51  ;;  %v2003_v24 = vadd.f32 %v1987_v17, %v1955_v30  ;;  %v2035_v4 = vmul.f32 %v4919_v52, %v5819_v1  ;;  %v6822_v2 = vld [vmem:[%s5809_s13 + $0x198] sm:$0xff] }
  0xe3   : > { %v1654_v12 = vadd.f32 %v1638_v13, %v6605_v6  ;;  %5111 = vst [vmem:[%s5976_s15 + $0xe0] sm:$0xff] %v1912_v16  ;;  %v1800_v56 = vadd.f32 %v1784_v19, %v1751_v50  ;;  %v1956_v34 = vmul.f32 %v6779_v22, %v5815_v63  ;;  %v1988_v47 = vmul.f32 %v4816_v49, %v5817_v0 }
  0xe4   : > { %v1897_v41 = vadd.f32 %v1881_v8, %v1848_v9  ;;  %v6797_v59 = vmul.f32 %v4815_v29, %v5829_v14  ;;  %v1785_v31 = vmul.f32 %v6779_v22, %v5844_v25  ;;  %v1957_v6 = vmul.f32 %v6785_v62, %v5815_v63  ;;  %v4921_v8 = vld [vmem:[%s5809_s13 + $0x192] sm:$0xff] }
  0xe5   : > { %v1703_v35 = vadd.f32 %v6696_v43, %v1654_v12  ;;  %v1849_v55 = vadd.f32 %v1833_v46, %v1800_v56  ;;  %v6807_v40 = vmul.f32 %v4919_v52, %v5837_v21  ;;  %v1989_v29 = vmul.f32 %v4817_v15, %v5817_v0  ;;  %v4922_v56 = vld [vmem:[%s5809_s13 + $0x19a] sm:$0xff] }
  0xe6   : > { %v1913_v60 = vadd.f32 %v6614_v28, %v1897_v41  ;;  %v6811_v45 = vadd.f32 %v2035_v4, %v2003_v24  ;;  %v1834_v57 = vmul.f32 %v4816_v49, %v5846_v26  ;;  %v2078_v36 = vmul.f32 %v6691_v42, %v5824_v7  ;;  %v6841_v4 = vld [vmem:[%s5809_s13 + $0x1a0] sm:$0xff] }
  0xe7   : > { %v1752_v43 = vadd.f32 %v6712_v61, %v1703_v35  ;;  %v1898_v51 = vadd.f32 %v1882_v38, %v1849_v55  ;;  %v1883_v53 = vmul.f32 %v6547_v23, %v4920_v11  ;;  %v2004_v30 = vadd.f32 %v1988_v47, %v1956_v34 }
  0xe8   : > { %5112 = vst [vmem:[%s5976_s15 + $0xe8] sm:$0xff] %v1913_v60  ;;  %v2036_v17 = vmul.f32 %v4920_v11, %v5819_v1  ;;  %v2005_v61 = vadd.f32 %v1989_v29, %v1957_v6  ;;  %v2037_v48 = vmul.f32 %v4921_v8, %v5819_v1  ;;  %v2094_v42 = vadd.f32 %v2078_v36, %v6650_v32  ;;  %v4819_v32 = vld [vmem:[%s5809_s13 + $0x1a1] sm:$0xff] }
  0xe9   : > { %v1801_v52 = vadd.f32 %v1785_v31, %v1752_v43  ;;  %v1914_v19 = vadd.f32 %v6614_v28, %v1898_v51  ;;  %v6828_v46 = vmul.f32 %v4816_v49, %v5829_v14  ;;  %v6831_v13 = vmul.f32 %v4920_v11, %v5837_v21  ;;  %v4820_v51 = vld [vmem:[%s5809_s13 + $0x1a9] sm:$0xff] }
  0xea   : > { %v2225_v16 = vmul.f32 %v6785_v62, %v5844_v25  ;;  %v2143_v50 = vadd.f32 %v6734_v33, %v2094_v42  ;;  %v1958_v38 = vmul.f32 %v6822_v2, %v5815_v63  ;;  %v1990_v24 = vmul.f32 %v4818_v18, %v5817_v0 }
  0xeb   : > { %v1850_v9 = vadd.f32 %v1834_v57, %v1801_v52  ;;  %5113 = vst [vmem:[%s5976_s15 + $0xf0] sm:$0xff] %v1914_v19  ;;  %v6844_v49 = vadd.f32 %v2036_v17, %v2004_v30  ;;  %v6847_v12 = vmul.f32 %v4817_v15, %v5829_v14  ;;  %v6850_v41 = vmul.f32 %v4921_v8, %v5837_v21 }
  0xec   : > { %v2079_v33 = vmul.f32 %v6723_v5, %v5824_v7  ;;  %v6855_v47 = vadd.f32 %v2037_v48, %v2005_v61  ;;  %v2192_v11 = vadd.f32 %v6751_v58, %v2143_v50  ;;  %v2274_v35 = vmul.f32 %v4817_v15, %v5846_v26  ;;  %v4923_v58 = vld [vmem:[%s5809_s13 + $0x1a2] sm:$0xff] }
  0xed   : > { %v1899_v34 = vadd.f32 %v1883_v53, %v1850_v9  ;;  %v2323_v31 = vmul.f32 %v6547_v23, %v4921_v8  ;;  %v1959_v60 = vmul.f32 %v6841_v4, %v5815_v63  ;;  %v1991_v55 = vmul.f32 %v4819_v32, %v5817_v0  ;;  %v6877_v53 = vld [vmem:[%s5809_s13 + $0x1a8] sm:$0xff] }
  0xee   : > { %v2095_v6 = vadd.f32 %v2079_v33, %v6693_v3  ;;  %v2241_v29 = vadd.f32 %v2225_v16, %v2192_v11  ;;  %v2006_v43 = vadd.f32 %v1990_v24, %v1958_v38  ;;  %v2038_v57 = vmul.f32 %v4922_v56, %v5819_v1  ;;  %v4924_v24 = vld [vmem:[%s5809_s13 + $0x1aa] sm:$0xff] }
  0xef   : > { %v1915_v5 = vadd.f32 %v6614_v28, %v1899_v34  ;;  %v6868_v36 = vmul.f32 %v4818_v18, %v5829_v14  ;;  %v2226_v3 = vmul.f32 %v6822_v2, %v5844_v25  ;;  %v2080_v8 = vmul.f32 %v6747_v54, %v5824_v7 }
  0xf0   : > { %v2144_v15 = vadd.f32 %v6769_v44, %v2095_v6  ;;  %v2290_v30 = vadd.f32 %v2274_v35, %v2241_v29  ;;  %v6881_v17 = vmul.f32 %v4922_v56, %v5837_v21  ;;  %v2275_v52 = vmul.f32 %v4818_v18, %v5846_v26 }
  0xf1   : > { %5114 = vst [vmem:[%s5976_s15 + $0xf8] sm:$0xff] %v1915_v5  ;;  %v2324_v61 = vmul.f32 %v6547_v23, %v4922_v56  ;;  %v2007_v48 = vadd.f32 %v1991_v55, %v1959_v60  ;;  %v2039_v42 = vmul.f32 %v4923_v58, %v5819_v1  ;;  %v2096_v54 = vadd.f32 %v2080_v8, %v6709_v10  ;;  %v4821_v60 = vld [vmem:[%s5809_s13 + $0x1b9] sm:$0xff] }
  0xf2   : > { %v2193_v44 = vadd.f32 %v6772_v20, %v2144_v15  ;;  %v2339_v19 = vadd.f32 %v2323_v31, %v2290_v30  ;;  %v6888_v16 = vadd.f32 %v2038_v57, %v2006_v43  ;;  %v1960_v9 = vmul.f32 %v6877_v53, %v5815_v63  ;;  %v4925_v15 = vld [vmem:[%s5809_s13 + $0x1ba] sm:$0xff] }
  0xf3   : > { %v1992_v50 = vmul.f32 %v4820_v51, %v5817_v0  ;;  %v2145_v38 = vadd.f32 %v6797_v59, %v2096_v54  ;;  %v2227_v20 = vmul.f32 %v6841_v4, %v5844_v25  ;;  %v2081_v10 = vmul.f32 %v6779_v22, %v5824_v7  ;;  %v6913_v22 = vld [vmem:[%s5809_s13 + $0x1b8] sm:$0xff] }
  0xf4   : > { %v2242_v18 = vadd.f32 %v2226_v3, %v2193_v44  ;;  %v2355_v56 = vadd.f32 %v6614_v28, %v2339_v19  ;;  %v6901_v33 = vmul.f32 %v4819_v32, %v5829_v14  ;;  %v6904_v34 = vmul.f32 %v4923_v58, %v5837_v21 }
  0xf5   : > { %v2276_v11 = vmul.f32 %v4819_v32, %v5846_v26  ;;  %v6907_v59 = vadd.f32 %v2039_v42, %v2007_v48  ;;  %v2194_v31 = vadd.f32 %v6807_v40, %v2145_v38  ;;  %v2097_v6 = vadd.f32 %v2081_v10, %v6729_v39  ;;  %v4926_v10 = vld [vmem:[%s5809_s13 + $0x1c2] sm:$0xff] }
  0xf6   : > { %v2291_v35 = vadd.f32 %v2275_v52, %v2242_v18  ;;  %5163 = vst [vmem:[%s5976_s15 + $0x100] sm:$0xff] %v2355_v56  ;;  %v2325_v55 = vmul.f32 %v6547_v23, %v4923_v58  ;;  %v2008_v5 = vadd.f32 %v1992_v50, %v1960_v9  ;;  %v2040_v29 = vmul.f32 %v4924_v24, %v5819_v1  ;;  %v4822_v52 = vld [vmem:[%s5809_s13 + $0x1c1] sm:$0xff] }
  0xf7   : > { %v6919_v32 = vmul.f32 %v4820_v51, %v5829_v14  ;;  %v2243_v57 = vadd.f32 %v2227_v20, %v2194_v31  ;;  %v2146_v40 = vadd.f32 %v6828_v46, %v2097_v6  ;;  %v2228_v39 = vmul.f32 %v6877_v53, %v5844_v25  ;;  %v4823_v6 = vld [vmem:[%s5809_s13 + $0x1c9] sm:$0xff] }
  0xf8   : > { %v2340_v43 = vadd.f32 %v2324_v61, %v2291_v35  ;;  %v6926_v3 = vmul.f32 %v4924_v24, %v5837_v21  ;;  %v1961_v58 = vmul.f32 %v6913_v22, %v5815_v63  ;;  %v1993_v8 = vmul.f32 %v4821_v60, %v5817_v0  ;;  %v6935_v61 = vld [vmem:[%s5809_s13 + $0x1c0] sm:$0xff] }
  0xf9   : > { %v2082_v30 = vmul.f32 %v6785_v62, %v5824_v7  ;;  %v2292_v44 = vadd.f32 %v2276_v11, %v2243_v57  ;;  %v2195_v48 = vadd.f32 %v6831_v13, %v2146_v40  ;;  %v2277_v42 = vmul.f32 %v4820_v51, %v5846_v26 }
  0xfa   : > { %v2356_v46 = vadd.f32 %v6614_v28, %v2340_v43  ;;  %v6940_v54 = vadd.f32 %v2040_v29, %v2008_v5  ;;  %v2326_v19 = vmul.f32 %v6547_v23, %v4924_v24  ;;  %v2041_v9 = vmul.f32 %v4925_v15, %v5819_v1 }
  0xfb   : > { %v2098_v62 = vadd.f32 %v2082_v30, %v6755_v27  ;;  %v2341_v50 = vadd.f32 %v2325_v55, %v2292_v44  ;;  %v2244_v18 = vadd.f32 %v2228_v39, %v2195_v48  ;;  %v1962_v38 = vmul.f32 %v6935_v61, %v5815_v63  ;;  %v6964_v55 = vld [vmem:[%s5809_s13 + $0x1c8] sm:$0xff] }
  0xfc   : > { %5164 = vst [vmem:[%s5976_s15 + $0x108] sm:$0xff] %v2356_v46  ;;  %v1994_v13 = vmul.f32 %v4822_v52, %v5817_v0  ;;  %v2009_v51 = vadd.f32 %v1993_v8, %v1961_v58  ;;  %v2229_v24 = vmul.f32 %v6913_v22, %v5844_v25  ;;  %v2083_v27 = vmul.f32 %v6822_v2, %v5824_v7  ;;  %v4927_v8 = vld [vmem:[%s5809_s13 + $0x1ca] sm:$0xff] }
  0xfd   : > { %v2147_v20 = vadd.f32 %v6847_v12, %v2098_v62  ;;  %v2357_v56 = vadd.f32 %v6614_v28, %v2341_v50  ;;  %v2293_v11 = vadd.f32 %v2277_v42, %v2244_v18  ;;  %v6957_v35 = vmul.f32 %v4821_v60, %v5829_v14  ;;  %v4824_v62 = vld [vmem:[%s5809_s13 + $0x1d1] sm:$0xff] }
  0xfe   : > { %v6960_v31 = vmul.f32 %v4925_v15, %v5837_v21  ;;  %v2278_v5 = vmul.f32 %v4821_v60, %v5846_v26  ;;  %v2327_v29 = vmul.f32 %v6547_v23, %v4925_v15  ;;  %v2099_v2 = vadd.f32 %v2083_v27, %v6787_v37  ;;  %v6994_v50 = vld [vmem:[%s5809_s13 + $0x1d0] sm:$0xff] }
  0xff   : > { %v2196_v12 = vadd.f32 %v6850_v41, %v2147_v20  ;;  %5165 = vst [vmem:[%s5976_s15 + $0x110] sm:$0xff] %v2357_v56  ;;  %v2342_v43 = vadd.f32 %v2326_v19, %v2293_v11  ;;  %v2010_v57 = vadd.f32 %v1994_v13, %v1962_v38  ;;  %v2042_v40 = vmul.f32 %v4926_v10, %v5819_v1 }
 0x100   : > { %v2230_v39 = vmul.f32 %v6935_v61, %v5844_v25  ;;  %v2148_v41 = vadd.f32 %v6868_v36, %v2099_v2  ;;  %v1963_v60 = vmul.f32 %v6964_v55, %v5815_v63  ;;  %v1995_v37 = vmul.f32 %v4823_v6, %v5817_v0 }
 0x101   : > { %v2245_v58 = vadd.f32 %v2229_v24, %v2196_v12  ;;  %v2358_v15 = vadd.f32 %v6614_v28, %v2342_v43  ;;  %v6980_v30 = vadd.f32 %v2041_v9, %v2009_v51  ;;  %v6983_v46 = vmul.f32 %v4822_v52, %v5829_v14  ;;  %v4928_v24 = vld [vmem:[%s5809_s13 + $0x1d2] sm:$0xff] }
 0x102   : > { %v2084_v44 = vmul.f32 %v6841_v4, %v5824_v7  ;;  %v6988_v36 = vmul.f32 %v4926_v10, %v5837_v21  ;;  %v2197_v42 = vadd.f32 %v6881_v17, %v2148_v41  ;;  %v2279_v19 = vmul.f32 %v4822_v52, %v5846_v26 }
 0x103   : > { %v2294_v48 = vadd.f32 %v2278_v5, %v2245_v58  ;;  %5166 = vst [vmem:[%s5976_s15 + $0x118] sm:$0xff] %v2358_v15  ;;  %v6997_v9 = vadd.f32 %v2042_v40, %v2010_v57  ;;  %v2328_v18 = vmul.f32 %v6547_v23, %v4926_v10  ;;  %v2043_v38 = vmul.f32 %v4927_v8, %v5819_v1 }
 0x104   : > { %v2100_v4 = vadd.f32 %v2084_v44, %v6811_v45  ;;  %v2246_v51 = vadd.f32 %v2230_v39, %v2197_v42  ;;  %v2011_v20 = vadd.f32 %v1995_v37, %v1963_v60  ;;  %v2231_v17 = vmul.f32 %v6964_v55, %v5844_v25 }
 0x105   : > { %v2343_v13 = vadd.f32 %v2327_v29, %v2294_v48  ;;  %v1964_v27 = vmul.f32 %v6994_v50, %v5815_v63  ;;  %v1996_v56 = vmul.f32 %v4824_v62, %v5817_v0  ;;  %v2085_v10 = vmul.f32 %v6877_v53, %v5824_v7 }
 0x106   : > { %v2149_v52 = vadd.f32 %v6901_v33, %v2100_v4  ;;  %v2295_v11 = vadd.f32 %v2279_v19, %v2246_v51  ;;  %v7013_v12 = vmul.f32 %v4823_v6, %v5829_v14  ;;  %v7016_v5 = vmul.f32 %v4927_v8, %v5837_v21  ;;  %v4929_v19 = vld [vmem:[%s5809_s13 + $0x1e2] sm:$0xff] }
 0x107   : > { %v2359_v45 = vadd.f32 %v6614_v28, %v2343_v13  ;;  %v2280_v29 = vmul.f32 %v4823_v6, %v5846_v26  ;;  %v2329_v2 = vmul.f32 %v6547_v23, %v4927_v8  ;;  %v2101_v43 = vadd.f32 %v2085_v10, %v6844_v49  ;;  %v4825_v8 = vld [vmem:[%s5809_s13 + $0x1e1] sm:$0xff] }
 0x108   : > { %v2198_v33 = vadd.f32 %v6904_v34, %v2149_v52  ;;  %v2344_v53 = vadd.f32 %v2328_v18, %v2295_v11  ;;  %v7023_v57 = vadd.f32 %v2043_v38, %v2011_v20  ;;  %v2044_v40 = vmul.f32 %v4928_v24, %v5819_v1  ;;  %v7033_v49 = vld [vmem:[%s5809_s13 + $0x1e0] sm:$0xff] }
 0x109   : > { %5167 = vst [vmem:[%s5976_s15 + $0x120] sm:$0xff] %v2359_v45  ;;  %v2086_v39 = vmul.f32 %v6913_v22, %v5824_v7  ;;  %v2012_v41 = vadd.f32 %v1996_v56, %v1964_v27  ;;  %v2150_v34 = vadd.f32 %v6919_v32, %v2101_v43  ;;  %v2232_v6 = vmul.f32 %v6994_v50, %v5844_v25  ;;  %v7068_v45 = vld [vmem:[%s5809_s13 + $0x1e8] sm:$0xff] }
 0x10a   : > { %v2247_v58 = vadd.f32 %v2231_v17, %v2198_v33  ;;  %v2360_v60 = vadd.f32 %v6614_v28, %v2344_v53  ;;  %v7037_v37 = vmul.f32 %v4824_v62, %v5829_v14  ;;  %v7040_v15 = vmul.f32 %v4928_v24, %v5837_v21  ;;  %v4826_v33 = vld [vmem:[%s5809_s13 + $0x1e9] sm:$0xff] }
 0x10b   : > { %v2102_v22 = vadd.f32 %v2086_v39, %v6855_v47  ;;  %v2199_v48 = vadd.f32 %v6926_v3, %v2150_v34  ;;  %v2281_v32 = vmul.f32 %v4824_v62, %v5846_v26  ;;  %v2233_v42 = vmul.f32 %v7033_v49, %v5844_v25  ;;  %v4930_v43 = vld [vmem:[%s5809_s13 + $0x1ea] sm:$0xff] }
 0x10c   : > { %v2296_v44 = vadd.f32 %v2280_v29, %v2247_v58  ;;  %5168 = vst [vmem:[%s5976_s15 + $0x128] sm:$0xff] %v2360_v60  ;;  %v2405_v38 = vmul.f32 %v7033_v49, %v5815_v63  ;;  %v2438_v4 = vmul.f32 %v4825_v8, %v5817_v0  ;;  %v2087_v47 = vmul.f32 %v6935_v61, %v5824_v7  ;;  %v4827_v34 = vld [vmem:[%s5809_s13 + $0x1f1] sm:$0xff] }
 0x10d   : > { %v2151_v18 = vadd.f32 %v6957_v35, %v2102_v22  ;;  %v7055_v13 = vadd.f32 %v2044_v40, %v2012_v41  ;;  %v2248_v62 = vadd.f32 %v2232_v6, %v2199_v48  ;;  %v2330_v51 = vmul.f32 %v6547_v23, %v4928_v24  ;;  %v7091_v6 = vld [vmem:[%s5809_s13 + $0x1f0] sm:$0xff] }
 0x10e   : > { %v2345_v3 = vadd.f32 %v2329_v2, %v2296_v44  ;;  %v7059_v20 = vmul.f32 %v4825_v8, %v5829_v14  ;;  %v2282_v17 = vmul.f32 %v4825_v8, %v5846_v26  ;;  %v2103_v52 = vadd.f32 %v2087_v47, %v6888_v16 }
 0x10f   : > { %v2200_v35 = vadd.f32 %v6960_v31, %v2151_v18  ;;  %v2297_v27 = vadd.f32 %v2281_v32, %v2248_v62  ;;  %v2331_v56 = vmul.f32 %v6547_v23, %v4929_v19  ;;  %v2487_v10 = vmul.f32 %v4929_v19, %v5819_v1 }
 0x110   : > { %v2361_v61 = vadd.f32 %v6614_v28, %v2345_v3  ;;  %v2454_v11 = vadd.f32 %v2438_v4, %v2405_v38  ;;  %v2152_v31 = vadd.f32 %v6983_v46, %v2103_v52  ;;  %v2234_v29 = vmul.f32 %v7068_v45, %v5844_v25  ;;  %v4931_v3 = vld [vmem:[%s5809_s13 + $0x1f2] sm:$0xff] }
 0x111   : > { %v2249_v24 = vadd.f32 %v2233_v42, %v2200_v35  ;;  %v2346_v16 = vadd.f32 %v2330_v51, %v2297_v27  ;;  %v7076_v2 = vmul.f32 %v4929_v19, %v5837_v21  ;;  %v7080_v53 = vmul.f32 %v4826_v33, %v5829_v14  ;;  %v7114_v51 = vld [vmem:[%s5809_s13 + $0x1f8] sm:$0xff] }
 0x112   : > { %5169 = vst [vmem:[%s5976_s15 + $0x130] sm:$0xff] %v2361_v61  ;;  %v2088_v40 = vmul.f32 %v6964_v55, %v5824_v7  ;;  %v7085_v58 = vmul.f32 %v4930_v43, %v5837_v21  ;;  %v2201_v46 = vadd.f32 %v6988_v36, %v2152_v31  ;;  %v2283_v41 = vmul.f32 %v4826_v33, %v5846_v26  ;;  %v4828_v61 = vld [vmem:[%s5809_s13 + $0x1f9] sm:$0xff] }
 0x113   : > { %v2298_v39 = vadd.f32 %v2282_v17, %v2249_v24  ;;  %v2362_v8 = vadd.f32 %v6614_v28, %v2346_v16  ;;  %v2406_v60 = vmul.f32 %v7068_v45, %v5815_v63  ;;  %v2439_v22 = vmul.f32 %v4826_v33, %v5817_v0 }
 0x114   : > { %v2104_v55 = vadd.f32 %v2088_v40, %v6907_v59  ;;  %v7098_v48 = vadd.f32 %v2487_v10, %v2454_v11  ;;  %v2250_v36 = vadd.f32 %v2234_v29, %v2201_v46  ;;  %v2332_v32 = vmul.f32 %v6547_v23, %v4930_v43 }
 0x115   : > { %v2347_v44 = vadd.f32 %v2331_v56, %v2298_v39  ;;  %5170 = vst [vmem:[%s5976_s15 + $0x138] sm:$0xff] %v2362_v8  ;;  %v2235_v19 = vmul.f32 %v7091_v6, %v5844_v25  ;;  %v2407_v18 = vmul.f32 %v7091_v6, %v5815_v63  ;;  %v2440_v38 = vmul.f32 %v4827_v34, %v5817_v0  ;;  %v7139_v39 = vld [vmem:[%s5809_s13 + $0x208] sm:$0xff] }
 0x116   : > { %v2153_v42 = vadd.f32 %v7013_v12, %v2104_v55  ;;  %v2299_v4 = vadd.f32 %v2283_v41, %v2250_v36  ;;  %v2488_v47 = vmul.f32 %v4930_v43, %v5819_v1  ;;  %v2089_v62 = vmul.f32 %v6994_v50, %v5824_v7  ;;  %v4933_v36 = vld [vmem:[%s5809_s13 + $0x20a] sm:$0xff] }
 0x117   : > { %v2363_v59 = vadd.f32 %v6614_v28, %v2347_v44  ;;  %v2455_v12 = vadd.f32 %v2439_v22, %v2406_v60  ;;  %v7117_v35 = vmul.f32 %v4827_v34, %v5829_v14  ;;  %v2284_v52 = vmul.f32 %v4827_v34, %v5846_v26 }
 0x118   : > { %v2202_v17 = vadd.f32 %v7016_v5, %v2153_v42  ;;  %v2348_v27 = vadd.f32 %v2332_v32, %v2299_v4  ;;  %v7124_v56 = vmul.f32 %v4931_v3, %v5837_v21  ;;  %v2333_v50 = vmul.f32 %v6547_v23, %v4931_v3  ;;  %v4932_v5 = vld [vmem:[%s5809_s13 + $0x1fa] sm:$0xff] }
 0x119   : > { %5171 = vst [vmem:[%s5976_s15 + $0x140] sm:$0xff] %v2363_v59  ;;  %v2105_v10 = vadd.f32 %v2089_v62, %v6940_v54  ;;  %v2456_v11 = vadd.f32 %v2440_v38, %v2407_v18  ;;  %v2489_v33 = vmul.f32 %v4931_v3, %v5819_v1  ;;  %v2408_v31 = vmul.f32 %v7114_v51, %v5815_v63  ;;  %v4829_v54 = vld [vmem:[%s5809_s13 + $0x209] sm:$0xff] }
 0x11a   : > { %v2251_v24 = vadd.f32 %v2235_v19, %v2202_v17  ;;  %v2364_v29 = vadd.f32 %v6614_v28, %v2348_v27  ;;  %v2236_v43 = vmul.f32 %v7114_v51, %v5844_v25  ;;  %v2441_v40 = vmul.f32 %v4828_v61, %v5817_v0  ;;  %v7171_v62 = vld [vmem:[%s5809_s13 + $0x210] sm:$0xff] }
 0x11b   : > { %v2154_v16 = vadd.f32 %v7037_v37, %v2105_v10  ;;  %v7141_v46 = vadd.f32 %v2488_v47, %v2455_v12  ;;  %v7144_v34 = vmul.f32 %v4828_v61, %v5829_v14  ;;  %v2090_v8 = vmul.f32 %v7033_v49, %v5824_v7  ;;  %v4830_v47 = vld [vmem:[%s5809_s13 + $0x211] sm:$0xff] }
 0x11c   : > { %v2300_v41 = vadd.f32 %v2284_v52, %v2251_v24  ;;  %5172 = vst [vmem:[%s5976_s15 + $0x148] sm:$0xff] %v2364_v29  ;;  %v2285_v60 = vmul.f32 %v4828_v61, %v5846_v26  ;;  %v2457_v22 = vadd.f32 %v2441_v40, %v2408_v31  ;;  %v2490_v55 = vmul.f32 %v4932_v5, %v5819_v1  ;;  %v4831_v29 = vld [vmem:[%s5809_s13 + $0x219] sm:$0xff] }
 0x11d   : > { %v2203_v37 = vadd.f32 %v7040_v15, %v2154_v16  ;;  %v2106_v32 = vadd.f32 %v2090_v8, %v6980_v30  ;;  %v2409_v42 = vmul.f32 %v7139_v39, %v5815_v63  ;;  %v2442_v49 = vmul.f32 %v4829_v54, %v5817_v0  ;;  %v7195_v16 = vld [vmem:[%s5809_s13 + $0x218] sm:$0xff] }
 0x11e   : > { %v2349_v44 = vadd.f32 %v2333_v50, %v2300_v41  ;;  %v7157_v19 = vadd.f32 %v2489_v33, %v2456_v11  ;;  %v7160_v15 = vmul.f32 %v4932_v5, %v5837_v21  ;;  %v2334_v38 = vmul.f32 %v6547_v23, %v4932_v5  ;;  %v4934_v5 = vld [vmem:[%s5809_s13 + $0x212] sm:$0xff]  ;;  %v7202_v41 = vld [vmem:[#allocation2 + $0x8] ss:$0 sm:$0xff] }
 0x11f   : > { %v2252_v18 = vadd.f32 %v2236_v43, %v2203_v37  ;;  %v2155_v4 = vadd.f32 %v7059_v20, %v2106_v32  ;;  %v2237_v30 = vmul.f32 %v7139_v39, %v5844_v25  ;;  %v2091_v3 = vmul.f32 %v7068_v45, %v5824_v7 }
 0x120   : > { %v2365_v59 = vadd.f32 %v6614_v28, %v2349_v44  ;;  %v2286_v17 = vmul.f32 %v4829_v54, %v5846_v26  ;;  %v2335_v52 = vmul.f32 %v6547_v23, %v4933_v36  ;;  %v2491_v61 = vmul.f32 %v4933_v36, %v5819_v1 }
 0x121   : > { %v2301_v12 = vadd.f32 %v2285_v60, %v2252_v18  ;;  %v7177_v20 = vadd.f32 %v2490_v55, %v2457_v22  ;;  %v2204_v27 = vadd.f32 %v7076_v2, %v2155_v4  ;;  %v2458_v50 = vadd.f32 %v2442_v49, %v2409_v42  ;;  %v4935_v49 = vld [vmem:[%s5809_s13 + $0x21a] sm:$0xff] }
 0x122   : > { %5173 = vst [vmem:[%s5976_s15 + $0x150] sm:$0xff] %v2365_v59  ;;  %v2107_v45 = vadd.f32 %v2091_v3, %v6997_v9  ;;  %v7182_v24 = vmul.f32 %v4829_v54, %v5829_v14  ;;  %v2410_v11 = vmul.f32 %v7171_v62, %v5815_v63  ;;  %v2443_v23 = vmul.f32 %v4830_v47, %v5817_v0  ;;  %v4832_v4 = vld [vmem:[%s5809_s13 + $0x221] sm:$0xff] }
 0x123   : > { %v2350_v10 = vadd.f32 %v2334_v38, %v2301_v12  ;;  %v2253_v33 = vadd.f32 %v2237_v30, %v2204_v27  ;;  %v2238_v2 = vmul.f32 %v7171_v62, %v5844_v25  ;;  %v2092_v9 = vmul.f32 %v7091_v6, %v5824_v7  ;;  %v7229_v3 = vld [vmem:[%s5809_s13 + $0x220] sm:$0xff] }
 0x124   : > { %v2156_v31 = vadd.f32 %v7080_v53, %v2107_v45  ;;  %v7199_v40 = vmul.f32 %v4933_v36, %v5837_v21  ;;  %v2287_v54 = vmul.f32 %v4830_v47, %v5846_v26  ;;  %v2336_v53 = vmul.f32 %v7202_v41, %v4934_v5  ;;  %v4833_v45 = vld [vmem:[%s5809_s13 + $0x231] sm:$0xff] }
 0x125   : > { %v2366_v43 = vadd.f32 %v6614_v28, %v2350_v10  ;;  %v2302_v8 = vadd.f32 %v2286_v17, %v2253_v33  ;;  %v7205_v37 = vadd.f32 %v2491_v61, %v2458_v50  ;;  %v2108_v60 = vadd.f32 %v2092_v9, %v7023_v57 }
 0x126   : > { %v2205_v6 = vadd.f32 %v7085_v58, %v2156_v31  ;;  %v2459_v22 = vadd.f32 %v2443_v23, %v2410_v11  ;;  %v2492_v55 = vmul.f32 %v4934_v5, %v5819_v1  ;;  %v2411_v44 = vmul.f32 %v7195_v16, %v5815_v63 }
 0x127   : > { %5174 = vst [vmem:[%s5976_s15 + $0x158] sm:$0xff] %v2366_v43  ;;  %v2444_v36 = vmul.f32 %v4831_v29, %v5817_v0  ;;  %v2351_v32 = vadd.f32 %v2335_v52, %v2302_v8  ;;  %v2157_v18 = vadd.f32 %v7117_v35, %v2108_v60  ;;  %v2239_v58 = vmul.f32 %v7195_v16, %v5844_v25  ;;  %v7235_v52 = vld [vmem:[%s5809_s13 + $0x230] sm:$0xff] }
 0x128   : > { %v2254_v42 = vadd.f32 %v2238_v2, %v2205_v6  ;;  %v7219_v57 = vmul.f32 %v4830_v47, %v5829_v14  ;;  %v7222_v38 = vmul.f32 %v4934_v5, %v5837_v21  ;;  %v2288_v59 = vmul.f32 %v4831_v29, %v5846_v26  ;;  %v4936_v5 = vld [vmem:[%s5809_s13 + $0x222] sm:$0xff] }
 0x129   : > { %v2093_v30 = vmul.f32 %v7114_v51, %v5824_v7  ;;  %v2367_v35 = vadd.f32 %v6614_v28, %v2351_v32  ;;  %v2206_v17 = vadd.f32 %v7124_v56, %v2157_v18  ;;  %v2337_v47 = vmul.f32 %v7202_v41, %v4935_v49  ;;  %v7272_v32 = vld [vmem:[%s5809_s13 + $0x238] sm:$0xff] }
 0x12a   : > { %v2303_v12 = vadd.f32 %v2287_v54, %v2254_v42  ;;  %v7237_v61 = vadd.f32 %v2492_v55, %v2459_v22  ;;  %v2460_v27 = vadd.f32 %v2444_v36, %v2411_v44  ;;  %v2493_v50 = vmul.f32 %v4935_v49, %v5819_v1  ;;  %v4834_v36 = vld [vmem:[%s5809_s13 + $0x239] sm:$0xff] }
 0x12b   : > { %v2109_v51 = vadd.f32 %v2093_v30, %v7055_v13  ;;  %5175 = vst [vmem:[%s5976_s15 + $0x160] sm:$0xff] %v2367_v35  ;;  %v2255_v11 = vadd.f32 %v2239_v58, %v2206_v17  ;;  %v2412_v23 = vmul.f32 %v7229_v3, %v5815_v63  ;;  %v2445_v56 = vmul.f32 %v4832_v4, %v5817_v0 }
 0x12c   : > { %v2352_v10 = vadd.f32 %v2336_v53, %v2303_v12  ;;  %v7247_v33 = vmul.f32 %v4831_v29, %v5829_v14  ;;  %v2240_v2 = vmul.f32 %v7229_v3, %v5844_v25  ;;  %v2413_v13 = vmul.f32 %v7235_v52, %v5815_v63  ;;  %v4937_v53 = vld [vmem:[%s5809_s13 + $0x232] sm:$0xff] }
 0x12d   : > { %v2158_v31 = vadd.f32 %v7144_v34, %v2109_v51  ;;  %v2304_v43 = vadd.f32 %v2288_v59, %v2255_v11  ;;  %v7257_v54 = vmul.f32 %v4935_v49, %v5837_v21  ;;  %v2446_v29 = vmul.f32 %v4833_v45, %v5817_v0  ;;  %v4938_v11 = vld [vmem:[%s5809_s13 + $0x23a] sm:$0xff] }
 0x12e   : > { %v2368_v9 = vadd.f32 %v6614_v28, %v2352_v10  ;;  %v7261_v8 = vadd.f32 %v2493_v50, %v2460_v27  ;;  %v2289_v6 = vmul.f32 %v4832_v4, %v5846_v26  ;;  %v2536_v60 = vmul.f32 %v7139_v39, %v5824_v7  ;;  %v7276_v39 = vld [vmem:[#allocation3] ss:$0 sm:$0xff]  ;;  %v4835_v27 = vld [vmem:[%s5809_s13 + $0x241] sm:$0xff] }
 0x12f   : > { %v2207_v34 = vadd.f32 %v7160_v15, %v2158_v31  ;;  %v2353_v22 = vadd.f32 %v2337_v47, %v2304_v43  ;;  %v2338_v28 = vmul.f32 %v7202_v41, %v4936_v5  ;;  %v2461_v55 = vadd.f32 %v2445_v56, %v2412_v23  ;;  %v7293_v50 = vld [vmem:[%s5809_s13 + $0x240] sm:$0xff] }
 0x130   : > { %5176 = vst [vmem:[%s5976_s15 + $0x168] sm:$0xff] %v2368_v9  ;;  %v2494_v44 = vmul.f32 %v4936_v5, %v5819_v1  ;;  %v2462_v15 = vadd.f32 %v2446_v29, %v2413_v13  ;;  %v2495_v49 = vmul.f32 %v4937_v53, %v5819_v1  ;;  %v2552_v18 = vadd.f32 %v2536_v60, %v7098_v48 }
 0x131   : > { %v2256_v42 = vadd.f32 %v2240_v2, %v2207_v34  ;;  %v2369_v58 = vadd.f32 %v7276_v39, %v2353_v22  ;;  %v7280_v59 = vmul.f32 %v4832_v4, %v5829_v14  ;;  %v7283_v30 = vmul.f32 %v4936_v5, %v5837_v21  ;;  %v4836_v22 = vld [vmem:[%s5809_s13 + $0x249] sm:$0xff] }
 0x132   : > { %v2683_v35 = vmul.f32 %v7235_v52, %v5844_v25  ;;  %v2601_v17 = vadd.f32 %v7182_v24, %v2552_v18  ;;  %v2414_v48 = vmul.f32 %v7272_v32, %v5815_v63  ;;  %v2447_v47 = vmul.f32 %v4834_v36, %v5817_v0 }
 0x133   : > { %v2305_v12 = vadd.f32 %v2289_v6, %v2256_v42  ;;  %5177 = vst [vmem:[%s5976_s15 + $0x170] sm:$0xff] %v2369_v58  ;;  %v7296_v4 = vadd.f32 %v2494_v44, %v2461_v55  ;;  %v7299_v51 = vmul.f32 %v4833_v45, %v5829_v14  ;;  %v7302_v10 = vmul.f32 %v4937_v53, %v5837_v21 }
 0x134   : > { %v2537_v24 = vmul.f32 %v7171_v62, %v5824_v7  ;;  %v7307_v56 = vadd.f32 %v2495_v49, %v2462_v15  ;;  %v2650_v5 = vadd.f32 %v7199_v40, %v2601_v17  ;;  %v2732_v31 = vmul.f32 %v4833_v45, %v5846_v26  ;;  %v4939_v40 = vld [vmem:[%s5809_s13 + $0x242] sm:$0xff] }
 0x135   : > { %v2354_v23 = vadd.f32 %v2338_v28, %v2305_v12  ;;  %v2781_v2 = vmul.f32 %v7202_v41, %v4937_v53  ;;  %v2415_v9 = vmul.f32 %v7293_v50, %v5815_v63  ;;  %v2448_v43 = vmul.f32 %v4835_v27, %v5817_v0  ;;  %v7329_v28 = vld [vmem:[%s5809_s13 + $0x248] sm:$0xff] }
 0x136   : > { %v2553_v13 = vadd.f32 %v2537_v24, %v7141_v46  ;;  %v2699_v29 = vadd.f32 %v2683_v35, %v2650_v5  ;;  %v2463_v34 = vadd.f32 %v2447_v47, %v2414_v48  ;;  %v2496_v6 = vmul.f32 %v4938_v11, %v5819_v1  ;;  %v4940_v47 = vld [vmem:[%s5809_s13 + $0x24a] sm:$0xff] }
 0x137   : > { %v2370_v62 = vadd.f32 %v7276_v39, %v2354_v23  ;;  %v7320_v60 = vmul.f32 %v4834_v36, %v5829_v14  ;;  %v2684_v46 = vmul.f32 %v7272_v32, %v5844_v25  ;;  %v2538_v53 = vmul.f32 %v7195_v16, %v5824_v7 }
 0x138   : > { %v2602_v45 = vadd.f32 %v7219_v57, %v2553_v13  ;;  %v2748_v55 = vadd.f32 %v2732_v31, %v2699_v29  ;;  %v7333_v44 = vmul.f32 %v4938_v11, %v5837_v21  ;;  %v2733_v42 = vmul.f32 %v4834_v36, %v5846_v26 }
 0x139   : > { %5178 = vst [vmem:[%s5976_s15 + $0x178] sm:$0xff] %v2370_v62  ;;  %v2782_v15 = vmul.f32 %v7202_v41, %v4938_v11  ;;  %v2464_v49 = vadd.f32 %v2448_v43, %v2415_v9  ;;  %v2497_v18 = vmul.f32 %v4939_v40, %v5819_v1  ;;  %v2554_v16 = vadd.f32 %v2538_v53, %v7157_v19  ;;  %v4837_v9 = vld [vmem:[%s5809_s13 + $0x259] sm:$0xff] }
 0x13a   : > { %v2651_v57 = vadd.f32 %v7222_v38, %v2602_v45  ;;  %v2797_v58 = vadd.f32 %v2781_v2, %v2748_v55  ;;  %v7340_v35 = vadd.f32 %v2496_v6, %v2463_v34  ;;  %v2416_v12 = vmul.f32 %v7329_v28, %v5815_v63  ;;  %v4941_v45 = vld [vmem:[%s5809_s13 + $0x25a] sm:$0xff] }
 0x13b   : > { %v2449_v17 = vmul.f32 %v4836_v22, %v5817_v0  ;;  %v2603_v48 = vadd.f32 %v7247_v33, %v2554_v16  ;;  %v2685_v38 = vmul.f32 %v7293_v50, %v5844_v25  ;;  %v2539_v19 = vmul.f32 %v7229_v3, %v5824_v7  ;;  %v7365_v3 = vld [vmem:[%s5809_s13 + $0x258] sm:$0xff] }
 0x13c   : > { %v2700_v36 = vadd.f32 %v2684_v46, %v2651_v57  ;;  %v2813_v11 = vadd.f32 %v7276_v39, %v2797_v58  ;;  %v7353_v24 = vmul.f32 %v4835_v27, %v5829_v14  ;;  %v7356_v23 = vmul.f32 %v4939_v40, %v5837_v21 }
 0x13d   : > { %v2734_v5 = vmul.f32 %v4835_v27, %v5846_v26  ;;  %v7359_v33 = vadd.f32 %v2497_v18, %v2464_v49  ;;  %v2652_v2 = vadd.f32 %v7257_v54, %v2603_v48  ;;  %v2555_v13 = vadd.f32 %v2539_v19, %v7177_v20  ;;  %v4942_v19 = vld [vmem:[%s5809_s13 + $0x262] sm:$0xff] }
 0x13e   : > { %v2749_v31 = vadd.f32 %v2733_v42, %v2700_v36  ;;  %5227 = vst [vmem:[%s5976_s15 + $0x180] sm:$0xff] %v2813_v11  ;;  %v2783_v43 = vmul.f32 %v7202_v41, %v4939_v40  ;;  %v2465_v62 = vadd.f32 %v2449_v17, %v2416_v12  ;;  %v2498_v29 = vmul.f32 %v4940_v47, %v5819_v1  ;;  %v4838_v42 = vld [vmem:[%s5809_s13 + $0x261] sm:$0xff] }
 0x13f   : > { %v7371_v27 = vmul.f32 %v4836_v22, %v5829_v14  ;;  %v2701_v6 = vadd.f32 %v2685_v38, %v2652_v2  ;;  %v2604_v54 = vadd.f32 %v7280_v59, %v2555_v13  ;;  %v2686_v20 = vmul.f32 %v7329_v28, %v5844_v25  ;;  %v4839_v13 = vld [vmem:[%s5809_s13 + $0x269] sm:$0xff] }
 0x140   : > { %v2798_v34 = vadd.f32 %v2782_v15, %v2749_v31  ;;  %v7378_v46 = vmul.f32 %v4940_v47, %v5837_v21  ;;  %v2417_v40 = vmul.f32 %v7365_v3, %v5815_v63  ;;  %v2450_v53 = vmul.f32 %v4837_v9, %v5817_v0  ;;  %v7387_v15 = vld [vmem:[%s5809_s13 + $0x260] sm:$0xff] }
 0x141   : > { %v2540_v55 = vmul.f32 %v7235_v52, %v5824_v7  ;;  %v2750_v57 = vadd.f32 %v2734_v5, %v2701_v6  ;;  %v2653_v49 = vadd.f32 %v7283_v30, %v2604_v54  ;;  %v2735_v18 = vmul.f32 %v4836_v22, %v5846_v26 }
 0x142   : > { %v2814_v59 = vadd.f32 %v7276_v39, %v2798_v34  ;;  %v7392_v16 = vadd.f32 %v2498_v29, %v2465_v62  ;;  %v2784_v58 = vmul.f32 %v7202_v41, %v4940_v47  ;;  %v2499_v12 = vmul.f32 %v4941_v45, %v5819_v1 }
 0x143   : > { %v2556_v52 = vadd.f32 %v2540_v55, %v7205_v37  ;;  %v2799_v17 = vadd.f32 %v2783_v43, %v2750_v57  ;;  %v2702_v36 = vadd.f32 %v2686_v20, %v2653_v49  ;;  %v2418_v48 = vmul.f32 %v7387_v15, %v5815_v63  ;;  %v7416_v43 = vld [vmem:[%s5809_s13 + $0x268] sm:$0xff] }
 0x144   : > { %5228 = vst [vmem:[%s5976_s15 + $0x188] sm:$0xff] %v2814_v59  ;;  %v2451_v30 = vmul.f32 %v4838_v42, %v5817_v0  ;;  %v2466_v22 = vadd.f32 %v2450_v53, %v2417_v40  ;;  %v2687_v47 = vmul.f32 %v7365_v3, %v5844_v25  ;;  %v2541_v37 = vmul.f32 %v7272_v32, %v5824_v7  ;;  %v4943_v53 = vld [vmem:[%s5809_s13 + $0x26a] sm:$0xff] }
 0x145   : > { %v2605_v38 = vadd.f32 %v7299_v51, %v2556_v52  ;;  %v2815_v11 = vadd.f32 %v7276_v39, %v2799_v17  ;;  %v2751_v5 = vadd.f32 %v2735_v18, %v2702_v36  ;;  %v7409_v31 = vmul.f32 %v4837_v9, %v5829_v14  ;;  %v4840_v52 = vld [vmem:[%s5809_s13 + $0x271] sm:$0xff] }
 0x146   : > { %v7412_v2 = vmul.f32 %v4941_v45, %v5837_v21  ;;  %v2736_v62 = vmul.f32 %v4837_v9, %v5846_v26  ;;  %v2785_v29 = vmul.f32 %v7202_v41, %v4941_v45  ;;  %v2557_v32 = vadd.f32 %v2541_v37, %v7237_v61  ;;  %v7446_v17 = vld [vmem:[%s5809_s13 + $0x270] sm:$0xff] }
 0x147   : > { %v2654_v51 = vadd.f32 %v7302_v10, %v2605_v38  ;;  %5229 = vst [vmem:[%s5976_s15 + $0x190] sm:$0xff] %v2815_v11  ;;  %v2800_v34 = vadd.f32 %v2784_v58, %v2751_v5  ;;  %v2467_v6 = vadd.f32 %v2451_v30, %v2418_v48  ;;  %v2500_v54 = vmul.f32 %v4942_v19, %v5819_v1 }
 0x148   : > { %v2688_v20 = vmul.f32 %v7387_v15, %v5844_v25  ;;  %v2606_v10 = vadd.f32 %v7320_v60, %v2557_v32  ;;  %v2419_v9 = vmul.f32 %v7416_v43, %v5815_v63  ;;  %v2452_v61 = vmul.f32 %v4839_v13, %v5817_v0 }
 0x149   : > { %v2703_v40 = vadd.f32 %v2687_v47, %v2654_v51  ;;  %v2816_v45 = vadd.f32 %v7276_v39, %v2800_v34  ;;  %v7432_v55 = vadd.f32 %v2499_v12, %v2466_v22  ;;  %v7435_v59 = vmul.f32 %v4838_v42, %v5829_v14  ;;  %v4944_v47 = vld [vmem:[%s5809_s13 + $0x272] sm:$0xff] }
 0x14a   : > { %v2542_v57 = vmul.f32 %v7293_v50, %v5824_v7  ;;  %v7440_v60 = vmul.f32 %v4942_v19, %v5837_v21  ;;  %v2655_v18 = vadd.f32 %v7333_v44, %v2606_v10  ;;  %v2737_v58 = vmul.f32 %v4838_v42, %v5846_v26 }
 0x14b   : > { %v2752_v49 = vadd.f32 %v2736_v62, %v2703_v40  ;;  %5230 = vst [vmem:[%s5976_s15 + $0x198] sm:$0xff] %v2816_v45  ;;  %v7449_v12 = vadd.f32 %v2500_v54, %v2467_v6  ;;  %v2786_v36 = vmul.f32 %v7202_v41, %v4942_v19  ;;  %v2501_v48 = vmul.f32 %v4943_v53, %v5819_v1 }
 0x14c   : > { %v2558_v50 = vadd.f32 %v2542_v57, %v7261_v8  ;;  %v2704_v22 = vadd.f32 %v2688_v20, %v2655_v18  ;;  %v2468_v38 = vadd.f32 %v2452_v61, %v2419_v9  ;;  %v2689_v44 = vmul.f32 %v7416_v43, %v5844_v25 }
 0x14d   : > { %v2801_v30 = vadd.f32 %v2785_v29, %v2752_v49  ;;  %v2420_v37 = vmul.f32 %v7446_v17, %v5815_v63  ;;  %v2453_v11 = vmul.f32 %v4840_v52, %v5817_v0  ;;  %v2543_v19 = vmul.f32 %v7329_v28, %v5824_v7 }
 0x14e   : > { %v2607_v42 = vadd.f32 %v7353_v24, %v2558_v50  ;;  %v2753_v5 = vadd.f32 %v2737_v58, %v2704_v22  ;;  %v7465_v51 = vmul.f32 %v4839_v13, %v5829_v14  ;;  %v7468_v62 = vmul.f32 %v4943_v53, %v5837_v21  ;;  %v4945_v58 = vld [vmem:[%s5809_s13 + $0x282] sm:$0xff] }
 0x14f   : > { %v2817_v8 = vadd.f32 %v7276_v39, %v2801_v30  ;;  %v2738_v29 = vmul.f32 %v4839_v13, %v5846_v26  ;;  %v2787_v32 = vmul.f32 %v7202_v41, %v4943_v53  ;;  %v2559_v34 = vadd.f32 %v2543_v19, %v7296_v4  ;;  %v4841_v53 = vld [vmem:[%s5809_s13 + $0x281] sm:$0xff] }
 0x150   : > { %v2656_v24 = vadd.f32 %v7356_v23, %v2607_v42  ;;  %v2802_v28 = vadd.f32 %v2786_v36, %v2753_v5  ;;  %v7475_v6 = vadd.f32 %v2501_v48, %v2468_v38  ;;  %v2502_v54 = vmul.f32 %v4944_v47, %v5819_v1  ;;  %v7485_v4 = vld [vmem:[%s5809_s13 + $0x280] sm:$0xff] }
 0x151   : > { %5231 = vst [vmem:[%s5976_s15 + $0x1a0] sm:$0xff] %v2817_v8  ;;  %v2544_v20 = vmul.f32 %v7365_v3, %v5824_v7  ;;  %v2469_v10 = vadd.f32 %v2453_v11, %v2420_v37  ;;  %v2608_v23 = vadd.f32 %v7371_v27, %v2559_v34  ;;  %v2690_v13 = vmul.f32 %v7446_v17, %v5844_v25  ;;  %v7520_v8 = vld [vmem:[%s5809_s13 + $0x288] sm:$0xff] }
 0x152   : > { %v2705_v40 = vadd.f32 %v2689_v44, %v2656_v24  ;;  %v2818_v9 = vadd.f32 %v7276_v39, %v2802_v28  ;;  %v7489_v61 = vmul.f32 %v4840_v52, %v5829_v14  ;;  %v7492_v45 = vmul.f32 %v4944_v47, %v5837_v21  ;;  %v4842_v24 = vld [vmem:[%s5809_s13 + $0x289] sm:$0xff] }
 0x153   : > { %v2560_v3 = vadd.f32 %v2544_v20, %v7307_v56  ;;  %v2657_v49 = vadd.f32 %v7378_v46, %v2608_v23  ;;  %v2739_v27 = vmul.f32 %v4840_v52, %v5846_v26  ;;  %v2691_v18 = vmul.f32 %v7485_v4, %v5844_v25  ;;  %v4946_v34 = vld [vmem:[%s5809_s13 + $0x28a] sm:$0xff] }
 0x154   : > { %v2754_v57 = vadd.f32 %v2738_v29, %v2705_v40  ;;  %5232 = vst [vmem:[%s5976_s15 + $0x1a8] sm:$0xff] %v2818_v9  ;;  %v2862_v48 = vmul.f32 %v7485_v4, %v5815_v63  ;;  %v2894_v50 = vmul.f32 %v4841_v53, %v5817_v0  ;;  %v2545_v56 = vmul.f32 %v7387_v15, %v5824_v7  ;;  %v4843_v23 = vld [vmem:[%s5809_s13 + $0x291] sm:$0xff] }
 0x155   : > { %v2609_v36 = vadd.f32 %v7409_v31, %v2560_v3  ;;  %v7507_v30 = vadd.f32 %v2502_v54, %v2469_v10  ;;  %v2706_v52 = vadd.f32 %v2690_v13, %v2657_v49  ;;  %v2788_v22 = vmul.f32 %v7202_v41, %v4944_v47  ;;  %v7543_v13 = vld [vmem:[%s5809_s13 + $0x290] sm:$0xff] }
 0x156   : > { %v2803_v46 = vadd.f32 %v2787_v32, %v2754_v57  ;;  %v7511_v38 = vmul.f32 %v4841_v53, %v5829_v14  ;;  %v2740_v44 = vmul.f32 %v4841_v53, %v5846_v26  ;;  %v2561_v42 = vadd.f32 %v2545_v56, %v7340_v35 }
 0x157   : > { %v2658_v31 = vadd.f32 %v7412_v2, %v2609_v36  ;;  %v2755_v37 = vadd.f32 %v2739_v27, %v2706_v52  ;;  %v2789_v11 = vmul.f32 %v7202_v41, %v4945_v58  ;;  %v2942_v19 = vmul.f32 %v4945_v58, %v5819_v1 }
 0x158   : > { %v2819_v15 = vadd.f32 %v7276_v39, %v2803_v46  ;;  %v2910_v5 = vadd.f32 %v2894_v50, %v2862_v48  ;;  %v2610_v2 = vadd.f32 %v7435_v59, %v2561_v42  ;;  %v2692_v29 = vmul.f32 %v7520_v8, %v5844_v25  ;;  %v4947_v46 = vld [vmem:[%s5809_s13 + $0x292] sm:$0xff] }
 0x159   : > { %v2707_v47 = vadd.f32 %v2691_v18, %v2658_v31  ;;  %v2804_v35 = vadd.f32 %v2788_v22, %v2755_v37  ;;  %v7528_v32 = vmul.f32 %v4945_v58, %v5837_v21  ;;  %v7532_v28 = vmul.f32 %v4842_v24, %v5829_v14  ;;  %v7566_v22 = vld [vmem:[%s5809_s13 + $0x298] sm:$0xff] }
 0x15a   : > { %5233 = vst [vmem:[%s5976_s15 + $0x1b0] sm:$0xff] %v2819_v15  ;;  %v2546_v54 = vmul.f32 %v7416_v43, %v5824_v7  ;;  %v7537_v40 = vmul.f32 %v4946_v34, %v5837_v21  ;;  %v2659_v59 = vadd.f32 %v7440_v60, %v2610_v2  ;;  %v2741_v10 = vmul.f32 %v4842_v24, %v5846_v26  ;;  %v4844_v15 = vld [vmem:[%s5809_s13 + $0x299] sm:$0xff] }
 0x15b   : > { %v2756_v20 = vadd.f32 %v2740_v44, %v2707_v47  ;;  %v2820_v53 = vadd.f32 %v7276_v39, %v2804_v35  ;;  %v2863_v9 = vmul.f32 %v7520_v8, %v5815_v63  ;;  %v2895_v3 = vmul.f32 %v4842_v24, %v5817_v0 }
 0x15c   : > { %v2562_v43 = vadd.f32 %v2546_v54, %v7359_v33  ;;  %v7550_v49 = vadd.f32 %v2942_v19, %v2910_v5  ;;  %v2708_v60 = vadd.f32 %v2692_v29, %v2659_v59  ;;  %v2790_v27 = vmul.f32 %v7202_v41, %v4946_v34 }
 0x15d   : > { %v2805_v57 = vadd.f32 %v2789_v11, %v2756_v20  ;;  %5234 = vst [vmem:[%s5976_s15 + $0x1b8] sm:$0xff] %v2820_v53  ;;  %v2693_v58 = vmul.f32 %v7543_v13, %v5844_v25  ;;  %v2864_v36 = vmul.f32 %v7543_v13, %v5815_v63  ;;  %v2896_v48 = vmul.f32 %v4843_v23, %v5817_v0  ;;  %v7591_v20 = vld [vmem:[%s5809_s13 + $0x2a8] sm:$0xff] }
 0x15e   : > { %v2611_v18 = vadd.f32 %v7465_v51, %v2562_v43  ;;  %v2757_v50 = vadd.f32 %v2741_v10, %v2708_v60  ;;  %v2943_v56 = vmul.f32 %v4946_v34, %v5819_v1  ;;  %v2547_v52 = vmul.f32 %v7446_v17, %v5824_v7  ;;  %v4949_v60 = vld [vmem:[%s5809_s13 + $0x2aa] sm:$0xff] }
 0x15f   : > { %v2821_v33 = vadd.f32 %v7276_v39, %v2805_v57  ;;  %v2911_v51 = vadd.f32 %v2895_v3, %v2863_v9  ;;  %v7569_v31 = vmul.f32 %v4843_v23, %v5829_v14  ;;  %v2742_v42 = vmul.f32 %v4843_v23, %v5846_v26 }
 0x160   : > { %v2660_v44 = vadd.f32 %v7468_v62, %v2611_v18  ;;  %v2806_v37 = vadd.f32 %v2790_v27, %v2757_v50  ;;  %v7576_v11 = vmul.f32 %v4947_v46, %v5837_v21  ;;  %v2791_v17 = vmul.f32 %v7202_v41, %v4947_v46  ;;  %v4948_v62 = vld [vmem:[%s5809_s13 + $0x29a] sm:$0xff] }
 0x161   : > { %5235 = vst [vmem:[%s5976_s15 + $0x1c0] sm:$0xff] %v2821_v33  ;;  %v2563_v19 = vadd.f32 %v2547_v52, %v7392_v16  ;;  %v2912_v5 = vadd.f32 %v2896_v48, %v2864_v36  ;;  %v2944_v24 = vmul.f32 %v4947_v46, %v5819_v1  ;;  %v2865_v2 = vmul.f32 %v7566_v22, %v5815_v63  ;;  %v4845_v16 = vld [vmem:[%s5809_s13 + $0x2a9] sm:$0xff] }
 0x162   : > { %v2709_v47 = vadd.f32 %v2693_v58, %v2660_v44  ;;  %v2822_v29 = vadd.f32 %v7276_v39, %v2806_v37  ;;  %v2694_v34 = vmul.f32 %v7566_v22, %v5844_v25  ;;  %v2897_v54 = vmul.f32 %v4844_v15, %v5817_v0  ;;  %v7623_v52 = vld [vmem:[%s5809_s13 + $0x2b0] sm:$0xff] }
 0x163   : > { %v2612_v35 = vadd.f32 %v7489_v61, %v2563_v19  ;;  %v7593_v59 = vadd.f32 %v2943_v56, %v2911_v51  ;;  %v7596_v23 = vmul.f32 %v4844_v15, %v5829_v14  ;;  %v2548_v53 = vmul.f32 %v7485_v4, %v5824_v7  ;;  %v4846_v56 = vld [vmem:[%s5809_s13 + $0x2b1] sm:$0xff] }
 0x164   : > { %v2758_v10 = vadd.f32 %v2742_v42, %v2709_v47  ;;  %5236 = vst [vmem:[%s5976_s15 + $0x1c8] sm:$0xff] %v2822_v29  ;;  %v2743_v9 = vmul.f32 %v4844_v15, %v5846_v26  ;;  %v2913_v3 = vadd.f32 %v2897_v54, %v2865_v2  ;;  %v2945_v43 = vmul.f32 %v4948_v62, %v5819_v1  ;;  %v4950_v2 = vld [vmem:[%s5809_s13 + $0x2b2] sm:$0xff] }
 0x165   : > { %v2661_v61 = vadd.f32 %v7492_v45, %v2612_v35  ;;  %v2564_v27 = vadd.f32 %v2548_v53, %v7432_v55  ;;  %v2866_v18 = vmul.f32 %v7591_v20, %v5815_v63  ;;  %v2898_v4 = vmul.f32 %v4845_v16, %v5817_v0  ;;  %v4847_v35 = vld [vmem:[%s5809_s13 + $0x2b9] sm:$0xff] }
 0x166   : > { %v2807_v57 = vadd.f32 %v2791_v17, %v2758_v10  ;;  %v7609_v58 = vadd.f32 %v2944_v24, %v2912_v5  ;;  %v7612_v45 = vmul.f32 %v4948_v62, %v5837_v21  ;;  %v2792_v48 = vmul.f32 %v7202_v41, %v4948_v62 }
 0x167   : > { %v2710_v36 = vadd.f32 %v2694_v34, %v2661_v61  ;;  %v2613_v50 = vadd.f32 %v7511_v38, %v2564_v27  ;;  %v2695_v55 = vmul.f32 %v7591_v20, %v5844_v25  ;;  %v2549_v46 = vmul.f32 %v7520_v8, %v5824_v7  ;;  %v7647_v34 = vld [vmem:[%s5809_s13 + $0x2b8] sm:$0xff] }
 0x168   : > { %v2823_v33 = vadd.f32 %v7276_v39, %v2807_v57  ;;  %v2744_v44 = vmul.f32 %v4845_v16, %v5846_v26  ;;  %v2793_v42 = vmul.f32 %v7202_v41, %v4949_v60  ;;  %v2946_v15 = vmul.f32 %v4949_v60, %v5819_v1 }
 0x169   : > { %v2759_v51 = vadd.f32 %v2743_v9, %v2710_v36  ;;  %v7629_v38 = vadd.f32 %v2945_v43, %v2913_v3  ;;  %v2662_v37 = vadd.f32 %v7528_v32, %v2613_v50  ;;  %v2914_v17 = vadd.f32 %v2898_v4, %v2866_v18  ;;  %v4951_v4 = vld [vmem:[%s5809_s13 + $0x2ba] sm:$0xff] }
 0x16a   : > { %5237 = vst [vmem:[%s5976_s15 + $0x1d0] sm:$0xff] %v2823_v33  ;;  %v2565_v8 = vadd.f32 %v2549_v46, %v7449_v12  ;;  %v7634_v47 = vmul.f32 %v4845_v16, %v5829_v14  ;;  %v2867_v5 = vmul.f32 %v7623_v52, %v5815_v63  ;;  %v2899_v24 = vmul.f32 %v4846_v56, %v5817_v0  ;;  %v4848_v50 = vld [vmem:[%s5809_s13 + $0x2c1] sm:$0xff] }
 0x16b   : > { %v2808_v19 = vadd.f32 %v2792_v48, %v2759_v51  ;;  %v2711_v62 = vadd.f32 %v2695_v55, %v2662_v37  ;;  %v2696_v32 = vmul.f32 %v7623_v52, %v5844_v25  ;;  %v2550_v12 = vmul.f32 %v7543_v13, %v5824_v7  ;;  %v7679_v46 = vld [vmem:[%s5809_s13 + $0x2c0] sm:$0xff] }
 0x16c   : > { %v2614_v29 = vadd.f32 %v7532_v28, %v2565_v8  ;;  %v7651_v16 = vmul.f32 %v4949_v60, %v5837_v21  ;;  %v2745_v10 = vmul.f32 %v4846_v56, %v5846_v26  ;;  %v2794_v53 = vmul.f32 %v7202_v41, %v4950_v2  ;;  %v4849_v8 = vld [vmem:[%s5809_s13 + $0x2d1] sm:$0xff] }
 0x16d   : > { %v2824_v54 = vadd.f32 %v7276_v39, %v2808_v19  ;;  %v2760_v28 = vadd.f32 %v2744_v44, %v2711_v62  ;;  %v7655_v61 = vadd.f32 %v2946_v15, %v2914_v17  ;;  %v2566_v13 = vadd.f32 %v2550_v12, %v7475_v6 }
 0x16e   : > { %v2663_v9 = vadd.f32 %v7537_v40, %v2614_v29  ;;  %v2915_v3 = vadd.f32 %v2899_v24, %v2867_v5  ;;  %v2947_v43 = vmul.f32 %v4950_v2, %v5819_v1  ;;  %v2868_v57 = vmul.f32 %v7647_v34, %v5815_v63 }
 0x16f   : > { %5238 = vst [vmem:[%s5976_s15 + $0x1d8] sm:$0xff] %v2824_v54  ;;  %v2900_v60 = vmul.f32 %v4847_v35, %v5817_v0  ;;  %v2809_v27 = vadd.f32 %v2793_v42, %v2760_v28  ;;  %v2615_v36 = vadd.f32 %v7569_v31, %v2566_v13  ;;  %v2697_v40 = vmul.f32 %v7647_v34, %v5844_v25  ;;  %v7685_v42 = vld [vmem:[%s5809_s13 + $0x2d0] sm:$0xff] }
 0x170   : > { %v2712_v18 = vadd.f32 %v2696_v32, %v2663_v9  ;;  %v7669_v6 = vmul.f32 %v4846_v56, %v5829_v14  ;;  %v7672_v48 = vmul.f32 %v4950_v2, %v5837_v21  ;;  %v2746_v33 = vmul.f32 %v4847_v35, %v5846_v26  ;;  %v4952_v2 = vld [vmem:[%s5809_s13 + $0x2c2] sm:$0xff] }
 0x171   : > { %v2551_v55 = vmul.f32 %v7566_v22, %v5824_v7  ;;  %v2825_v31 = vadd.f32 %v7276_v39, %v2809_v27  ;;  %v2664_v44 = vadd.f32 %v7576_v11, %v2615_v36  ;;  %v2795_v56 = vmul.f32 %v7202_v41, %v4951_v4  ;;  %v4850_v27 = vld [vmem:[%s5809_s13 + $0x2d9] sm:$0xff] }
 0x172   : > { %v2761_v51 = vadd.f32 %v2745_v10, %v2712_v18  ;;  %v7687_v15 = vadd.f32 %v2947_v43, %v2915_v3  ;;  %v2916_v37 = vadd.f32 %v2900_v60, %v2868_v57  ;;  %v2948_v17 = vmul.f32 %v4951_v4, %v5819_v1  ;;  %v7722_v18 = vld [vmem:[%s5809_s13 + $0x2d8] sm:$0xff] }
 0x173   : > { %v2567_v22 = vadd.f32 %v2551_v55, %v7507_v30  ;;  %5239 = vst [vmem:[%s5976_s15 + $0x1e0] sm:$0xff] %v2825_v31  ;;  %v2713_v5 = vadd.f32 %v2697_v40, %v2664_v44  ;;  %v2869_v24 = vmul.f32 %v7679_v46, %v5815_v63  ;;  %v2901_v11 = vmul.f32 %v4848_v50, %v5817_v0 }
 0x174   : > { %v2810_v19 = vadd.f32 %v2794_v53, %v2761_v51  ;;  %v7697_v62 = vmul.f32 %v4847_v35, %v5829_v14  ;;  %v2698_v32 = vmul.f32 %v7679_v46, %v5844_v25  ;;  %v2870_v30 = vmul.f32 %v7685_v42, %v5815_v63  ;;  %v4953_v53 = vld [vmem:[%s5809_s13 + $0x2d2] sm:$0xff] }
 0x175   : > { %v2616_v29 = vadd.f32 %v7596_v23, %v2567_v22  ;;  %v2762_v54 = vadd.f32 %v2746_v33, %v2713_v5  ;;  %v7707_v10 = vmul.f32 %v4951_v4, %v5837_v21  ;;  %v2902_v35 = vmul.f32 %v4849_v8, %v5817_v0  ;;  %v4954_v5 = vld [vmem:[%s5809_s13 + $0x2da] sm:$0xff] }
 0x176   : > { %v2826_v12 = vadd.f32 %v7276_v39, %v2810_v19  ;;  %v7711_v28 = vadd.f32 %v2948_v17, %v2916_v37  ;;  %v2747_v9 = vmul.f32 %v4848_v50, %v5846_v26  ;;  %v2991_v13 = vmul.f32 %v7591_v20, %v5824_v7  ;;  %v7741_v17 = vld [vmem:[%s5809_s13 + $0x2e0] sm:$0xff] }
 0x177   : > { %v2665_v23 = vadd.f32 %v7612_v45, %v2616_v29  ;;  %v2811_v3 = vadd.f32 %v2795_v56, %v2762_v54  ;;  %v2796_v43 = vmul.f32 %v7202_v41, %v4952_v2  ;;  %v2917_v57 = vadd.f32 %v2901_v11, %v2869_v24 }
 0x178   : > { %5240 = vst [vmem:[%s5976_s15 + $0x1e8] sm:$0xff] %v2826_v12  ;;  %v2949_v60 = vmul.f32 %v4952_v2, %v5819_v1  ;;  %v2918_v45 = vadd.f32 %v2902_v35, %v2870_v30  ;;  %v2950_v36 = vmul.f32 %v4953_v53, %v5819_v1  ;;  %v3007_v20 = vadd.f32 %v2991_v13, %v7550_v49  ;;  %v4851_v49 = vld [vmem:[%s5809_s13 + $0x2e1] sm:$0xff] }
 0x179   : > { %v2714_v4 = vadd.f32 %v2698_v32, %v2665_v23  ;;  %v2827_v40 = vadd.f32 %v7276_v39, %v2811_v3  ;;  %v7728_v33 = vmul.f32 %v4848_v50, %v5829_v14  ;;  %v7731_v55 = vmul.f32 %v4952_v2, %v5837_v21  ;;  %v4852_v3 = vld [vmem:[%s5809_s13 + $0x2e9] sm:$0xff] }
 0x17a   : > { %v3138_v31 = vmul.f32 %v7685_v42, %v5844_v25  ;;  %v3056_v44 = vadd.f32 %v7634_v47, %v3007_v20  ;;  %v2871_v56 = vmul.f32 %v7722_v18, %v5815_v63  ;;  %v2903_v37 = vmul.f32 %v4850_v27, %v5817_v0 }
 0x17b   : > { %v2763_v51 = vadd.f32 %v2747_v9, %v2714_v4  ;;  %5241 = vst [vmem:[%s5976_s15 + $0x1f0] sm:$0xff] %v2827_v40  ;;  %v7744_v50 = vadd.f32 %v2949_v60, %v2917_v57  ;;  %v7747_v22 = vmul.f32 %v4849_v8, %v5829_v14  ;;  %v7750_v19 = vmul.f32 %v4953_v53, %v5837_v21 }
 0x17c   : > { %v2992_v47 = vmul.f32 %v7623_v52, %v5824_v7  ;;  %v7755_v11 = vadd.f32 %v2950_v36, %v2918_v45  ;;  %v3105_v2 = vadd.f32 %v7651_v16, %v3056_v44  ;;  %v3187_v29 = vmul.f32 %v4849_v8, %v5846_v26  ;;  %v4955_v16 = vld [vmem:[%s5809_s13 + $0x2e2] sm:$0xff] }
 0x17d   : > { %v2812_v24 = vadd.f32 %v2796_v43, %v2763_v51  ;;  %v3236_v32 = vmul.f32 %v7202_v41, %v4953_v53  ;;  %v2872_v12 = vmul.f32 %v7741_v17, %v5815_v63  ;;  %v2904_v54 = vmul.f32 %v4851_v49, %v5817_v0  ;;  %v7777_v43 = vld [vmem:[%s5809_s13 + $0x2e8] sm:$0xff] }
 0x17e   : > { %v3008_v30 = vadd.f32 %v2992_v47, %v7593_v59  ;;  %v3154_v35 = vadd.f32 %v3138_v31, %v3105_v2  ;;  %v2919_v23 = vadd.f32 %v2903_v37, %v2871_v56  ;;  %v2951_v9 = vmul.f32 %v4954_v5, %v5819_v1  ;;  %v4956_v37 = vld [vmem:[%s5809_s13 + $0x2ea] sm:$0xff] }
 0x17f   : > { %v2828_v52 = vadd.f32 %v7276_v39, %v2812_v24  ;;  %v7768_v13 = vmul.f32 %v4850_v27, %v5829_v14  ;;  %v3139_v59 = vmul.f32 %v7722_v18, %v5844_v25  ;;  %v2993_v53 = vmul.f32 %v7647_v34, %v5824_v7 }
 0x180   : > { %v3057_v8 = vadd.f32 %v7669_v6, %v3008_v30  ;;  %v3203_v57 = vadd.f32 %v3187_v29, %v3154_v35  ;;  %v7781_v60 = vmul.f32 %v4954_v5, %v5837_v21  ;;  %v3188_v4 = vmul.f32 %v4850_v27, %v5846_v26 }
 0x181   : > { %5242 = vst [vmem:[%s5976_s15 + $0x1f8] sm:$0xff] %v2828_v52  ;;  %v3237_v45 = vmul.f32 %v7202_v41, %v4954_v5  ;;  %v2920_v36 = vadd.f32 %v2904_v54, %v2872_v12  ;;  %v2952_v20 = vmul.f32 %v4955_v16, %v5819_v1  ;;  %v3009_v34 = vadd.f32 %v2993_v53, %v7609_v58  ;;  %v4853_v12 = vld [vmem:[%s5809_s13 + $0x2f9] sm:$0xff] }
 0x182   : > { %v3106_v6 = vadd.f32 %v7672_v48, %v3057_v8  ;;  %v3252_v40 = vadd.f32 %v3236_v32, %v3203_v57  ;;  %v7788_v31 = vadd.f32 %v2951_v9, %v2919_v23  ;;  %v2873_v51 = vmul.f32 %v7777_v43, %v5815_v63  ;;  %v4957_v8 = vld [vmem:[%s5809_s13 + $0x2fa] sm:$0xff] }
 0x183   : > { %v2905_v44 = vmul.f32 %v4852_v3, %v5817_v0  ;;  %v3058_v56 = vadd.f32 %v7697_v62, %v3009_v34  ;;  %v3140_v48 = vmul.f32 %v7741_v17, %v5844_v25  ;;  %v2994_v58 = vmul.f32 %v7679_v46, %v5824_v7  ;;  %v7813_v46 = vld [vmem:[%s5809_s13 + $0x2f8] sm:$0xff] }
 0x184   : > { %v3155_v27 = vadd.f32 %v3139_v59, %v3106_v6  ;;  %v3268_v5 = vadd.f32 %v7276_v39, %v3252_v40  ;;  %v7801_v47 = vmul.f32 %v4851_v49, %v5829_v14  ;;  %v7804_v24 = vmul.f32 %v4955_v16, %v5837_v21 }
 0x185   : > { %v3189_v2 = vmul.f32 %v4851_v49, %v5846_v26  ;;  %v7807_v62 = vadd.f32 %v2952_v20, %v2920_v36  ;;  %v3107_v32 = vadd.f32 %v7707_v10, %v3058_v56  ;;  %v3010_v30 = vadd.f32 %v2994_v58, %v7629_v38 }
 0x186   : > { %v3204_v29 = vadd.f32 %v3188_v4, %v3155_v27  ;;  %5291 = vst [vmem:[%s5976_s15 + $0x200] sm:$0xff] %v3268_v5  ;;  %v3238_v54 = vmul.f32 %v7202_v41, %v4955_v16  ;;  %v2921_v52 = vadd.f32 %v2905_v44, %v2873_v51  ;;  %v2953_v35 = vmul.f32 %v4956_v37, %v5819_v1  ;;  %v4854_v4 = vld [vmem:[%s5809_s13 + $0x301] sm:$0xff] }
 0x187   : > { %v7819_v49 = vmul.f32 %v4852_v3, %v5829_v14  ;;  %v3156_v9 = vadd.f32 %v3140_v48, %v3107_v32  ;;  %v3059_v10 = vadd.f32 %v7728_v33, %v3010_v30  ;;  %v3141_v38 = vmul.f32 %v7777_v43, %v5844_v25  ;;  %v4855_v32 = vld [vmem:[%s5809_s13 + $0x309] sm:$0xff] }
 0x188   : > { %v3253_v23 = vadd.f32 %v3237_v45, %v3204_v29  ;;  %v7826_v59 = vmul.f32 %v4956_v37, %v5837_v21  ;;  %v2874_v16 = vmul.f32 %v7813_v46, %v5815_v63  ;;  %v2906_v53 = vmul.f32 %v4853_v12, %v5817_v0  ;;  %v7835_v45 = vld [vmem:[%s5809_s13 + $0x300] sm:$0xff]  ;;  %v7864_v30 = vld [vmem:[%s5809_s13 + $0x308] sm:$0xff] }
 0x189   : > { %v2995_v57 = vmul.f32 %v7685_v42, %v5824_v7  ;;  %v3205_v6 = vadd.f32 %v3189_v2, %v3156_v9  ;;  %v3108_v36 = vadd.f32 %v7731_v55, %v3059_v10  ;;  %v3190_v20 = vmul.f32 %v4852_v3, %v5846_v26 }
 0x18a   : > { %v3269_v33 = vadd.f32 %v7276_v39, %v3253_v23  ;;  %v7840_v34 = vadd.f32 %v2953_v35, %v2921_v52  ;;  %v3239_v40 = vmul.f32 %v7202_v41, %v4956_v37  ;;  %v2954_v51 = vmul.f32 %v4957_v8, %v5819_v1  ;;  %v4958_v37 = vld [vmem:[%s5809_s13 + $0x302] sm:$0xff] }
 0x18b   : > { %v3011_v42 = vadd.f32 %v2995_v57, %v7655_v61  ;;  %v3254_v44 = vadd.f32 %v3238_v54, %v3205_v6  ;;  %v3157_v27 = vadd.f32 %v3141_v38, %v3108_v36  ;;  %v2875_v56 = vmul.f32 %v7835_v45, %v5815_v63  ;;  %v7868_v52 = vld [vmem:[#allocation2 + $0x8] ss:$0 sm:$0xff] }
 0x18c   : > { %5292 = vst [vmem:[%s5976_s15 + $0x208] sm:$0xff] %v3269_v33  ;;  %v2907_v55 = vmul.f32 %v4854_v4, %v5817_v0  ;;  %v2922_v48 = vadd.f32 %v2906_v53, %v2874_v16  ;;  %v3142_v41 = vmul.f32 %v7813_v46, %v5844_v25  ;;  %v2996_v61 = vmul.f32 %v7722_v18, %v5824_v7  ;;  %v4959_v16 = vld [vmem:[%s5809_s13 + $0x30a] sm:$0xff] }
 0x18d   : > { %v3060_v3 = vadd.f32 %v7747_v22, %v3011_v42  ;;  %v3270_v58 = vadd.f32 %v7276_v39, %v3254_v44  ;;  %v3206_v5 = vadd.f32 %v3190_v20, %v3157_v27  ;;  %v7857_v2 = vmul.f32 %v4853_v12, %v5829_v14  ;;  %v4856_v42 = vld [vmem:[%s5809_s13 + $0x311] sm:$0xff] }
 0x18e   : > { %v7860_v29 = vmul.f32 %v4957_v8, %v5837_v21  ;;  %v3191_v54 = vmul.f32 %v4853_v12, %v5846_v26  ;;  %v3240_v18 = vmul.f32 %v7868_v52, %v4957_v8  ;;  %v3012_v35 = vadd.f32 %v2996_v61, %v7687_v15  ;;  %v7896_v44 = vld [vmem:[%s5809_s13 + $0x310] sm:$0xff] }
 0x18f   : > { %v3109_v22 = vadd.f32 %v7750_v19, %v3060_v3  ;;  %5293 = vst [vmem:[%s5976_s15 + $0x210] sm:$0xff] %v3270_v58  ;;  %v3255_v23 = vadd.f32 %v3239_v40, %v3206_v5  ;;  %v2923_v9 = vadd.f32 %v2907_v55, %v2875_v56  ;;  %v2955_v10 = vmul.f32 %v4958_v37, %v5819_v1 }
 0x190   : > { %v3143_v38 = vmul.f32 %v7835_v45, %v5844_v25  ;;  %v3061_v12 = vadd.f32 %v7768_v13, %v3012_v35  ;;  %v2876_v8 = vmul.f32 %v7864_v30, %v5815_v63  ;;  %v2908_v15 = vmul.f32 %v4855_v32, %v5817_v0 }
 0x191   : > { %v3158_v19 = vadd.f32 %v3142_v41, %v3109_v22  ;;  %v3271_v53 = vadd.f32 %v7276_v39, %v3255_v23  ;;  %v7882_v57 = vadd.f32 %v2954_v51, %v2922_v48  ;;  %v7885_v33 = vmul.f32 %v4854_v4, %v5829_v14  ;;  %v4960_v41 = vld [vmem:[%s5809_s13 + $0x312] sm:$0xff] }
 0x192   : > { %v2997_v6 = vmul.f32 %v7741_v17, %v5824_v7  ;;  %v7890_v13 = vmul.f32 %v4958_v37, %v5837_v21  ;;  %v3110_v20 = vadd.f32 %v7781_v60, %v3061_v12  ;;  %v3192_v40 = vmul.f32 %v4854_v4, %v5846_v26  ;;  %v4857_v12 = vld [vmem:[%s5809_s13 + $0x321] sm:$0xff] }
 0x193   : > { %v3207_v36 = vadd.f32 %v3191_v54, %v3158_v19  ;;  %5294 = vst [vmem:[%s5976_s15 + $0x218] sm:$0xff] %v3271_v53  ;;  %v7899_v51 = vadd.f32 %v2955_v10, %v2923_v9  ;;  %v3241_v27 = vmul.f32 %v7868_v52, %v4958_v37  ;;  %v2956_v56 = vmul.f32 %v4959_v16, %v5819_v1 }
 0x194   : > { %v3013_v17 = vadd.f32 %v2997_v6, %v7711_v28  ;;  %v3159_v48 = vadd.f32 %v3143_v38, %v3110_v20  ;;  %v2924_v3 = vadd.f32 %v2908_v15, %v2876_v8  ;;  %v3144_v60 = vmul.f32 %v7864_v30, %v5844_v25 }
 0x195   : > { %v3256_v55 = vadd.f32 %v3240_v18, %v3207_v36  ;;  %v2877_v61 = vmul.f32 %v7896_v44, %v5815_v63  ;;  %v2909_v58 = vmul.f32 %v4856_v42, %v5817_v0  ;;  %v2998_v37 = vmul.f32 %v7777_v43, %v5824_v7 }
 0x196   : > { %v3062_v4 = vadd.f32 %v7801_v47, %v3013_v17  ;;  %v3208_v5 = vadd.f32 %v3192_v40, %v3159_v48  ;;  %v7915_v22 = vmul.f32 %v4855_v32, %v5829_v14  ;;  %v7918_v54 = vmul.f32 %v4959_v16, %v5837_v21  ;;  %v4961_v40 = vld [vmem:[%s5809_s13 + $0x322] sm:$0xff] }
 0x197   : > { %v3272_v28 = vadd.f32 %v7276_v39, %v3256_v55  ;;  %v3193_v18 = vmul.f32 %v4855_v32, %v5846_v26  ;;  %v3242_v35 = vmul.f32 %v7868_v52, %v4959_v16  ;;  %v3014_v23 = vadd.f32 %v2998_v37, %v7744_v50  ;;  %v7935_v50 = vld [vmem:[%s5809_s13 + $0x320] sm:$0xff]  ;;  %v7937_v16 = vld [vmem:[#allocation3] ss:$0 sm:$0xff] }
 0x198   : > { %v3111_v47 = vadd.f32 %v7804_v24, %v3062_v4  ;;  %v3257_v43 = vadd.f32 %v3241_v27, %v3208_v5  ;;  %v7925_v39 = vadd.f32 %v2956_v56, %v2924_v3  ;;  %v2957_v9 = vmul.f32 %v4960_v41, %v5819_v1 }
 0x199   : > { %5295 = vst [vmem:[%s5976_s15 + $0x220] sm:$0xff] %v3272_v28  ;;  %v2999_v10 = vmul.f32 %v7813_v46, %v5824_v7  ;;  %v2925_v19 = vadd.f32 %v2909_v58, %v2877_v61  ;;  %v3063_v24 = vadd.f32 %v7819_v49, %v3014_v23  ;;  %v3145_v32 = vmul.f32 %v7896_v44, %v5844_v25  ;;  %v7972_v28 = vld [vmem:[%s5809_s13 + $0x328] sm:$0xff] }
 0x19a   : > { %v3160_v38 = vadd.f32 %v3144_v60, %v3111_v47  ;;  %v3273_v8 = vadd.f32 %v7937_v16, %v3257_v43  ;;  %v7941_v15 = vmul.f32 %v4856_v42, %v5829_v14  ;;  %v7944_v46 = vmul.f32 %v4960_v41, %v5837_v21  ;;  %v4858_v47 = vld [vmem:[%s5809_s13 + $0x329] sm:$0xff] }
 0x19b   : > { %v3015_v53 = vadd.f32 %v2999_v10, %v7755_v11  ;;  %v3112_v49 = vadd.f32 %v7826_v59, %v3063_v24  ;;  %v3194_v36 = vmul.f32 %v4856_v42, %v5846_v26  ;;  %v3146_v20 = vmul.f32 %v7935_v50, %v5844_v25  ;;  %v4962_v23 = vld [vmem:[%s5809_s13 + $0x32a] sm:$0xff] }
 0x19c   : > { %v3209_v6 = vadd.f32 %v3193_v18, %v3160_v38  ;;  %5296 = vst [vmem:[%s5976_s15 + $0x228] sm:$0xff] %v3273_v8  ;;  %v3318_v56 = vmul.f32 %v7935_v50, %v5815_v63  ;;  %v3351_v17 = vmul.f32 %v4857_v12, %v5817_v0  ;;  %v3000_v11 = vmul.f32 %v7835_v45, %v5824_v7  ;;  %v4859_v24 = vld [vmem:[%s5809_s13 + $0x331] sm:$0xff] }
 0x19d   : > { %v3064_v27 = vadd.f32 %v7857_v2, %v3015_v53  ;;  %v7959_v55 = vadd.f32 %v2957_v9, %v2925_v19  ;;  %v3161_v42 = vadd.f32 %v3145_v32, %v3112_v49  ;;  %v3243_v48 = vmul.f32 %v7868_v52, %v4960_v41  ;;  %v7995_v32 = vld [vmem:[%s5809_s13 + $0x330] sm:$0xff] }
 0x19e   : > { %v3258_v59 = vadd.f32 %v3242_v35, %v3209_v6  ;;  %v7963_v3 = vmul.f32 %v4857_v12, %v5829_v14  ;;  %v3195_v60 = vmul.f32 %v4857_v12, %v5846_v26  ;;  %v3016_v4 = vadd.f32 %v3000_v11, %v7788_v31 }
 0x19f   : > { %v3113_v2 = vadd.f32 %v7860_v29, %v3064_v27  ;;  %v3210_v61 = vadd.f32 %v3194_v36, %v3161_v42  ;;  %v3244_v58 = vmul.f32 %v7868_v52, %v4961_v40  ;;  %v3400_v37 = vmul.f32 %v4961_v40, %v5819_v1 }
 0x1a0   : > { %v3274_v45 = vadd.f32 %v7937_v16, %v3258_v59  ;;  %v3367_v5 = vadd.f32 %v3351_v17, %v3318_v56  ;;  %v3065_v29 = vadd.f32 %v7885_v33, %v3016_v4  ;;  %v3147_v18 = vmul.f32 %v7972_v28, %v5844_v25  ;;  %v4963_v59 = vld [vmem:[%s5809_s13 + $0x332] sm:$0xff] }
 0x1a1   : > { %v3162_v41 = vadd.f32 %v3146_v20, %v3113_v2  ;;  %v3259_v31 = vadd.f32 %v3243_v48, %v3210_v61  ;;  %v7980_v35 = vmul.f32 %v4961_v40, %v5837_v21  ;;  %v7984_v43 = vmul.f32 %v4858_v47, %v5829_v14  ;;  %v8018_v48 = vld [vmem:[%s5809_s13 + $0x338] sm:$0xff] }
 0x1a2   : > { %5297 = vst [vmem:[%s5976_s15 + $0x230] sm:$0xff] %v3274_v45  ;;  %v3001_v9 = vmul.f32 %v7864_v30, %v5824_v7  ;;  %v7989_v38 = vmul.f32 %v4962_v23, %v5837_v21  ;;  %v3114_v33 = vadd.f32 %v7890_v13, %v3065_v29  ;;  %v3196_v19 = vmul.f32 %v4858_v47, %v5846_v26  ;;  %v4860_v45 = vld [vmem:[%s5809_s13 + $0x339] sm:$0xff] }
 0x1a3   : > { %v3211_v10 = vadd.f32 %v3195_v60, %v3162_v41  ;;  %v3275_v12 = vadd.f32 %v7937_v16, %v3259_v31  ;;  %v3319_v8 = vmul.f32 %v7972_v28, %v5815_v63  ;;  %v3352_v53 = vmul.f32 %v4858_v47, %v5817_v0 }
 0x1a4   : > { %v3017_v30 = vadd.f32 %v3001_v9, %v7807_v62  ;;  %v8002_v49 = vadd.f32 %v3400_v37, %v3367_v5  ;;  %v3163_v13 = vadd.f32 %v3147_v18, %v3114_v33  ;;  %v3245_v36 = vmul.f32 %v7868_v52, %v4962_v23 }
 0x1a5   : > { %v3260_v6 = vadd.f32 %v3244_v58, %v3211_v10  ;;  %5298 = vst [vmem:[%s5976_s15 + $0x238] sm:$0xff] %v3275_v12  ;;  %v3148_v40 = vmul.f32 %v7995_v32, %v5844_v25  ;;  %v3320_v27 = vmul.f32 %v7995_v32, %v5815_v63  ;;  %v3353_v56 = vmul.f32 %v4859_v24, %v5817_v0  ;;  %v8043_v10 = vld [vmem:[%s5809_s13 + $0x348] sm:$0xff] }
 0x1a6   : > { %v3066_v20 = vadd.f32 %v7915_v22, %v3017_v30  ;;  %v3212_v17 = vadd.f32 %v3196_v19, %v3163_v13  ;;  %v3401_v11 = vmul.f32 %v4962_v23, %v5819_v1  ;;  %v3002_v42 = vmul.f32 %v7896_v44, %v5824_v7  ;;  %v4965_v13 = vld [vmem:[%s5809_s13 + $0x34a] sm:$0xff] }
 0x1a7   : > { %v3276_v62 = vadd.f32 %v7937_v16, %v3260_v6  ;;  %v3368_v22 = vadd.f32 %v3352_v53, %v3319_v8  ;;  %v8021_v2 = vmul.f32 %v4859_v24, %v5829_v14  ;;  %v3197_v4 = vmul.f32 %v4859_v24, %v5846_v26 }
 0x1a8   : > { %v3115_v60 = vadd.f32 %v7918_v54, %v3066_v20  ;;  %v3261_v61 = vadd.f32 %v3245_v36, %v3212_v17  ;;  %v8028_v58 = vmul.f32 %v4963_v59, %v5837_v21  ;;  %v3246_v44 = vmul.f32 %v7868_v52, %v4963_v59  ;;  %v4964_v54 = vld [vmem:[%s5809_s13 + $0x33a] sm:$0xff] }
 0x1a9   : > { %5299 = vst [vmem:[%s5976_s15 + $0x240] sm:$0xff] %v3276_v62  ;;  %v3018_v37 = vadd.f32 %v3002_v42, %v7840_v34  ;;  %v3369_v5 = vadd.f32 %v3353_v56, %v3320_v27  ;;  %v3402_v47 = vmul.f32 %v4963_v59, %v5819_v1  ;;  %v3321_v29 = vmul.f32 %v8018_v48, %v5815_v63  ;;  %v4861_v34 = vld [vmem:[%s5809_s13 + $0x349] sm:$0xff] }
 0x1aa   : > { %v3164_v41 = vadd.f32 %v3148_v40, %v3115_v60  ;;  %v3277_v18 = vadd.f32 %v7937_v16, %v3261_v61  ;;  %v3149_v23 = vmul.f32 %v8018_v48, %v5844_v25  ;;  %v3354_v9 = vmul.f32 %v4860_v45, %v5817_v0  ;;  %v8075_v42 = vld [vmem:[%s5809_s13 + $0x350] sm:$0xff] }
 0x1ab   : > { %v3067_v31 = vadd.f32 %v7941_v15, %v3018_v37  ;;  %v8045_v33 = vadd.f32 %v3401_v11, %v3368_v22  ;;  %v8048_v24 = vmul.f32 %v4860_v45, %v5829_v14  ;;  %v3003_v12 = vmul.f32 %v7935_v50, %v5824_v7  ;;  %v4862_v11 = vld [vmem:[%s5809_s13 + $0x351] sm:$0xff] }
 0x1ac   : > { %v3213_v19 = vadd.f32 %v3197_v4, %v3164_v41  ;;  %5300 = vst [vmem:[%s5976_s15 + $0x248] sm:$0xff] %v3277_v18  ;;  %v3198_v8 = vmul.f32 %v4860_v45, %v5846_v26  ;;  %v3370_v53 = vadd.f32 %v3354_v9, %v3321_v29  ;;  %v3403_v30 = vmul.f32 %v4964_v54, %v5819_v1  ;;  %v4966_v29 = vld [vmem:[%s5809_s13 + $0x352] sm:$0xff] }
 0x1ad   : > { %v3116_v15 = vadd.f32 %v7944_v46, %v3067_v31  ;;  %v3019_v36 = vadd.f32 %v3003_v12, %v7882_v57  ;;  %v3322_v20 = vmul.f32 %v8043_v10, %v5815_v63  ;;  %v3355_v50 = vmul.f32 %v4861_v34, %v5817_v0  ;;  %v4863_v31 = vld [vmem:[%s5809_s13 + $0x359] sm:$0xff] }
 0x1ae   : > { %v3262_v6 = vadd.f32 %v3246_v44, %v3213_v19  ;;  %v8061_v40 = vadd.f32 %v3402_v47, %v3369_v5  ;;  %v8064_v46 = vmul.f32 %v4964_v54, %v5837_v21  ;;  %v3247_v56 = vmul.f32 %v7868_v52, %v4964_v54 }
 0x1af   : > { %v3165_v27 = vadd.f32 %v3149_v23, %v3116_v15  ;;  %v3068_v17 = vadd.f32 %v7963_v3, %v3019_v36  ;;  %v3150_v57 = vmul.f32 %v8043_v10, %v5844_v25  ;;  %v3004_v59 = vmul.f32 %v7972_v28, %v5824_v7  ;;  %v8099_v23 = vld [vmem:[%s5809_s13 + $0x358] sm:$0xff] }
 0x1b0   : > { %v3278_v62 = vadd.f32 %v7937_v16, %v3262_v6  ;;  %v3199_v60 = vmul.f32 %v4861_v34, %v5846_v26  ;;  %v3248_v4 = vmul.f32 %v7868_v52, %v4965_v13  ;;  %v3404_v45 = vmul.f32 %v4965_v13, %v5819_v1 }
 0x1b1   : > { %v3214_v22 = vadd.f32 %v3198_v8, %v3165_v27  ;;  %v8081_v3 = vadd.f32 %v3403_v30, %v3370_v53  ;;  %v3117_v61 = vadd.f32 %v7980_v35, %v3068_v17  ;;  %v3371_v44 = vadd.f32 %v3355_v50, %v3322_v20  ;;  %v4967_v50 = vld [vmem:[%s5809_s13 + $0x35a] sm:$0xff] }
 0x1b2   : > { %5301 = vst [vmem:[%s5976_s15 + $0x250] sm:$0xff] %v3278_v62  ;;  %v3020_v28 = vadd.f32 %v3004_v59, %v7899_v51  ;;  %v8086_v41 = vmul.f32 %v4861_v34, %v5829_v14  ;;  %v3323_v5 = vmul.f32 %v8075_v42, %v5815_v63  ;;  %v3356_v47 = vmul.f32 %v4862_v11, %v5817_v0  ;;  %v4864_v17 = vld [vmem:[%s5809_s13 + $0x361] sm:$0xff] }
 0x1b3   : > { %v3263_v37 = vadd.f32 %v3247_v56, %v3214_v22  ;;  %v3166_v54 = vadd.f32 %v3150_v57, %v3117_v61  ;;  %v3151_v35 = vmul.f32 %v8075_v42, %v5844_v25  ;;  %v3005_v51 = vmul.f32 %v7995_v32, %v5824_v7  ;;  %v8131_v59 = vld [vmem:[%s5809_s13 + $0x360] sm:$0xff] }
 0x1b4   : > { %v3069_v18 = vadd.f32 %v7984_v43, %v3020_v28  ;;  %v8103_v34 = vmul.f32 %v4965_v13, %v5837_v21  ;;  %v3200_v19 = vmul.f32 %v4862_v11, %v5846_v26  ;;  %v3249_v12 = vmul.f32 %v7868_v52, %v4966_v29  ;;  %v4865_v28 = vld [vmem:[%s5809_s13 + $0x371] sm:$0xff] }
 0x1b5   : > { %v3279_v9 = vadd.f32 %v7937_v16, %v3263_v37  ;;  %v3215_v43 = vadd.f32 %v3199_v60, %v3166_v54  ;;  %v8107_v15 = vadd.f32 %v3404_v45, %v3371_v44  ;;  %v3021_v32 = vadd.f32 %v3005_v51, %v7925_v39 }
 0x1b6   : > { %v3118_v8 = vadd.f32 %v7989_v38, %v3069_v18  ;;  %v3372_v53 = vadd.f32 %v3356_v47, %v3323_v5  ;;  %v3405_v30 = vmul.f32 %v4966_v29, %v5819_v1  ;;  %v3324_v6 = vmul.f32 %v8099_v23, %v5815_v63 }
 0x1b7   : > { %5302 = vst [vmem:[%s5976_s15 + $0x258] sm:$0xff] %v3279_v9  ;;  %v3357_v13 = vmul.f32 %v4863_v31, %v5817_v0  ;;  %v3264_v36 = vadd.f32 %v3248_v4, %v3215_v43  ;;  %v3070_v27 = vadd.f32 %v8021_v2, %v3021_v32  ;;  %v3152_v38 = vmul.f32 %v8099_v23, %v5844_v25  ;;  %v8137_v4 = vld [vmem:[%s5809_s13 + $0x370] sm:$0xff] }
 0x1b8   : > { %v3167_v20 = vadd.f32 %v3151_v35, %v3118_v8  ;;  %v8121_v39 = vmul.f32 %v4862_v11, %v5829_v14  ;;  %v8124_v56 = vmul.f32 %v4966_v29, %v5837_v21  ;;  %v3201_v62 = vmul.f32 %v4863_v31, %v5846_v26  ;;  %v4968_v29 = vld [vmem:[%s5809_s13 + $0x362] sm:$0xff] }
 0x1b9   : > { %v3006_v57 = vmul.f32 %v8018_v48, %v5824_v7  ;;  %v3280_v2 = vadd.f32 %v7937_v16, %v3264_v36  ;;  %v3119_v60 = vadd.f32 %v8028_v58, %v3070_v27  ;;  %v3250_v11 = vmul.f32 %v7868_v52, %v4967_v50  ;;  %v4866_v36 = vld [vmem:[%s5809_s13 + $0x379] sm:$0xff] }
 0x1ba   : > { %v3216_v22 = vadd.f32 %v3200_v19, %v3167_v20  ;;  %v8139_v45 = vadd.f32 %v3405_v30, %v3372_v53  ;;  %v3373_v61 = vadd.f32 %v3357_v13, %v3324_v6  ;;  %v3406_v44 = vmul.f32 %v4967_v50, %v5819_v1  ;;  %v8174_v20 = vld [vmem:[%s5809_s13 + $0x378] sm:$0xff] }
 0x1bb   : > { %v3022_v48 = vadd.f32 %v3006_v57, %v7959_v55  ;;  %5303 = vst [vmem:[%s5976_s15 + $0x260] sm:$0xff] %v3280_v2  ;;  %v3168_v5 = vadd.f32 %v3152_v38, %v3119_v60  ;;  %v3325_v47 = vmul.f32 %v8131_v59, %v5815_v63  ;;  %v3358_v58 = vmul.f32 %v4864_v17, %v5817_v0 }
 0x1bc   : > { %v3265_v37 = vadd.f32 %v3249_v12, %v3216_v22  ;;  %v8149_v54 = vmul.f32 %v4863_v31, %v5829_v14  ;;  %v3153_v35 = vmul.f32 %v8131_v59, %v5844_v25  ;;  %v3326_v55 = vmul.f32 %v8137_v4, %v5815_v63  ;;  %v4969_v12 = vld [vmem:[%s5809_s13 + $0x372] sm:$0xff] }
 0x1bd   : > { %v3071_v18 = vadd.f32 %v8048_v24, %v3022_v48  ;;  %v3217_v9 = vadd.f32 %v3201_v62, %v3168_v5  ;;  %v8159_v19 = vmul.f32 %v4967_v50, %v5837_v21  ;;  %v3359_v31 = vmul.f32 %v4865_v28, %v5817_v0  ;;  %v4970_v5 = vld [vmem:[%s5809_s13 + $0x37a] sm:$0xff] }
 0x1be   : > { %v3281_v51 = vadd.f32 %v7937_v16, %v3265_v37  ;;  %v8163_v43 = vadd.f32 %v3406_v44, %v3373_v61  ;;  %v3202_v8 = vmul.f32 %v4864_v17, %v5846_v26  ;;  %v3449_v32 = vmul.f32 %v8043_v10, %v5824_v7  ;;  %v8193_v44 = vld [vmem:[%s5809_s13 + $0x380] sm:$0xff] }
 0x1bf   : > { %v3120_v24 = vadd.f32 %v8064_v46, %v3071_v18  ;;  %v3266_v53 = vadd.f32 %v3250_v11, %v3217_v9  ;;  %v3251_v30 = vmul.f32 %v7868_v52, %v4968_v29  ;;  %v3374_v6 = vadd.f32 %v3358_v58, %v3325_v47 }
 0x1c0   : > { %5304 = vst [vmem:[%s5976_s15 + $0x268] sm:$0xff] %v3281_v51  ;;  %v3407_v13 = vmul.f32 %v4968_v29, %v5819_v1  ;;  %v3375_v46 = vadd.f32 %v3359_v31, %v3326_v55  ;;  %v3408_v27 = vmul.f32 %v4969_v12, %v5819_v1  ;;  %v3465_v10 = vadd.f32 %v3449_v32, %v8002_v49  ;;  %v4867_v49 = vld [vmem:[%s5809_s13 + $0x381] sm:$0xff] }
 0x1c1   : > { %v3169_v50 = vadd.f32 %v3153_v35, %v3120_v24  ;;  %v3282_v38 = vadd.f32 %v7937_v16, %v3266_v53  ;;  %v8180_v62 = vmul.f32 %v4864_v17, %v5829_v14  ;;  %v8183_v57 = vmul.f32 %v4968_v29, %v5837_v21  ;;  %v4868_v53 = vld [vmem:[%s5809_s13 + $0x389] sm:$0xff] }
 0x1c2   : > { %v3596_v2 = vmul.f32 %v8137_v4, %v5844_v25  ;;  %v3514_v60 = vadd.f32 %v8086_v41, %v3465_v10  ;;  %v3327_v11 = vmul.f32 %v8174_v20, %v5815_v63  ;;  %v3360_v61 = vmul.f32 %v4866_v36, %v5817_v0 }
 0x1c3   : > { %v3218_v22 = vadd.f32 %v3202_v8, %v3169_v50  ;;  %5305 = vst [vmem:[%s5976_s15 + $0x270] sm:$0xff] %v3282_v38  ;;  %v8196_v17 = vadd.f32 %v3407_v13, %v3374_v6  ;;  %v8199_v48 = vmul.f32 %v4865_v28, %v5829_v14  ;;  %v8202_v37 = vmul.f32 %v4969_v12, %v5837_v21 }
 0x1c4   : > { %v3450_v41 = vmul.f32 %v8075_v42, %v5824_v7  ;;  %v8207_v58 = vadd.f32 %v3408_v27, %v3375_v46  ;;  %v3563_v29 = vadd.f32 %v8103_v34, %v3514_v60  ;;  %v3645_v18 = vmul.f32 %v4865_v28, %v5846_v26  ;;  %v4971_v34 = vld [vmem:[%s5809_s13 + $0x382] sm:$0xff] }
 0x1c5   : > { %v3267_v47 = vadd.f32 %v3251_v30, %v3218_v22  ;;  %v3694_v35 = vmul.f32 %v7868_v52, %v4969_v12  ;;  %v3328_v51 = vmul.f32 %v8193_v44, %v5815_v63  ;;  %v3361_v9 = vmul.f32 %v4867_v49, %v5817_v0  ;;  %v8229_v30 = vld [vmem:[%s5809_s13 + $0x388] sm:$0xff] }
 0x1c6   : > { %v3466_v55 = vadd.f32 %v3450_v41, %v8045_v33  ;;  %v3612_v31 = vadd.f32 %v3596_v2, %v3563_v29  ;;  %v3376_v24 = vadd.f32 %v3360_v61, %v3327_v11  ;;  %v3409_v8 = vmul.f32 %v4970_v5, %v5819_v1  ;;  %v4972_v61 = vld [vmem:[%s5809_s13 + $0x38a] sm:$0xff] }
 0x1c7   : > { %v3283_v42 = vadd.f32 %v7937_v16, %v3267_v47  ;;  %v8220_v32 = vmul.f32 %v4866_v36, %v5829_v14  ;;  %v3597_v33 = vmul.f32 %v8174_v20, %v5844_v25  ;;  %v3451_v12 = vmul.f32 %v8099_v23, %v5824_v7 }
 0x1c8   : > { %v3515_v28 = vadd.f32 %v8121_v39, %v3466_v55  ;;  %v3661_v6 = vadd.f32 %v3645_v18, %v3612_v31  ;;  %v8233_v13 = vmul.f32 %v4970_v5, %v5837_v21  ;;  %v3646_v50 = vmul.f32 %v4866_v36, %v5846_v26 }
 0x1c9   : > { %5306 = vst [vmem:[%s5976_s15 + $0x278] sm:$0xff] %v3283_v42  ;;  %v3695_v46 = vmul.f32 %v7868_v52, %v4970_v5  ;;  %v3377_v27 = vadd.f32 %v3361_v9, %v3328_v51  ;;  %v3410_v10 = vmul.f32 %v4971_v34, %v5819_v1  ;;  %v3467_v23 = vadd.f32 %v3451_v12, %v8061_v40  ;;  %v4869_v51 = vld [vmem:[%s5809_s13 + $0x399] sm:$0xff] }
 0x1ca   : > { %v3564_v39 = vadd.f32 %v8124_v56, %v3515_v28  ;;  %v3710_v38 = vadd.f32 %v3694_v35, %v3661_v6  ;;  %v8240_v2 = vadd.f32 %v3409_v8, %v3376_v24  ;;  %v3329_v22 = vmul.f32 %v8229_v30, %v5815_v63  ;;  %v4973_v28 = vld [vmem:[%s5809_s13 + $0x39a] sm:$0xff] }
 0x1cb   : > { %v3362_v60 = vmul.f32 %v4868_v53, %v5817_v0  ;;  %v3516_v11 = vadd.f32 %v8149_v54, %v3467_v23  ;;  %v3598_v56 = vmul.f32 %v8193_v44, %v5844_v25  ;;  %v3452_v40 = vmul.f32 %v8131_v59, %v5824_v7  ;;  %v8265_v59 = vld [vmem:[%s5809_s13 + $0x398] sm:$0xff] }
 0x1cc   : > { %v3613_v36 = vadd.f32 %v3597_v33, %v3564_v39  ;;  %v3726_v5 = vadd.f32 %v7937_v16, %v3710_v38  ;;  %v8253_v41 = vmul.f32 %v4867_v49, %v5829_v14  ;;  %v8256_v47 = vmul.f32 %v4971_v34, %v5837_v21 }
 0x1cd   : > { %v3647_v29 = vmul.f32 %v4867_v49, %v5846_v26  ;;  %v8259_v54 = vadd.f32 %v3410_v10, %v3377_v27  ;;  %v3565_v35 = vadd.f32 %v8159_v19, %v3516_v11  ;;  %v3468_v55 = vadd.f32 %v3452_v40, %v8081_v3  ;;  %v4974_v40 = vld [vmem:[%s5809_s13 + $0x3a2] sm:$0xff] }
 0x1ce   : > { %v3662_v18 = vadd.f32 %v3646_v50, %v3613_v36  ;;  %5355 = vst [vmem:[%s5976_s15 + $0x280] sm:$0xff] %v3726_v5  ;;  %v3696_v9 = vmul.f32 %v7868_v52, %v4971_v34  ;;  %v3378_v42 = vadd.f32 %v3362_v60, %v3329_v22  ;;  %v3411_v31 = vmul.f32 %v4972_v61, %v5819_v1  ;;  %v4870_v50 = vld [vmem:[%s5809_s13 + $0x3a1] sm:$0xff] }
 0x1cf   : > { %v8271_v49 = vmul.f32 %v4868_v53, %v5829_v14  ;;  %v3614_v8 = vadd.f32 %v3598_v56, %v3565_v35  ;;  %v3517_v19 = vadd.f32 %v8180_v62, %v3468_v55  ;;  %v3599_v3 = vmul.f32 %v8229_v30, %v5844_v25  ;;  %v4871_v55 = vld [vmem:[%s5809_s13 + $0x3a9] sm:$0xff] }
 0x1d0   : > { %v3711_v24 = vadd.f32 %v3695_v46, %v3662_v18  ;;  %v8278_v33 = vmul.f32 %v4972_v61, %v5837_v21  ;;  %v3330_v34 = vmul.f32 %v8265_v59, %v5815_v63  ;;  %v3363_v12 = vmul.f32 %v4869_v51, %v5817_v0  ;;  %v8287_v46 = vld [vmem:[%s5809_s13 + $0x3a0] sm:$0xff] }
 0x1d1   : > { %v3453_v6 = vmul.f32 %v8137_v4, %v5824_v7  ;;  %v3663_v39 = vadd.f32 %v3647_v29, %v3614_v8  ;;  %v3566_v27 = vadd.f32 %v8183_v57, %v3517_v19  ;;  %v3648_v10 = vmul.f32 %v4868_v53, %v5846_v26 }
 0x1d2   : > { %v3727_v62 = vadd.f32 %v7937_v16, %v3711_v24  ;;  %v8292_v23 = vadd.f32 %v3411_v31, %v3378_v42  ;;  %v3697_v38 = vmul.f32 %v7868_v52, %v4972_v61  ;;  %v3412_v22 = vmul.f32 %v4973_v28, %v5819_v1 }
 0x1d3   : > { %v3469_v4 = vadd.f32 %v3453_v6, %v8107_v15  ;;  %v3712_v60 = vadd.f32 %v3696_v9, %v3663_v39  ;;  %v3615_v36 = vadd.f32 %v3599_v3, %v3566_v27  ;;  %v3331_v11 = vmul.f32 %v8287_v46, %v5815_v63  ;;  %v8316_v9 = vld [vmem:[%s5809_s13 + $0x3a8] sm:$0xff] }
 0x1d4   : > { %5356 = vst [vmem:[%s5976_s15 + $0x288] sm:$0xff] %v3727_v62  ;;  %v3364_v57 = vmul.f32 %v4870_v50, %v5817_v0  ;;  %v3379_v53 = vadd.f32 %v3363_v12, %v3330_v34  ;;  %v3600_v61 = vmul.f32 %v8265_v59, %v5844_v25  ;;  %v3454_v15 = vmul.f32 %v8174_v20, %v5824_v7  ;;  %v4975_v12 = vld [vmem:[%s5809_s13 + $0x3aa] sm:$0xff] }
 0x1d5   : > { %v3518_v56 = vadd.f32 %v8199_v48, %v3469_v4  ;;  %v3728_v5 = vadd.f32 %v7937_v16, %v3712_v60  ;;  %v3664_v29 = vadd.f32 %v3648_v10, %v3615_v36  ;;  %v8309_v18 = vmul.f32 %v4869_v51, %v5829_v14  ;;  %v4872_v4 = vld [vmem:[%s5809_s13 + $0x3b1] sm:$0xff] }
 0x1d6   : > { %v8312_v35 = vmul.f32 %v4973_v28, %v5837_v21  ;;  %v3649_v42 = vmul.f32 %v4869_v51, %v5846_v26  ;;  %v3698_v31 = vmul.f32 %v7868_v52, %v4973_v28  ;;  %v3470_v20 = vadd.f32 %v3454_v15, %v8139_v45  ;;  %v8346_v60 = vld [vmem:[%s5809_s13 + $0x3b0] sm:$0xff] }
 0x1d7   : > { %v3567_v48 = vadd.f32 %v8202_v37, %v3518_v56  ;;  %5357 = vst [vmem:[%s5976_s15 + $0x290] sm:$0xff] %v3728_v5  ;;  %v3713_v24 = vadd.f32 %v3697_v38, %v3664_v29  ;;  %v3380_v8 = vadd.f32 %v3364_v57, %v3331_v11  ;;  %v3413_v19 = vmul.f32 %v4974_v40, %v5819_v1 }
 0x1d8   : > { %v3601_v3 = vmul.f32 %v8287_v46, %v5844_v25  ;;  %v3519_v37 = vadd.f32 %v8220_v32, %v3470_v20  ;;  %v3332_v51 = vmul.f32 %v8316_v9, %v5815_v63  ;;  %v3365_v45 = vmul.f32 %v4871_v55, %v5817_v0 }
 0x1d9   : > { %v3616_v34 = vadd.f32 %v3600_v61, %v3567_v48  ;;  %v3729_v28 = vadd.f32 %v7937_v16, %v3713_v24  ;;  %v8332_v6 = vadd.f32 %v3412_v22, %v3379_v53  ;;  %v8335_v62 = vmul.f32 %v4870_v50, %v5829_v14  ;;  %v4976_v61 = vld [vmem:[%s5809_s13 + $0x3b2] sm:$0xff] }
 0x1da   : > { %v3455_v39 = vmul.f32 %v8193_v44, %v5824_v7  ;;  %v8340_v32 = vmul.f32 %v4974_v40, %v5837_v21  ;;  %v3568_v10 = vadd.f32 %v8233_v13, %v3519_v37  ;;  %v3650_v38 = vmul.f32 %v4870_v50, %v5846_v26 }
 0x1db   : > { %v3665_v27 = vadd.f32 %v3649_v42, %v3616_v34  ;;  %5358 = vst [vmem:[%s5976_s15 + $0x298] sm:$0xff] %v3729_v28  ;;  %v8349_v22 = vadd.f32 %v3413_v19, %v3380_v8  ;;  %v3699_v36 = vmul.f32 %v7868_v52, %v4974_v40  ;;  %v3414_v11 = vmul.f32 %v4975_v12, %v5819_v1 }
 0x1dc   : > { %v3471_v44 = vadd.f32 %v3455_v39, %v8163_v43  ;;  %v3617_v53 = vadd.f32 %v3601_v3, %v3568_v10  ;;  %v3381_v56 = vadd.f32 %v3365_v45, %v3332_v51  ;;  %v3602_v13 = vmul.f32 %v8316_v9, %v5844_v25 }
 0x1dd   : > { %v3714_v57 = vadd.f32 %v3698_v31, %v3665_v27  ;;  %v3333_v15 = vmul.f32 %v8346_v60, %v5815_v63  ;;  %v3366_v5 = vmul.f32 %v4872_v4, %v5817_v0  ;;  %v3456_v40 = vmul.f32 %v8229_v30, %v5824_v7 }
 0x1de   : > { %v3520_v50 = vadd.f32 %v8253_v41, %v3471_v44  ;;  %v3666_v29 = vadd.f32 %v3650_v38, %v3617_v53  ;;  %v8365_v48 = vmul.f32 %v4871_v55, %v5829_v14  ;;  %v8368_v42 = vmul.f32 %v4975_v12, %v5837_v21  ;;  %v4977_v38 = vld [vmem:[%s5809_s13 + $0x3c2] sm:$0xff] }
 0x1df   : > { %v3730_v43 = vadd.f32 %v7937_v16, %v3714_v57  ;;  %v3651_v31 = vmul.f32 %v4871_v55, %v5846_v26  ;;  %v3700_v20 = vmul.f32 %v7868_v52, %v4975_v12  ;;  %v3472_v24 = vadd.f32 %v3456_v40, %v8196_v17  ;;  %v4873_v12 = vld [vmem:[%s5809_s13 + $0x3c1] sm:$0xff] }
 0x1e0   : > { %v3569_v41 = vadd.f32 %v8256_v47, %v3520_v50  ;;  %v3715_v30 = vadd.f32 %v3699_v36, %v3666_v29  ;;  %v8375_v8 = vadd.f32 %v3414_v11, %v3381_v56  ;;  %v3415_v19 = vmul.f32 %v4976_v61, %v5819_v1  ;;  %v8385_v17 = vld [vmem:[%s5809_s13 + $0x3c0] sm:$0xff] }
 0x1e1   : > { %5359 = vst [vmem:[%s5976_s15 + $0x2a0] sm:$0xff] %v3730_v43  ;;  %v3457_v3 = vmul.f32 %v8265_v59, %v5824_v7  ;;  %v3382_v37 = vadd.f32 %v3366_v5, %v3333_v15  ;;  %v3521_v47 = vadd.f32 %v8271_v49, %v3472_v24  ;;  %v3603_v55 = vmul.f32 %v8346_v60, %v5844_v25  ;;  %v8420_v43 = vld [vmem:[%s5809_s13 + $0x3c8] sm:$0xff] }
 0x1e2   : > { %v3618_v34 = vadd.f32 %v3602_v13, %v3569_v41  ;;  %v3731_v51 = vadd.f32 %v7937_v16, %v3715_v30  ;;  %v8389_v45 = vmul.f32 %v4872_v4, %v5829_v14  ;;  %v8392_v28 = vmul.f32 %v4976_v61, %v5837_v21  ;;  %v4874_v41 = vld [vmem:[%s5809_s13 + $0x3c9] sm:$0xff] }
 0x1e3   : > { %v3473_v59 = vadd.f32 %v3457_v3, %v8207_v58  ;;  %v3570_v27 = vadd.f32 %v8278_v33, %v3521_v47  ;;  %v3652_v49 = vmul.f32 %v4872_v4, %v5846_v26  ;;  %v3604_v10 = vmul.f32 %v8385_v17, %v5844_v25  ;;  %v4978_v24 = vld [vmem:[%s5809_s13 + $0x3ca] sm:$0xff] }
 0x1e4   : > { %v3667_v39 = vadd.f32 %v3651_v31, %v3618_v34  ;;  %5360 = vst [vmem:[%s5976_s15 + $0x2a8] sm:$0xff] %v3731_v51  ;;  %v3775_v11 = vmul.f32 %v8385_v17, %v5815_v63  ;;  %v3807_v44 = vmul.f32 %v4873_v12, %v5817_v0  ;;  %v3458_v58 = vmul.f32 %v8287_v46, %v5824_v7  ;;  %v4875_v47 = vld [vmem:[%s5809_s13 + $0x3d1] sm:$0xff] }
 0x1e5   : > { %v3522_v36 = vadd.f32 %v8309_v18, %v3473_v59  ;;  %v8407_v57 = vadd.f32 %v3415_v19, %v3382_v37  ;;  %v3619_v4 = vadd.f32 %v3603_v55, %v3570_v27  ;;  %v3701_v53 = vmul.f32 %v7868_v52, %v4976_v61  ;;  %v8443_v55 = vld [vmem:[%s5809_s13 + $0x3d0] sm:$0xff] }
 0x1e6   : > { %v3716_v33 = vadd.f32 %v3700_v20, %v3667_v39  ;;  %v8411_v56 = vmul.f32 %v4873_v12, %v5829_v14  ;;  %v3653_v13 = vmul.f32 %v4873_v12, %v5846_v26  ;;  %v3474_v50 = vadd.f32 %v3458_v58, %v8240_v2 }
 0x1e7   : > { %v3571_v18 = vadd.f32 %v8312_v35, %v3522_v36  ;;  %v3668_v15 = vadd.f32 %v3652_v49, %v3619_v4  ;;  %v3702_v5 = vmul.f32 %v7868_v52, %v4977_v38  ;;  %v3855_v40 = vmul.f32 %v4977_v38, %v5819_v1 }
 0x1e8   : > { %v3732_v46 = vadd.f32 %v7937_v16, %v3716_v33  ;;  %v3823_v29 = vadd.f32 %v3807_v44, %v3775_v11  ;;  %v3523_v35 = vadd.f32 %v8335_v62, %v3474_v50  ;;  %v3605_v31 = vmul.f32 %v8420_v43, %v5844_v25  ;;  %v4979_v33 = vld [vmem:[%s5809_s13 + $0x3d2] sm:$0xff] }
 0x1e9   : > { %v3620_v61 = vadd.f32 %v3604_v10, %v3571_v18  ;;  %v3717_v2 = vadd.f32 %v3701_v53, %v3668_v15  ;;  %v8428_v20 = vmul.f32 %v4977_v38, %v5837_v21  ;;  %v8432_v30 = vmul.f32 %v4874_v41, %v5829_v14  ;;  %v8466_v53 = vld [vmem:[%s5809_s13 + $0x3d8] sm:$0xff] }
 0x1ea   : > { %5361 = vst [vmem:[%s5976_s15 + $0x2b0] sm:$0xff] %v3732_v46  ;;  %v3459_v19 = vmul.f32 %v8316_v9, %v5824_v7  ;;  %v8437_v34 = vmul.f32 %v4978_v24, %v5837_v21  ;;  %v3572_v62 = vadd.f32 %v8340_v32, %v3523_v35  ;;  %v3654_v37 = vmul.f32 %v4874_v41, %v5846_v26  ;;  %v4876_v46 = vld [vmem:[%s5809_s13 + $0x3d9] sm:$0xff] }
 0x1eb   : > { %v3669_v3 = vadd.f32 %v3653_v13, %v3620_v61  ;;  %v3733_v12 = vadd.f32 %v7937_v16, %v3717_v2  ;;  %v3776_v51 = vmul.f32 %v8420_v43, %v5815_v63  ;;  %v3808_v59 = vmul.f32 %v4874_v41, %v5817_v0 }
 0x1ec   : > { %v3475_v9 = vadd.f32 %v3459_v19, %v8259_v54  ;;  %v8450_v27 = vadd.f32 %v3855_v40, %v3823_v29  ;;  %v3621_v32 = vadd.f32 %v3605_v31, %v3572_v62  ;;  %v3703_v49 = vmul.f32 %v7868_v52, %v4978_v24 }
 0x1ed   : > { %v3718_v39 = vadd.f32 %v3702_v5, %v3669_v3  ;;  %5362 = vst [vmem:[%s5976_s15 + $0x2b8] sm:$0xff] %v3733_v12  ;;  %v3606_v38 = vmul.f32 %v8443_v55, %v5844_v25  ;;  %v3777_v36 = vmul.f32 %v8443_v55, %v5815_v63  ;;  %v3809_v11 = vmul.f32 %v4875_v47, %v5817_v0  ;;  %v8491_v3 = vld [vmem:[%s5809_s13 + $0x3e8] sm:$0xff] }
 0x1ee   : > { %v3524_v10 = vadd.f32 %v8365_v48, %v3475_v9  ;;  %v3670_v44 = vadd.f32 %v3654_v37, %v3621_v32  ;;  %v3856_v58 = vmul.f32 %v4978_v24, %v5819_v1  ;;  %v3460_v4 = vmul.f32 %v8346_v60, %v5824_v7  ;;  %v4981_v32 = vld [vmem:[%s5809_s13 + $0x3ea] sm:$0xff] }
 0x1ef   : > { %v3734_v54 = vadd.f32 %v7937_v16, %v3718_v39  ;;  %v3824_v48 = vadd.f32 %v3808_v59, %v3776_v51  ;;  %v8469_v18 = vmul.f32 %v4875_v47, %v5829_v14  ;;  %v3655_v50 = vmul.f32 %v4875_v47, %v5846_v26 }
 0x1f0   : > { %v3573_v13 = vadd.f32 %v8368_v42, %v3524_v10  ;;  %v3719_v15 = vadd.f32 %v3703_v49, %v3670_v44  ;;  %v8476_v5 = vmul.f32 %v4979_v33, %v5837_v21  ;;  %v3704_v60 = vmul.f32 %v7868_v52, %v4979_v33  ;;  %v4980_v42 = vld [vmem:[%s5809_s13 + $0x3da] sm:$0xff] }
 0x1f1   : > { %5363 = vst [vmem:[%s5976_s15 + $0x2c0] sm:$0xff] %v3734_v54  ;;  %v3476_v40 = vadd.f32 %v3460_v4, %v8292_v23  ;;  %v3825_v29 = vadd.f32 %v3809_v11, %v3777_v36  ;;  %v3857_v41 = vmul.f32 %v4979_v33, %v5819_v1  ;;  %v3778_v35 = vmul.f32 %v8466_v53, %v5815_v63  ;;  %v4877_v23 = vld [vmem:[%s5809_s13 + $0x3e9] sm:$0xff] }
 0x1f2   : > { %v3622_v61 = vadd.f32 %v3606_v38, %v3573_v13  ;;  %v3735_v31 = vadd.f32 %v7937_v16, %v3719_v15  ;;  %v3607_v24 = vmul.f32 %v8466_v53, %v5844_v25  ;;  %v3810_v19 = vmul.f32 %v4876_v46, %v5817_v0  ;;  %v8523_v4 = vld [vmem:[%s5809_s13 + $0x3f0] sm:$0xff] }
 0x1f3   : > { %v3525_v2 = vadd.f32 %v8389_v45, %v3476_v40  ;;  %v8493_v62 = vadd.f32 %v3856_v58, %v3824_v48  ;;  %v8496_v47 = vmul.f32 %v4876_v46, %v5829_v14  ;;  %v3461_v12 = vmul.f32 %v8385_v17, %v5824_v7  ;;  %v4878_v58 = vld [vmem:[%s5809_s13 + $0x3f1] sm:$0xff] }
 0x1f4   : > { %v3671_v37 = vadd.f32 %v3655_v50, %v3622_v61  ;;  %5364 = vst [vmem:[%s5976_s15 + $0x2c8] sm:$0xff] %v3735_v31  ;;  %v3656_v51 = vmul.f32 %v4876_v46, %v5846_v26  ;;  %v3826_v59 = vadd.f32 %v3810_v19, %v3778_v35  ;;  %v3858_v9 = vmul.f32 %v4980_v42, %v5819_v1  ;;  %v8526_v50 = vld [vmem:[#allocation2 + $0x8] ss:$0 sm:$0xff]  ;;  %v4982_v35 = vld [vmem:[%s5809_s13 + $0x3f2] sm:$0xff] }
 0x1f5   : > { %v3574_v45 = vadd.f32 %v8392_v28, %v3525_v2  ;;  %v3477_v49 = vadd.f32 %v3461_v12, %v8332_v6  ;;  %v3779_v10 = vmul.f32 %v8491_v3, %v5815_v63  ;;  %v3811_v38 = vmul.f32 %v4877_v23, %v5817_v0  ;;  %v4879_v2 = vld [vmem:[%s5809_s13 + $0x3f9] sm:$0xff] }
 0x1f6   : > { %v3720_v39 = vadd.f32 %v3704_v60, %v3671_v37  ;;  %v8509_v17 = vadd.f32 %v3857_v41, %v3825_v29  ;;  %v8512_v28 = vmul.f32 %v4980_v42, %v5837_v21  ;;  %v3705_v11 = vmul.f32 %v7868_v52, %v4980_v42 }
 0x1f7   : > { %v3623_v36 = vadd.f32 %v3607_v24, %v3574_v45  ;;  %v3526_v44 = vadd.f32 %v8411_v56, %v3477_v49  ;;  %v3608_v6 = vmul.f32 %v8491_v3, %v5844_v25  ;;  %v3462_v33 = vmul.f32 %v8420_v43, %v5824_v7  ;;  %v8549_v24 = vld [vmem:[%s5809_s13 + $0x3f8] sm:$0xff] }
 0x1f8   : > { %v3736_v54 = vadd.f32 %v7937_v16, %v3720_v39  ;;  %v3657_v13 = vmul.f32 %v4877_v23, %v5846_v26  ;;  %v3706_v52 = vmul.f32 %v8526_v50, %v4981_v32  ;;  %v3859_v56 = vmul.f32 %v4981_v32, %v5819_v1 }
 0x1f9   : > { %v3672_v48 = vadd.f32 %v3656_v51, %v3623_v36  ;;  %v8531_v46 = vadd.f32 %v3858_v9, %v3826_v59  ;;  %v3575_v15 = vadd.f32 %v8428_v20, %v3526_v44  ;;  %v3827_v43 = vadd.f32 %v3811_v38, %v3779_v10  ;;  %v4983_v38 = vld [vmem:[%s5809_s13 + $0x3fa] sm:$0xff] }
 0x1fa   : > { %5365 = vst [vmem:[%s5976_s15 + $0x2d0] sm:$0xff] %v3736_v54  ;;  %v3478_v60 = vadd.f32 %v3462_v33, %v8349_v22  ;;  %v8536_v61 = vmul.f32 %v4877_v23, %v5829_v14  ;;  %v3780_v29 = vmul.f32 %v8523_v4, %v5815_v63  ;;  %v3812_v41 = vmul.f32 %v4878_v58, %v5817_v0  ;;  %v4880_v44 = vld [vmem:[%s5809_s13 + $0x401] sm:$0xff] }
 0x1fb   : > { %v3721_v40 = vadd.f32 %v3705_v11, %v3672_v48  ;;  %v3624_v42 = vadd.f32 %v3608_v6, %v3575_v15  ;;  %v3609_v20 = vmul.f32 %v8523_v4, %v5844_v25  ;;  %v3463_v22 = vmul.f32 %v8443_v55, %v5824_v7  ;;  %v8581_v33 = vld [vmem:[%s5809_s13 + $0x400] sm:$0xff] }
 0x1fc   : > { %v3527_v31 = vadd.f32 %v8432_v30, %v3478_v60  ;;  %v8553_v23 = vmul.f32 %v4981_v32, %v5837_v21  ;;  %v3658_v37 = vmul.f32 %v4878_v58, %v5846_v26  ;;  %v3707_v12 = vmul.f32 %v8526_v50, %v4982_v35 }
 0x1fd   : > { %v3737_v19 = vadd.f32 %v7937_v16, %v3721_v40  ;;  %v3673_v30 = vadd.f32 %v3657_v13, %v3624_v42  ;;  %v8557_v45 = vadd.f32 %v3859_v56, %v3827_v43  ;;  %v3479_v55 = vadd.f32 %v3463_v22, %v8375_v8  ;;  %v4984_v42 = vld [vmem:[%s5809_s13 + $0x402] sm:$0xff] }
 0x1fe   : > { %v3576_v51 = vadd.f32 %v8437_v34, %v3527_v31  ;;  %v3828_v59 = vadd.f32 %v3812_v41, %v3780_v29  ;;  %v3860_v9 = vmul.f32 %v4982_v35, %v5819_v1  ;;  %v3781_v39 = vmul.f32 %v8549_v24, %v5815_v63 }
 0x1ff   : > { %5366 = vst [vmem:[%s5976_s15 + $0x2d8] sm:$0xff] %v3737_v19  ;;  %v3813_v32 = vmul.f32 %v4879_v2, %v5817_v0  ;;  %v3722_v49 = vadd.f32 %v3706_v52, %v3673_v30  ;;  %v3528_v36 = vadd.f32 %v8469_v18, %v3479_v55  ;;  %v3610_v34 = vmul.f32 %v8549_v24, %v5844_v25  ;;  %v8587_v52 = vld [vmem:[%s5809_s13 + $0x410] sm:$0xff] }
 0x200   : > { %v3625_v10 = vadd.f32 %v3609_v20, %v3576_v51  ;;  %v8571_v8 = vmul.f32 %v4878_v58, %v5829_v14  ;;  %v8574_v11 = vmul.f32 %v4982_v35, %v5837_v21  ;;  %v3659_v54 = vmul.f32 %v4879_v2, %v5846_v26  ;;  %v8607_v20 = vld [vmem:[#allocation3] ss:$0 sm:$0xff] }
 0x201   : > { %v3464_v6 = vmul.f32 %v8466_v53, %v5824_v7  ;;  %v3738_v18 = vadd.f32 %v7937_v16, %v3722_v49  ;;  %v3577_v13 = vadd.f32 %v8476_v5, %v3528_v36  ;;  %v3708_v58 = vmul.f32 %v8526_v50, %v4983_v38  ;;  %v4881_v53 = vld [vmem:[%s5809_s13 + $0x411] sm:$0xff]  ;;  %v4882_v49 = vld [vmem:[%s5809_s13 + $0x419] sm:$0xff] }
 0x202   : > { %v3674_v48 = vadd.f32 %v3658_v37, %v3625_v10  ;;  %v8589_v56 = vadd.f32 %v3860_v9, %v3828_v59  ;;  %v3829_v15 = vadd.f32 %v3813_v32, %v3781_v39  ;;  %v3861_v43 = vmul.f32 %v4983_v38, %v5819_v1  ;;  %v8626_v10 = vld [vmem:[%s5809_s13 + $0x418] sm:$0xff] }
 0x203   : > { %v3480_v60 = vadd.f32 %v3464_v6, %v8407_v57  ;;  %5367 = vst [vmem:[%s5976_s15 + $0x2e0] sm:$0xff] %v3738_v18  ;;  %v3626_v16 = vadd.f32 %v3610_v34, %v3577_v13  ;;  %v3782_v29 = vmul.f32 %v8581_v33, %v5815_v63  ;;  %v3814_v5 = vmul.f32 %v4880_v44, %v5817_v0 }
 0x204   : > { %v3723_v40 = vadd.f32 %v3707_v12, %v3674_v48  ;;  %v8599_v41 = vmul.f32 %v4879_v2, %v5829_v14  ;;  %v3611_v57 = vmul.f32 %v8581_v33, %v5844_v25  ;;  %v3783_v31 = vmul.f32 %v8587_v52, %v5815_v63  ;;  %v4985_v2 = vld [vmem:[%s5809_s13 + $0x412] sm:$0xff] }
 0x205   : > { %v3529_v35 = vadd.f32 %v8496_v47, %v3480_v60  ;;  %v3675_v19 = vadd.f32 %v3659_v54, %v3626_v16  ;;  %v8611_v37 = vmul.f32 %v4983_v38, %v5837_v21  ;;  %v3815_v12 = vmul.f32 %v4881_v53, %v5817_v0  ;;  %v4986_v16 = vld [vmem:[%s5809_s13 + $0x41a] sm:$0xff] }
 0x206   : > { %v3739_v22 = vadd.f32 %v8607_v20, %v3723_v40  ;;  %v8615_v47 = vadd.f32 %v3861_v43, %v3829_v15  ;;  %v3660_v51 = vmul.f32 %v4880_v44, %v5846_v26  ;;  %v3904_v55 = vmul.f32 %v8491_v3, %v5824_v7  ;;  %v8645_v43 = vld [vmem:[%s5809_s13 + $0x420] sm:$0xff] }
 0x207   : > { %v3578_v30 = vadd.f32 %v8512_v28, %v3529_v35  ;;  %v3724_v59 = vadd.f32 %v3708_v58, %v3675_v19  ;;  %v3709_v9 = vmul.f32 %v8526_v50, %v4984_v42  ;;  %v3830_v39 = vadd.f32 %v3814_v5, %v3782_v29 }
 0x208   : > { %5368 = vst [vmem:[%s5976_s15 + $0x2e8] sm:$0xff] %v3739_v22  ;;  %v3862_v32 = vmul.f32 %v4984_v42, %v5819_v1  ;;  %v3831_v28 = vadd.f32 %v3815_v12, %v3783_v31  ;;  %v3863_v36 = vmul.f32 %v4985_v2, %v5819_v1  ;;  %v3920_v3 = vadd.f32 %v3904_v55, %v8450_v27  ;;  %v4883_v27 = vld [vmem:[%s5809_s13 + $0x421] sm:$0xff] }
 0x209   : > { %v3627_v38 = vadd.f32 %v3611_v57, %v3578_v30  ;;  %v3740_v34 = vadd.f32 %v8607_v20, %v3724_v59  ;;  %v8632_v54 = vmul.f32 %v4880_v44, %v5829_v14  ;;  %v8635_v6 = vmul.f32 %v4984_v42, %v5837_v21  ;;  %v4884_v59 = vld [vmem:[%s5809_s13 + $0x429] sm:$0xff] }
 0x20a   : > { %v4051_v18 = vmul.f32 %v8587_v52, %v5844_v25  ;;  %v3969_v13 = vadd.f32 %v8536_v61, %v3920_v3  ;;  %v3784_v58 = vmul.f32 %v8626_v10, %v5815_v63  ;;  %v3816_v15 = vmul.f32 %v4882_v49, %v5817_v0 }
 0x20b   : > { %v3676_v48 = vadd.f32 %v3660_v51, %v3627_v38  ;;  %5369 = vst [vmem:[%s5976_s15 + $0x2f0] sm:$0xff] %v3740_v34  ;;  %v8648_v44 = vadd.f32 %v3862_v32, %v3830_v39  ;;  %v8651_v60 = vmul.f32 %v4881_v53, %v5829_v14  ;;  %v8654_v40 = vmul.f32 %v4985_v2, %v5837_v21 }
 0x20c   : > { %v3905_v61 = vmul.f32 %v8523_v4, %v5824_v7  ;;  %v8659_v5 = vadd.f32 %v3863_v36, %v3831_v28  ;;  %v4018_v42 = vadd.f32 %v8553_v23, %v3969_v13  ;;  %v4100_v35 = vmul.f32 %v4881_v53, %v5846_v26  ;;  %v4987_v23 = vld [vmem:[%s5809_s13 + $0x422] sm:$0xff] }
 0x20d   : > { %v3725_v29 = vadd.f32 %v3709_v9, %v3676_v48  ;;  %v4149_v57 = vmul.f32 %v8526_v50, %v4985_v2  ;;  %v3785_v22 = vmul.f32 %v8645_v43, %v5815_v63  ;;  %v3817_v19 = vmul.f32 %v4883_v27, %v5817_v0  ;;  %v8681_v9 = vld [vmem:[%s5809_s13 + $0x428] sm:$0xff] }
 0x20e   : > { %v3921_v31 = vadd.f32 %v3905_v61, %v8493_v62  ;;  %v4067_v12 = vadd.f32 %v4051_v18, %v4018_v42  ;;  %v3832_v30 = vadd.f32 %v3816_v15, %v3784_v58  ;;  %v3864_v51 = vmul.f32 %v4986_v16, %v5819_v1  ;;  %v4988_v15 = vld [vmem:[%s5809_s13 + $0x42a] sm:$0xff] }
 0x20f   : > { %v3741_v4 = vadd.f32 %v8607_v20, %v3725_v29  ;;  %v8672_v55 = vmul.f32 %v4882_v49, %v5829_v14  ;;  %v4052_v62 = vmul.f32 %v8626_v10, %v5844_v25  ;;  %v3906_v2 = vmul.f32 %v8549_v24, %v5824_v7 }
 0x210   : > { %v3970_v53 = vadd.f32 %v8571_v8, %v3921_v31  ;;  %v4116_v39 = vadd.f32 %v4100_v35, %v4067_v12  ;;  %v8685_v32 = vmul.f32 %v4986_v16, %v5837_v21  ;;  %v4101_v38 = vmul.f32 %v4882_v49, %v5846_v26 }
 0x211   : > { %5370 = vst [vmem:[%s5976_s15 + $0x2f8] sm:$0xff] %v3741_v4  ;;  %v4150_v28 = vmul.f32 %v8526_v50, %v4986_v16  ;;  %v3833_v36 = vadd.f32 %v3817_v19, %v3785_v22  ;;  %v3865_v3 = vmul.f32 %v4987_v23, %v5819_v1  ;;  %v3922_v24 = vadd.f32 %v3906_v2, %v8509_v17  ;;  %v4885_v22 = vld [vmem:[%s5809_s13 + $0x439] sm:$0xff] }
 0x212   : > { %v4019_v8 = vadd.f32 %v8574_v11, %v3970_v53  ;;  %v4165_v34 = vadd.f32 %v4149_v57, %v4116_v39  ;;  %v8692_v18 = vadd.f32 %v3864_v51, %v3832_v30  ;;  %v3786_v48 = vmul.f32 %v8681_v9, %v5815_v63  ;;  %v4989_v53 = vld [vmem:[%s5809_s13 + $0x43a] sm:$0xff] }
 0x213   : > { %v3818_v13 = vmul.f32 %v4884_v59, %v5817_v0  ;;  %v3971_v58 = vadd.f32 %v8599_v41, %v3922_v24  ;;  %v4053_v11 = vmul.f32 %v8645_v43, %v5844_v25  ;;  %v3907_v17 = vmul.f32 %v8581_v33, %v5824_v7  ;;  %v8717_v33 = vld [vmem:[%s5809_s13 + $0x438] sm:$0xff] }
 0x214   : > { %v4068_v49 = vadd.f32 %v4052_v62, %v4019_v8  ;;  %v4181_v16 = vadd.f32 %v8607_v20, %v4165_v34  ;;  %v8705_v61 = vmul.f32 %v4883_v27, %v5829_v14  ;;  %v8708_v29 = vmul.f32 %v4987_v23, %v5837_v21 }
 0x215   : > { %v4102_v42 = vmul.f32 %v4883_v27, %v5846_v26  ;;  %v8711_v41 = vadd.f32 %v3865_v3, %v3833_v36  ;;  %v4020_v57 = vadd.f32 %v8611_v37, %v3971_v58  ;;  %v3923_v31 = vadd.f32 %v3907_v17, %v8531_v46  ;;  %v4990_v17 = vld [vmem:[%s5809_s13 + $0x442] sm:$0xff] }
 0x216   : > { %v4117_v35 = vadd.f32 %v4101_v38, %v4068_v49  ;;  %5419 = vst [vmem:[%s5976_s15 + $0x300] sm:$0xff] %v4181_v16  ;;  %v4151_v19 = vmul.f32 %v8526_v50, %v4987_v23  ;;  %v3834_v4 = vadd.f32 %v3818_v13, %v3786_v48  ;;  %v3866_v12 = vmul.f32 %v4988_v15, %v5819_v1  ;;  %v4886_v38 = vld [vmem:[%s5809_s13 + $0x441] sm:$0xff] }
 0x217   : > { %v8723_v27 = vmul.f32 %v4884_v59, %v5829_v14  ;;  %v4069_v51 = vadd.f32 %v4053_v11, %v4020_v57  ;;  %v3972_v37 = vadd.f32 %v8632_v54, %v3923_v31  ;;  %v4054_v46 = vmul.f32 %v8681_v9, %v5844_v25  ;;  %v4887_v31 = vld [vmem:[%s5809_s13 + $0x449] sm:$0xff] }
 0x218   : > { %v4166_v30 = vadd.f32 %v4150_v28, %v4117_v35  ;;  %v8730_v62 = vmul.f32 %v4988_v15, %v5837_v21  ;;  %v3787_v23 = vmul.f32 %v8717_v33, %v5815_v63  ;;  %v3819_v2 = vmul.f32 %v4885_v22, %v5817_v0  ;;  %v8739_v28 = vld [vmem:[%s5809_s13 + $0x440] sm:$0xff] }
 0x219   : > { %v3908_v39 = vmul.f32 %v8587_v52, %v5824_v7  ;;  %v4118_v8 = vadd.f32 %v4102_v42, %v4069_v51  ;;  %v4021_v36 = vadd.f32 %v8635_v6, %v3972_v37  ;;  %v4103_v3 = vmul.f32 %v4884_v59, %v5846_v26 }
 0x21a   : > { %v4182_v54 = vadd.f32 %v8607_v20, %v4166_v30  ;;  %v8744_v24 = vadd.f32 %v3866_v12, %v3834_v4  ;;  %v4152_v34 = vmul.f32 %v8526_v50, %v4988_v15  ;;  %v3867_v48 = vmul.f32 %v4989_v53, %v5819_v1 }
 0x21b   : > { %v3924_v52 = vadd.f32 %v3908_v39, %v8557_v45  ;;  %v4167_v13 = vadd.f32 %v4151_v19, %v4118_v8  ;;  %v4070_v49 = vadd.f32 %v4054_v46, %v4021_v36  ;;  %v3788_v58 = vmul.f32 %v8739_v28, %v5815_v63  ;;  %v8768_v19 = vld [vmem:[%s5809_s13 + $0x448] sm:$0xff] }
 0x21c   : > { %5420 = vst [vmem:[%s5976_s15 + $0x308] sm:$0xff] %v4182_v54  ;;  %v3820_v6 = vmul.f32 %v4886_v38, %v5817_v0  ;;  %v3835_v59 = vadd.f32 %v3819_v2, %v3787_v23  ;;  %v4055_v15 = vmul.f32 %v8717_v33, %v5844_v25  ;;  %v3909_v45 = vmul.f32 %v8626_v10, %v5824_v7  ;;  %v4991_v2 = vld [vmem:[%s5809_s13 + $0x44a] sm:$0xff] }
 0x21d   : > { %v3973_v11 = vadd.f32 %v8651_v60, %v3924_v52  ;;  %v4183_v16 = vadd.f32 %v8607_v20, %v4167_v13  ;;  %v4119_v42 = vadd.f32 %v4103_v3, %v4070_v49  ;;  %v8761_v35 = vmul.f32 %v4885_v22, %v5829_v14  ;;  %v4888_v52 = vld [vmem:[%s5809_s13 + $0x451] sm:$0xff] }
 0x21e   : > { %v8764_v57 = vmul.f32 %v4989_v53, %v5837_v21  ;;  %v4104_v4 = vmul.f32 %v4885_v22, %v5846_v26  ;;  %v4153_v12 = vmul.f32 %v8526_v50, %v4989_v53  ;;  %v3925_v10 = vadd.f32 %v3909_v45, %v8589_v56  ;;  %v8798_v13 = vld [vmem:[%s5809_s13 + $0x450] sm:$0xff] }
 0x21f   : > { %v4022_v60 = vadd.f32 %v8654_v40, %v3973_v11  ;;  %5421 = vst [vmem:[%s5976_s15 + $0x310] sm:$0xff] %v4183_v16  ;;  %v4168_v30 = vadd.f32 %v4152_v34, %v4119_v42  ;;  %v3836_v51 = vadd.f32 %v3820_v6, %v3788_v58  ;;  %v3868_v37 = vmul.f32 %v4990_v17, %v5819_v1 }
 0x220   : > { %v4056_v46 = vmul.f32 %v8739_v28, %v5844_v25  ;;  %v3974_v40 = vadd.f32 %v8672_v55, %v3925_v10  ;;  %v3789_v22 = vmul.f32 %v8768_v19, %v5815_v63  ;;  %v3821_v56 = vmul.f32 %v4887_v31, %v5817_v0 }
 0x221   : > { %v4071_v23 = vadd.f32 %v4055_v15, %v4022_v60  ;;  %v4184_v53 = vadd.f32 %v8607_v20, %v4168_v30  ;;  %v8784_v39 = vadd.f32 %v3867_v48, %v3835_v59  ;;  %v8787_v54 = vmul.f32 %v4886_v38, %v5829_v14  ;;  %v4992_v15 = vld [vmem:[%s5809_s13 + $0x452] sm:$0xff] }
 0x222   : > { %v3910_v8 = vmul.f32 %v8645_v43, %v5824_v7  ;;  %v8792_v55 = vmul.f32 %v4990_v17, %v5837_v21  ;;  %v4023_v3 = vadd.f32 %v8685_v32, %v3974_v40  ;;  %v4105_v34 = vmul.f32 %v4886_v38, %v5846_v26 }
 0x223   : > { %v4120_v36 = vadd.f32 %v4104_v4, %v4071_v23  ;;  %5422 = vst [vmem:[%s5976_s15 + $0x318] sm:$0xff] %v4184_v53  ;;  %v8801_v48 = vadd.f32 %v3868_v37, %v3836_v51  ;;  %v4154_v49 = vmul.f32 %v8526_v50, %v4990_v17  ;;  %v3869_v58 = vmul.f32 %v4991_v2, %v5819_v1 }
 0x224   : > { %v3926_v43 = vadd.f32 %v3910_v8, %v8615_v47  ;;  %v4072_v59 = vadd.f32 %v4056_v46, %v4023_v3  ;;  %v3837_v11 = vadd.f32 %v3821_v56, %v3789_v22  ;;  %v4057_v32 = vmul.f32 %v8768_v19, %v5844_v25 }
 0x225   : > { %v4169_v6 = vadd.f32 %v4153_v12, %v4120_v36  ;;  %v3790_v45 = vmul.f32 %v8798_v13, %v5815_v63  ;;  %v3822_v16 = vmul.f32 %v4888_v52, %v5817_v0  ;;  %v3911_v17 = vmul.f32 %v8681_v9, %v5824_v7 }
 0x226   : > { %v3975_v38 = vadd.f32 %v8705_v61, %v3926_v43  ;;  %v4121_v42 = vadd.f32 %v4105_v34, %v4072_v59  ;;  %v8817_v60 = vmul.f32 %v4887_v31, %v5829_v14  ;;  %v8820_v4 = vmul.f32 %v4991_v2, %v5837_v21  ;;  %v4993_v34 = vld [vmem:[%s5809_s13 + $0x462] sm:$0xff] }
 0x227   : > { %v4185_v47 = vadd.f32 %v8607_v20, %v4169_v6  ;;  %v4106_v12 = vmul.f32 %v4887_v31, %v5846_v26  ;;  %v4155_v10 = vmul.f32 %v8526_v50, %v4991_v2  ;;  %v3927_v30 = vadd.f32 %v3911_v17, %v8648_v44  ;;  %v4889_v2 = vld [vmem:[%s5809_s13 + $0x461] sm:$0xff] }
 0x228   : > { %v4024_v61 = vadd.f32 %v8708_v29, %v3975_v38  ;;  %v4170_v9 = vadd.f32 %v4154_v49, %v4121_v42  ;;  %v8827_v51 = vadd.f32 %v3869_v58, %v3837_v11  ;;  %v3870_v37 = vmul.f32 %v4992_v15, %v5819_v1  ;;  %v8837_v44 = vld [vmem:[%s5809_s13 + $0x460] sm:$0xff] }
 0x229   : > { %5423 = vst [vmem:[%s5976_s15 + $0x320] sm:$0xff] %v4185_v47  ;;  %v3912_v46 = vmul.f32 %v8717_v33, %v5824_v7  ;;  %v3838_v40 = vadd.f32 %v3822_v16, %v3790_v45  ;;  %v3976_v29 = vadd.f32 %v8723_v27, %v3927_v30  ;;  %v4058_v31 = vmul.f32 %v8798_v13, %v5844_v25  ;;  %v8872_v47 = vld [vmem:[%s5809_s13 + $0x468] sm:$0xff] }
 0x22a   : > { %v4073_v23 = vadd.f32 %v4057_v32, %v4024_v61  ;;  %v4186_v22 = vadd.f32 %v8607_v20, %v4170_v9  ;;  %v8841_v56 = vmul.f32 %v4888_v52, %v5829_v14  ;;  %v8844_v53 = vmul.f32 %v4992_v15, %v5837_v21  ;;  %v4890_v61 = vld [vmem:[%s5809_s13 + $0x469] sm:$0xff] }
 0x22b   : > { %v3928_v33 = vadd.f32 %v3912_v46, %v8659_v5  ;;  %v4025_v36 = vadd.f32 %v8730_v62, %v3976_v29  ;;  %v4107_v27 = vmul.f32 %v4888_v52, %v5846_v26  ;;  %v4059_v3 = vmul.f32 %v8837_v44, %v5844_v25  ;;  %v4994_v30 = vld [vmem:[%s5809_s13 + $0x46a] sm:$0xff] }
 0x22c   : > { %v4122_v8 = vadd.f32 %v4106_v12, %v4073_v23  ;;  %5424 = vst [vmem:[%s5976_s15 + $0x328] sm:$0xff] %v4186_v22  ;;  %v4231_v58 = vmul.f32 %v8837_v44, %v5815_v63  ;;  %v4264_v43 = vmul.f32 %v4889_v2, %v5817_v0  ;;  %v3913_v5 = vmul.f32 %v8739_v28, %v5824_v7  ;;  %v4891_v29 = vld [vmem:[%s5809_s13 + $0x471] sm:$0xff] }
 0x22d   : > { %v3977_v49 = vadd.f32 %v8761_v35, %v3928_v33  ;;  %v8859_v6 = vadd.f32 %v3870_v37, %v3838_v40  ;;  %v4074_v52 = vadd.f32 %v4058_v31, %v4025_v36  ;;  %v4156_v59 = vmul.f32 %v8526_v50, %v4992_v15  ;;  %v8895_v31 = vld [vmem:[%s5809_s13 + $0x470] sm:$0xff] }
 0x22e   : > { %v4171_v62 = vadd.f32 %v4155_v10, %v4122_v8  ;;  %v8863_v11 = vmul.f32 %v4889_v2, %v5829_v14  ;;  %v4108_v32 = vmul.f32 %v4889_v2, %v5846_v26  ;;  %v3929_v38 = vadd.f32 %v3913_v5, %v8692_v18 }
 0x22f   : > { %v4026_v35 = vadd.f32 %v8764_v57, %v3977_v49  ;;  %v4123_v45 = vadd.f32 %v4107_v27, %v4074_v52  ;;  %v4157_v16 = vmul.f32 %v8526_v50, %v4993_v34  ;;  %v4313_v17 = vmul.f32 %v4993_v34, %v5819_v1 }
 0x230   : > { %v4187_v28 = vadd.f32 %v8607_v20, %v4171_v62  ;;  %v4280_v42 = vadd.f32 %v4264_v43, %v4231_v58  ;;  %v3978_v57 = vadd.f32 %v8787_v54, %v3929_v38  ;;  %v4060_v12 = vmul.f32 %v8872_v47, %v5844_v25  ;;  %v4995_v62 = vld [vmem:[%s5809_s13 + $0x472] sm:$0xff] }
 0x231   : > { %v4075_v15 = vadd.f32 %v4059_v3, %v4026_v35  ;;  %v4172_v18 = vadd.f32 %v4156_v59, %v4123_v45  ;;  %v8880_v10 = vmul.f32 %v4993_v34, %v5837_v21  ;;  %v8884_v9 = vmul.f32 %v4890_v61, %v5829_v14  ;;  %v8918_v59 = vld [vmem:[%s5809_s13 + $0x478] sm:$0xff] }
 0x232   : > { %5425 = vst [vmem:[%s5976_s15 + $0x330] sm:$0xff] %v4187_v28  ;;  %v3914_v37 = vmul.f32 %v8768_v19, %v5824_v7  ;;  %v8889_v23 = vmul.f32 %v4994_v30, %v5837_v21  ;;  %v4027_v54 = vadd.f32 %v8792_v55, %v3978_v57  ;;  %v4109_v40 = vmul.f32 %v4890_v61, %v5846_v26  ;;  %v4892_v28 = vld [vmem:[%s5809_s13 + $0x479] sm:$0xff] }
 0x233   : > { %v4124_v46 = vadd.f32 %v4108_v32, %v4075_v15  ;;  %v4188_v2 = vadd.f32 %v8607_v20, %v4172_v18  ;;  %v4232_v22 = vmul.f32 %v8872_v47, %v5815_v63  ;;  %v4265_v33 = vmul.f32 %v4890_v61, %v5817_v0 }
 0x234   : > { %v3930_v19 = vadd.f32 %v3914_v37, %v8711_v41  ;;  %v8902_v36 = vadd.f32 %v4313_v17, %v4280_v42  ;;  %v4076_v55 = vadd.f32 %v4060_v12, %v4027_v54  ;;  %v4158_v27 = vmul.f32 %v8526_v50, %v4994_v30 }
 0x235   : > { %v4173_v8 = vadd.f32 %v4157_v16, %v4124_v46  ;;  %5426 = vst [vmem:[%s5976_s15 + $0x338] sm:$0xff] %v4188_v2  ;;  %v4061_v34 = vmul.f32 %v8895_v31, %v5844_v25  ;;  %v4233_v49 = vmul.f32 %v8895_v31, %v5815_v63  ;;  %v4266_v58 = vmul.f32 %v4891_v29, %v5817_v0  ;;  %v8943_v46 = vld [vmem:[%s5809_s13 + $0x488] sm:$0xff] }
 0x236   : > { %v3979_v3 = vadd.f32 %v8817_v60, %v3930_v19  ;;  %v4125_v43 = vadd.f32 %v4109_v40, %v4076_v55  ;;  %v4314_v5 = vmul.f32 %v4994_v30, %v5819_v1  ;;  %v3915_v52 = vmul.f32 %v8798_v13, %v5824_v7  ;;  %v4997_v55 = vld [vmem:[%s5809_s13 + $0x48a] sm:$0xff] }
 0x237   : > { %v4189_v41 = vadd.f32 %v8607_v20, %v4173_v8  ;;  %v4281_v60 = vadd.f32 %v4265_v33, %v4232_v22  ;;  %v8921_v35 = vmul.f32 %v4891_v29, %v5829_v14  ;;  %v4110_v38 = vmul.f32 %v4891_v29, %v5846_v26 }
 0x238   : > { %v4028_v32 = vadd.f32 %v8820_v4, %v3979_v3  ;;  %v4174_v45 = vadd.f32 %v4158_v27, %v4125_v43  ;;  %v8928_v16 = vmul.f32 %v4995_v62, %v5837_v21  ;;  %v4159_v13 = vmul.f32 %v8526_v50, %v4995_v62  ;;  %v4996_v4 = vld [vmem:[%s5809_s13 + $0x47a] sm:$0xff] }
 0x239   : > { %5427 = vst [vmem:[%s5976_s15 + $0x340] sm:$0xff] %v4189_v41  ;;  %v3931_v17 = vadd.f32 %v3915_v52, %v8744_v24  ;;  %v4282_v42 = vadd.f32 %v4266_v58, %v4233_v49  ;;  %v4315_v61 = vmul.f32 %v4995_v62, %v5819_v1  ;;  %v4234_v57 = vmul.f32 %v8918_v59, %v5815_v63  ;;  %v4893_v24 = vld [vmem:[%s5809_s13 + $0x489] sm:$0xff] }
 0x23a   : > { %v4077_v15 = vadd.f32 %v4061_v34, %v4028_v32  ;;  %v4190_v12 = vadd.f32 %v8607_v20, %v4174_v45  ;;  %v4062_v30 = vmul.f32 %v8918_v59, %v5844_v25  ;;  %v4267_v37 = vmul.f32 %v4892_v28, %v5817_v0  ;;  %v8975_v52 = vld [vmem:[%s5809_s13 + $0x490] sm:$0xff] }
 0x23b   : > { %v3980_v18 = vadd.f32 %v8841_v56, %v3931_v17  ;;  %v8945_v54 = vadd.f32 %v4314_v5, %v4281_v60  ;;  %v8948_v29 = vmul.f32 %v4892_v28, %v5829_v14  ;;  %v3916_v2 = vmul.f32 %v8837_v44, %v5824_v7  ;;  %v4894_v5 = vld [vmem:[%s5809_s13 + $0x491] sm:$0xff] }
 0x23c   : > { %v4126_v40 = vadd.f32 %v4110_v38, %v4077_v15  ;;  %5428 = vst [vmem:[%s5976_s15 + $0x348] sm:$0xff] %v4190_v12  ;;  %v4111_v22 = vmul.f32 %v4892_v28, %v5846_v26  ;;  %v4283_v33 = vadd.f32 %v4267_v37, %v4234_v57  ;;  %v4316_v19 = vmul.f32 %v4996_v4, %v5819_v1  ;;  %v4998_v57 = vld [vmem:[%s5809_s13 + $0x492] sm:$0xff] }
 0x23d   : > { %v4029_v56 = vadd.f32 %v8844_v53, %v3980_v18  ;;  %v3932_v27 = vadd.f32 %v3916_v2, %v8784_v39  ;;  %v4235_v3 = vmul.f32 %v8943_v46, %v5815_v63  ;;  %v4268_v44 = vmul.f32 %v4893_v24, %v5817_v0  ;;  %v4895_v18 = vld [vmem:[%s5809_s13 + $0x499] sm:$0xff] }
 0x23e   : > { %v4175_v8 = vadd.f32 %v4159_v13, %v4126_v40  ;;  %v8961_v34 = vadd.f32 %v4315_v61, %v4282_v42  ;;  %v8964_v53 = vmul.f32 %v4996_v4, %v5837_v21  ;;  %v4160_v58 = vmul.f32 %v8526_v50, %v4996_v4 }
 0x23f   : > { %v4078_v49 = vadd.f32 %v4062_v30, %v4029_v56  ;;  %v3981_v43 = vadd.f32 %v8863_v11, %v3932_v27  ;;  %v4063_v39 = vmul.f32 %v8943_v46, %v5844_v25  ;;  %v3917_v62 = vmul.f32 %v8872_v47, %v5824_v7  ;;  %v8999_v30 = vld [vmem:[%s5809_s13 + $0x498] sm:$0xff] }
 0x240   : > { %v4191_v41 = vadd.f32 %v8607_v20, %v4175_v8  ;;  %v4112_v32 = vmul.f32 %v4893_v24, %v5846_v26  ;;  %v4161_v38 = vmul.f32 %v8526_v50, %v4997_v55  ;;  %v4317_v28 = vmul.f32 %v4997_v55, %v5819_v1 }
 0x241   : > { %v4127_v60 = vadd.f32 %v4111_v22, %v4078_v49  ;;  %v8981_v11 = vadd.f32 %v4316_v19, %v4283_v33  ;;  %v4030_v45 = vadd.f32 %v8880_v10, %v3981_v43  ;;  %v4284_v13 = vadd.f32 %v4268_v44, %v4235_v3  ;;  %v4999_v44 = vld [vmem:[%s5809_s13 + $0x49a] sm:$0xff] }
 0x242   : > { %5429 = vst [vmem:[%s5976_s15 + $0x350] sm:$0xff] %v4191_v41  ;;  %v3933_v47 = vadd.f32 %v3917_v62, %v8801_v48  ;;  %v8986_v15 = vmul.f32 %v4893_v24, %v5829_v14  ;;  %v4236_v42 = vmul.f32 %v8975_v52, %v5815_v63  ;;  %v4269_v61 = vmul.f32 %v4894_v5, %v5817_v0  ;;  %v4896_v43 = vld [vmem:[%s5809_s13 + $0x4a1] sm:$0xff] }
 0x243   : > { %v4176_v17 = vadd.f32 %v4160_v58, %v4127_v60  ;;  %v4079_v4 = vadd.f32 %v4063_v39, %v4030_v45  ;;  %v4064_v10 = vmul.f32 %v8975_v52, %v5844_v25  ;;  %v3918_v48 = vmul.f32 %v8895_v31, %v5824_v7  ;;  %v9031_v62 = vld [vmem:[%s5809_s13 + $0x4a0] sm:$0xff] }
 0x244   : > { %v3982_v12 = vadd.f32 %v8884_v9, %v3933_v47  ;;  %v9003_v24 = vmul.f32 %v4997_v55, %v5837_v21  ;;  %v4113_v40 = vmul.f32 %v4894_v5, %v5846_v26  ;;  %v4162_v2 = vmul.f32 %v8526_v50, %v4998_v57  ;;  %v4897_v47 = vld [vmem:[%s5809_s13 + $0x4b1] sm:$0xff] }
 0x245   : > { %v4192_v37 = vadd.f32 %v8607_v20, %v4176_v17  ;;  %v4128_v9 = vadd.f32 %v4112_v32, %v4079_v4  ;;  %v9007_v56 = vadd.f32 %v4317_v28, %v4284_v13  ;;  %v3934_v31 = vadd.f32 %v3918_v48, %v8827_v51 }
 0x246   : > { %v4031_v22 = vadd.f32 %v8889_v23, %v3982_v12  ;;  %v4285_v33 = vadd.f32 %v4269_v61, %v4236_v42  ;;  %v4318_v19 = vmul.f32 %v4998_v57, %v5819_v1  ;;  %v4237_v8 = vmul.f32 %v8999_v30, %v5815_v63 }
 0x247   : > { %5430 = vst [vmem:[%s5976_s15 + $0x358] sm:$0xff] %v4192_v37  ;;  %v4270_v55 = vmul.f32 %v4895_v18, %v5817_v0  ;;  %v4177_v27 = vadd.f32 %v4161_v38, %v4128_v9  ;;  %v3983_v49 = vadd.f32 %v8921_v35, %v3934_v31  ;;  %v4065_v23 = vmul.f32 %v8999_v30, %v5844_v25  ;;  %v9037_v38 = vld [vmem:[%s5809_s13 + $0x4b0] sm:$0xff] }
 0x248   : > { %v4080_v3 = vadd.f32 %v4064_v10, %v4031_v22  ;;  %v9021_v51 = vmul.f32 %v4894_v5, %v5829_v14  ;;  %v9024_v58 = vmul.f32 %v4998_v57, %v5837_v21  ;;  %v4114_v41 = vmul.f32 %v4895_v18, %v5846_v26  ;;  %v5000_v57 = vld [vmem:[%s5809_s13 + $0x4a2] sm:$0xff] }
 0x249   : > { %v3919_v39 = vmul.f32 %v8918_v59, %v5824_v7  ;;  %v4193_v35 = vadd.f32 %v8607_v20, %v4177_v27  ;;  %v4032_v32 = vadd.f32 %v8928_v16, %v3983_v49  ;;  %v4163_v5 = vmul.f32 %v8526_v50, %v4999_v44  ;;  %v4898_v27 = vld [vmem:[%s5809_s13 + $0x4b9] sm:$0xff] }
 0x24a   : > { %v4129_v60 = vadd.f32 %v4113_v40, %v4080_v3  ;;  %v9039_v28 = vadd.f32 %v4318_v19, %v4285_v33  ;;  %v4286_v45 = vadd.f32 %v4270_v55, %v4237_v8  ;;  %v4319_v13 = vmul.f32 %v4999_v44, %v5819_v1  ;;  %v9074_v3 = vld [vmem:[%s5809_s13 + $0x4b8] sm:$0xff] }
 0x24b   : > { %v3935_v59 = vadd.f32 %v3919_v39, %v8859_v6  ;;  %5431 = vst [vmem:[%s5976_s15 + $0x360] sm:$0xff] %v4193_v35  ;;  %v4081_v42 = vadd.f32 %v4065_v23, %v4032_v32  ;;  %v4238_v61 = vmul.f32 %v9031_v62, %v5815_v63  ;;  %v4271_v16 = vmul.f32 %v4896_v43, %v5817_v0 }
 0x24c   : > { %v4178_v17 = vadd.f32 %v4162_v2, %v4129_v60  ;;  %v9049_v4 = vmul.f32 %v4895_v18, %v5829_v14  ;;  %v4066_v10 = vmul.f32 %v9031_v62, %v5844_v25  ;;  %v4239_v6 = vmul.f32 %v9037_v38, %v5815_v63  ;;  %v5001_v2 = vld [vmem:[%s5809_s13 + $0x4b2] sm:$0xff] }
 0x24d   : > { %v3984_v12 = vadd.f32 %v8948_v29, %v3935_v59  ;;  %v4130_v37 = vadd.f32 %v4114_v41, %v4081_v42  ;;  %v9059_v40 = vmul.f32 %v4999_v44, %v5837_v21  ;;  %v4272_v18 = vmul.f32 %v4897_v47, %v5817_v0  ;;  %v5002_v42 = vld [vmem:[%s5809_s13 + $0x4ba] sm:$0xff] }
 0x24e   : > { %v4194_v48 = vadd.f32 %v8607_v20, %v4178_v17  ;;  %v9063_v9 = vadd.f32 %v4319_v13, %v4286_v45  ;;  %v4115_v22 = vmul.f32 %v4896_v43, %v5846_v26  ;;  %v4362_v31 = vmul.f32 %v8943_v46, %v5824_v7  ;;  %v9093_v13 = vld [vmem:[%s5809_s13 + $0x4c0] sm:$0xff] }
 0x24f   : > { %v4033_v29 = vadd.f32 %v8964_v53, %v3984_v12  ;;  %v4179_v33 = vadd.f32 %v4163_v5, %v4130_v37  ;;  %v4164_v19 = vmul.f32 %v8526_v50, %v5000_v57  ;;  %v4287_v8 = vadd.f32 %v4271_v16, %v4238_v61 }
 0x250   : > { %5432 = vst [vmem:[%s5976_s15 + $0x368] sm:$0xff] %v4194_v48  ;;  %v4320_v55 = vmul.f32 %v5000_v57, %v5819_v1  ;;  %v4288_v53 = vadd.f32 %v4272_v18, %v4239_v6  ;;  %v4321_v49 = vmul.f32 %v5001_v2, %v5819_v1  ;;  %v4378_v46 = vadd.f32 %v4362_v31, %v8902_v36  ;;  %v4899_v36 = vld [vmem:[%s5809_s13 + $0x4c1] sm:$0xff] }
 0x251   : > { %v4082_v44 = vadd.f32 %v4066_v10, %v4033_v29  ;;  %v4195_v23 = vadd.f32 %v8607_v20, %v4179_v33  ;;  %v9080_v41 = vmul.f32 %v4896_v43, %v5829_v14  ;;  %v9083_v39 = vmul.f32 %v5000_v57, %v5837_v21 }
 0x252   : > { %v4509_v35 = vmul.f32 %v9037_v38, %v5844_v25  ;;  %v4427_v32 = vadd.f32 %v8986_v15, %v4378_v46  ;;  %v4240_v5 = vmul.f32 %v9074_v3, %v5815_v63  ;;  %v4273_v45 = vmul.f32 %v4898_v27, %v5817_v0  ;;  %v9138_v46 = vld [vmem:[%s5809_s13 + $0x4c8] sm:$0xff] }
 0x253   : > { %v4131_v60 = vadd.f32 %v4115_v22, %v4082_v44  ;;  %5433 = vst [vmem:[%s5976_s15 + $0x370] sm:$0xff] %v4195_v23  ;;  %v9096_v43 = vadd.f32 %v4320_v55, %v4287_v8  ;;  %v9099_v59 = vmul.f32 %v4897_v47, %v5829_v14  ;;  %v9102_v17 = vmul.f32 %v5001_v2, %v5837_v21 }
 0x254   : > { %v4363_v15 = vmul.f32 %v8975_v52, %v5824_v7  ;;  %v9107_v16 = vadd.f32 %v4321_v49, %v4288_v53  ;;  %v4476_v57 = vadd.f32 %v9003_v24, %v4427_v32  ;;  %v4558_v12 = vmul.f32 %v4897_v47, %v5846_v26  ;;  %v5003_v24 = vld [vmem:[%s5809_s13 + $0x4c2] sm:$0xff] }
 0x255   : > { %v4180_v61 = vadd.f32 %v4164_v19, %v4131_v60  ;;  %v4607_v10 = vmul.f32 %v8526_v50, %v5001_v2  ;;  %v4241_v48 = vmul.f32 %v9093_v13, %v5815_v63  ;;  %v4274_v37 = vmul.f32 %v4899_v36, %v5817_v0 }
 0x256   : > { %v4379_v6 = vadd.f32 %v4363_v15, %v8945_v54  ;;  %v4525_v52 = vadd.f32 %v4509_v35, %v4476_v57  ;;  %v4289_v29 = vadd.f32 %v4273_v45, %v4240_v5  ;;  %v4322_v22 = vmul.f32 %v5002_v42, %v5819_v1  ;;  %v9156_v15 = vld [vmem:[%s5809_s13 + $0x4d8] sm:$0xff] }
 0x257   : > { %v4196_v18 = vadd.f32 %v8607_v20, %v4180_v61  ;;  %v9120_v47 = vmul.f32 %v4898_v27, %v5829_v14  ;;  %v4510_v54 = vmul.f32 %v9074_v3, %v5844_v25  ;;  %v4364_v31 = vmul.f32 %v8999_v30, %v5824_v7  ;;  %v4900_v30 = vld [vmem:[%s5809_s13 + $0x4c9] sm:$0xff] }
 0x258   : > { %v4428_v2 = vadd.f32 %v9021_v51, %v4379_v6  ;;  %v4574_v33 = vadd.f32 %v4558_v12, %v4525_v52  ;;  %v9129_v19 = vmul.f32 %v5002_v42, %v5837_v21  ;;  %v4559_v8 = vmul.f32 %v4898_v27, %v5846_v26 }
 0x259   : > { %5434 = vst [vmem:[%s5976_s15 + $0x378] sm:$0xff] %v4196_v18  ;;  %v4608_v55 = vmul.f32 %v8526_v50, %v5002_v42  ;;  %v4290_v51 = vadd.f32 %v4274_v37, %v4241_v48  ;;  %v4323_v53 = vmul.f32 %v5003_v24, %v5819_v1  ;;  %v4380_v49 = vadd.f32 %v4364_v31, %v8961_v34  ;;  %v5004_v34 = vld [vmem:[%s5809_s13 + $0x4ca] sm:$0xff]  ;;  %v4901_v42 = vld [vmem:[%s5809_s13 + $0x4d9] sm:$0xff] }
 0x25a   : > { %v4477_v44 = vadd.f32 %v9024_v58, %v4428_v2  ;;  %v4623_v23 = vadd.f32 %v4607_v10, %v4574_v33  ;;  %v9140_v35 = vadd.f32 %v4322_v22, %v4289_v29  ;;  %v9143_v60 = vmul.f32 %v4899_v36, %v5829_v14  ;;  %v4902_v33 = vld [vmem:[%s5809_s13 + $0x4e1] sm:$0xff] }
 0x25b   : > { %v9146_v27 = vmul.f32 %v5003_v24, %v5837_v21  ;;  %v4429_v32 = vadd.f32 %v9049_v4, %v4380_v49  ;;  %v4511_v5 = vmul.f32 %v9093_v13, %v5844_v25  ;;  %v4365_v45 = vmul.f32 %v9031_v62, %v5824_v7 }
 0x25c   : > { %v4526_v58 = vadd.f32 %v4510_v54, %v4477_v44  ;;  %v4639_v61 = vadd.f32 %v8607_v20, %v4623_v23  ;;  %v4560_v57 = vmul.f32 %v4899_v36, %v5846_v26  ;;  %v4242_v12 = vmul.f32 %v9138_v46, %v5815_v63  ;;  %v5005_v54 = vld [vmem:[%s5809_s13 + $0x4da] sm:$0xff] }
 0x25d   : > { %v4275_v4 = vmul.f32 %v4900_v30, %v5817_v0  ;;  %v9163_v6 = vadd.f32 %v4323_v53, %v4290_v51  ;;  %v4478_v48 = vadd.f32 %v9059_v40, %v4429_v32  ;;  %v4381_v62 = vadd.f32 %v4365_v45, %v8981_v11  ;;  %v9192_v53 = vld [vmem:[#allocation2 + $0x8] ss:$0 sm:$0xff] }
 0x25e   : > { %v4575_v10 = vadd.f32 %v4559_v8, %v4526_v58  ;;  %5483 = vst [vmem:[%s5976_s15 + $0x380] sm:$0xff] %v4639_v61  ;;  %v4609_v37 = vmul.f32 %v8526_v50, %v5003_v24  ;;  %v4324_v36 = vmul.f32 %v5004_v34, %v5819_v1  ;;  %v4243_v18 = vmul.f32 %v9156_v15, %v5815_v63  ;;  %v9187_v8 = vld [vmem:[%s5809_s13 + $0x4e0] sm:$0xff] }
 0x25f   : > { %v4276_v52 = vmul.f32 %v4901_v42, %v5817_v0  ;;  %v4527_v22 = vadd.f32 %v4511_v5, %v4478_v48  ;;  %v4430_v2 = vadd.f32 %v9080_v41, %v4381_v62  ;;  %v4512_v40 = vmul.f32 %v9138_v46, %v5844_v25 }
 0x260   : > { %v4624_v29 = vadd.f32 %v4608_v55, %v4575_v10  ;;  %v4291_v11 = vadd.f32 %v4275_v4, %v4242_v12  ;;  %v9178_v31 = vmul.f32 %v4900_v30, %v5829_v14  ;;  %v9181_v50 = vmul.f32 %v5004_v34, %v5837_v21 }
 0x261   : > { %v4366_v24 = vmul.f32 %v9037_v38, %v5824_v7  ;;  %v4576_v55 = vadd.f32 %v4560_v57, %v4527_v22  ;;  %v4479_v44 = vadd.f32 %v9083_v39, %v4430_v2  ;;  %v4561_v51 = vmul.f32 %v4900_v30, %v5846_v26  ;;  %v5006_v57 = vld [vmem:[%s5809_s13 + $0x4e2] sm:$0xff] }
 0x262   : > { %v4640_v41 = vadd.f32 %v8607_v20, %v4624_v29  ;;  %v4610_v49 = vmul.f32 %v9192_v53, %v5004_v34  ;;  %v4292_v23 = vadd.f32 %v4276_v52, %v4243_v18  ;;  %v4325_v58 = vmul.f32 %v5005_v54, %v5819_v1  ;;  %v4903_v18 = vld [vmem:[%s5809_s13 + $0x4e9] sm:$0xff] }
 0x263   : > { %v4382_v38 = vadd.f32 %v4366_v24, %v9007_v56  ;;  %v4625_v32 = vadd.f32 %v4609_v37, %v4576_v55  ;;  %v4528_v5 = vadd.f32 %v4512_v40, %v4479_v44  ;;  %v4244_v45 = vmul.f32 %v9187_v8, %v5815_v63  ;;  %v4904_v44 = vld [vmem:[%s5809_s13 + $0x4f1] sm:$0xff] }
 0x264   : > { %5484 = vst [vmem:[%s5976_s15 + $0x388] sm:$0xff] %v4640_v41  ;;  %v4277_v39 = vmul.f32 %v4902_v33, %v5817_v0  ;;  %v9201_v30 = vadd.f32 %v4324_v36, %v4291_v11  ;;  %v4513_v61 = vmul.f32 %v9156_v15, %v5844_v25  ;;  %v4367_v56 = vmul.f32 %v9074_v3, %v5824_v7  ;;  %v9223_v3 = vld [vmem:[%s5809_s13 + $0x4e8] sm:$0xff] }
 0x265   : > { %v4431_v34 = vadd.f32 %v9099_v59, %v4382_v38  ;;  %v4641_v12 = vadd.f32 %v8607_v20, %v4625_v32  ;;  %v4577_v4 = vadd.f32 %v4561_v51, %v4528_v5  ;;  %v9211_v10 = vmul.f32 %v4901_v42, %v5829_v14  ;;  %v5007_v11 = vld [vmem:[%s5809_s13 + $0x4ea] sm:$0xff] }
 0x266   : > { %v9214_v48 = vmul.f32 %v5005_v54, %v5837_v21  ;;  %v9216_v62 = vadd.f32 %v4325_v58, %v4292_v23  ;;  %v4562_v37 = vmul.f32 %v4901_v42, %v5846_v26  ;;  %v4383_v36 = vadd.f32 %v4367_v56, %v9039_v28  ;;  %v9243_v51 = vld [vmem:[%s5809_s13 + $0x4f0] sm:$0xff] }
 0x267   : > { %v4480_v59 = vadd.f32 %v9102_v17, %v4431_v34  ;;  %5485 = vst [vmem:[%s5976_s15 + $0x390] sm:$0xff] %v4641_v12  ;;  %v4626_v52 = vadd.f32 %v4610_v49, %v4577_v4  ;;  %v4611_v29 = vmul.f32 %v9192_v53, %v5005_v54  ;;  %v4293_v22 = vadd.f32 %v4277_v39, %v4244_v45  ;;  %v5008_v56 = vld [vmem:[%s5809_s13 + $0x4f2] sm:$0xff]  ;;  %v9265_v12 = vld [vmem:[#allocation3] ss:$0 sm:$0xff] }
 0x268   : > { %v4326_v2 = vmul.f32 %v5006_v57, %v5819_v1  ;;  %v9229_v17 = vmul.f32 %v4902_v33, %v5829_v14  ;;  %v4432_v42 = vadd.f32 %v9120_v47, %v4383_v36  ;;  %v4514_v28 = vmul.f32 %v9187_v8, %v5844_v25 }
 0x269   : > { %v4529_v40 = vadd.f32 %v4513_v61, %v4480_v59  ;;  %v4642_v24 = vadd.f32 %v8607_v20, %v4626_v52  ;;  %v4245_v41 = vmul.f32 %v9223_v3, %v5815_v63  ;;  %v4278_v54 = vmul.f32 %v4903_v18, %v5817_v0 }
 0x26a   : > { %v4368_v55 = vmul.f32 %v9093_v13, %v5824_v7  ;;  %v9246_v47 = vmul.f32 %v5006_v57, %v5837_v21  ;;  %v4481_v23 = vadd.f32 %v9129_v19, %v4432_v42  ;;  %v4563_v20 = vmul.f32 %v4902_v33, %v5846_v26 }
 0x26b   : > { %v4578_v49 = vadd.f32 %v4562_v37, %v4529_v40  ;;  %5486 = vst [vmem:[%s5976_s15 + $0x398] sm:$0xff] %v4642_v24  ;;  %v9251_v58 = vadd.f32 %v4326_v2, %v4293_v22  ;;  %v4612_v38 = vmul.f32 %v9192_v53, %v5006_v57  ;;  %v4327_v32 = vmul.f32 %v5007_v11, %v5819_v1 }
 0x26c   : > { %v4384_v13 = vadd.f32 %v4368_v55, %v9063_v9  ;;  %v4530_v45 = vadd.f32 %v4514_v28, %v4481_v23  ;;  %v4246_v39 = vmul.f32 %v9243_v51, %v5815_v63  ;;  %v4279_v34 = vmul.f32 %v4904_v44, %v5817_v0 }
 0x26d   : > { %v4627_v5 = vadd.f32 %v4611_v29, %v4578_v49  ;;  %v4294_v19 = vadd.f32 %v4278_v54, %v4245_v41  ;;  %v4515_v61 = vmul.f32 %v9223_v3, %v5844_v25  ;;  %v4369_v57 = vmul.f32 %v9138_v46, %v5824_v7  ;;  %v5475_v54 = vld [vmem:[%s5809_s13 + $0x500] sm:$0xff] }
 0x26e   : > { %v4433_v33 = vadd.f32 %v9143_v60, %v4384_v13  ;;  %v4579_v4 = vadd.f32 %v4563_v20, %v4530_v45  ;;  %v4421_v63 = vmul.f32 %v4903_v18, %v5829_v14  ;;  %v9270_v59 = vmul.f32 %v5007_v11, %v5837_v21 }
 0x26f   : > { %v4643_v9 = vadd.f32 %v9265_v12, %v4627_v5  ;;  %v4564_v60 = vmul.f32 %v4903_v18, %v5846_v26  ;;  %v4613_v37 = vmul.f32 %v9192_v53, %v5007_v11  ;;  %v4385_v36 = vadd.f32 %v4369_v57, %v9096_v43 }
 0x270   : > { %v4482_v0 = vadd.f32 %v9146_v27, %v4433_v33  ;;  %v4628_v46 = vadd.f32 %v4612_v38, %v4579_v4  ;;  %v4295_v52 = vadd.f32 %v4279_v34, %v4246_v39  ;;  %v4328_v29 = vmul.f32 %v5008_v56, %v5819_v1  ;;  %v4905_v1 = vld [vmem:[%s5809_s13 + $0x501] sm:$0xff]  ;;  %v5010_v33 = vld [vmem:[%s5809_s13 + $0x50a] sm:$0xff] }
 0x271   : > { %5487 = vst [vmem:[%s5976_s15 + $0x3a0] sm:$0xff] %v4643_v9  ;;  %v4370_v22 = vmul.f32 %v9156_v15, %v5824_v7  ;;  %v9280_v2 = vadd.f32 %v4327_v32, %v4294_v19  ;;  %v4434_v18 = vadd.f32 %v9178_v31, %v4385_v36  ;;  %v4516_v40 = vmul.f32 %v9243_v51, %v5844_v25  ;;  %v5009_v31 = vld [vmem:[%s5809_s13 + $0x502] sm:$0xff] }
 0x272   : > { %v4531_v27 = vadd.f32 %v4515_v61, %v4482_v0  ;;  %v4644_v43 = vadd.f32 %v9265_v12, %v4628_v46  ;;  %v4422_v42 = vmul.f32 %v4904_v44, %v5829_v14  ;;  %v9288_v28 = vmul.f32 %v5008_v56, %v5837_v21  ;;  %v4906_v32 = vld [vmem:[%s5809_s13 + $0x509] sm:$0xff] }
 0x273   : > { %v4386_v15 = vadd.f32 %v4370_v22, %v9107_v16  ;;  %v4483_v24 = vadd.f32 %v9181_v50, %v4434_v18  ;;  %v4565_v41 = vmul.f32 %v4904_v44, %v5846_v26  ;;  %v4371_v55 = vmul.f32 %v9187_v8, %v5824_v7 }
 0x274   : > { %v4580_v11 = vadd.f32 %v4564_v60, %v4531_v27  ;;  %5488 = vst [vmem:[%s5976_s15 + $0x3a8] sm:$0xff] %v4644_v43  ;;  %v9299_v49 = vadd.f32 %v4328_v29, %v4295_v52  ;;  %v4614_v23 = vmul.f32 %v9192_v53, %v5008_v56  ;;  %v4517_v16 = vmul.f32 %v5475_v54, %v5844_v25  ;;  %v4907_v60 = vld [vmem:[%s5809_s13 + $0x511] sm:$0xff] }
 0x275   : > { %v4435_v20 = vadd.f32 %v9211_v10, %v4386_v15  ;;  %v4532_v50 = vadd.f32 %v4516_v40, %v4483_v24  ;;  %v9305_v44 = vmul.f32 %v4905_v1, %v5829_v14  ;;  %v4387_v13 = vadd.f32 %v4371_v55, %v9140_v35  ;;  %v5476_v10 = vld [vmem:[%s5809_s13 + $0x508] sm:$0xff]  ;;  %v5011_v15 = vld [vmem:[%s5809_s13 + $0x512] sm:$0xff] }
 0x276   : > { %v4629_v38 = vadd.f32 %v4613_v37, %v4580_v11  ;;  %v9310_v8 = vmul.f32 %v5009_v31, %v5837_v21  ;;  %v4566_v45 = vmul.f32 %v4905_v1, %v5846_v26  ;;  %v4372_v39 = vmul.f32 %v9223_v3, %v5824_v7  ;;  %v5477_v37 = vld [vmem:[%s5809_s13 + $0x510] sm:$0xff]  ;;  %v5478_v1 = vld [vmem:[%s5809_s13 + $0x518] sm:$0xff] }
 0x277   : > { %v4484_v5 = vadd.f32 %v9214_v48, %v4435_v20  ;;  %v4581_v19 = vadd.f32 %v4565_v41, %v4532_v50  ;;  %v4436_v61 = vadd.f32 %v9229_v17, %v4387_v13  ;;  %v4518_v35 = vmul.f32 %v5476_v10, %v5844_v25  ;;  %v4908_v11 = vld [vmem:[%s5809_s13 + $0x519] sm:$0xff] }
 0x278   : > { %v4645_v34 = vadd.f32 %v9265_v12, %v4629_v38  ;;  %v4615_v57 = vmul.f32 %v9192_v53, %v5009_v31  ;;  %v4424_v48 = vmul.f32 %v4906_v32, %v5829_v14  ;;  %v4388_v9 = vadd.f32 %v4372_v39, %v9163_v6  ;;  %v5479_v31 = vld [vmem:[%s5809_s13 + $0x528] sm:$0xff]  ;;  %v5012_v38 = vld [vmem:[%s5809_s13 + $0x51a] sm:$0xff] }
 0x279   : > { %v4533_v56 = vadd.f32 %v4517_v16, %v4484_v5  ;;  %v4630_v4 = vadd.f32 %v4614_v23, %v4581_v19  ;;  %v4485_v0 = vadd.f32 %v9246_v47, %v4436_v61  ;;  %v4567_v3 = vmul.f32 %v4906_v32, %v5846_v26  ;;  %v4909_v32 = vld [vmem:[%s5809_s13 + $0x529] sm:$0xff] }
 0x27a   : > { %5489 = vst [vmem:[%s5976_s15 + $0x3b0] sm:$0xff] %v4645_v34  ;;  %v4373_v17 = vmul.f32 %v9243_v51, %v5824_v7  ;;  %v4473_v46 = vmul.f32 %v5010_v33, %v5837_v21  ;;  %v4437_v52 = vadd.f32 %v4421_v63, %v4388_v9  ;;  %v4519_v6 = vmul.f32 %v5477_v37, %v5844_v25  ;;  %v5480_v34 = vld [vmem:[%s5809_s13 + $0x530] sm:$0xff] }
 0x27b   : > { %v4582_v36 = vadd.f32 %v4566_v45, %v4533_v56  ;;  %v4646_v29 = vadd.f32 %v9265_v12, %v4630_v4  ;;  %v4534_v47 = vadd.f32 %v4518_v35, %v4485_v0  ;;  %v4616_v22 = vmul.f32 %v9192_v53, %v5010_v33  ;;  %v5013_v33 = vld [vmem:[%s5809_s13 + $0x52a] sm:$0xff] }
 0x27c   : > { %v4389_v27 = vadd.f32 %v4373_v17, %v9201_v30  ;;  %v4425_v40 = vmul.f32 %v4907_v60, %v5829_v14  ;;  %v4486_v51 = vadd.f32 %v9270_v59, %v4437_v52  ;;  %v4568_v43 = vmul.f32 %v4907_v60, %v5846_v26  ;;  %v5481_v60 = vld [vmem:[%s5809_s13 + $0x538] sm:$0xff] }
 0x27d   : > { %v4631_v18 = vadd.f32 %v4615_v57, %v4582_v36  ;;  %5490 = vst [vmem:[%s5976_s15 + $0x3b8] sm:$0xff] %v4646_v29  ;;  %v4583_v63 = vadd.f32 %v4567_v3, %v4534_v47  ;;  %v4520_v41 = vmul.f32 %v5478_v1, %v5844_v25  ;;  %v4374_v30 = vmul.f32 %v5475_v54, %v5824_v7  ;;  %v4910_v57 = vld [vmem:[%s5809_s13 + $0x531] sm:$0xff]  ;;  %v5482_v47 = vld [vmem:[%s5809_s13 + $0x540] sm:$0xff] }
 0x27e   : > { %v4438_v24 = vadd.f32 %v4422_v42, %v4389_v27  ;;  %v4535_v59 = vadd.f32 %v4519_v6, %v4486_v51  ;;  %v4617_v23 = vmul.f32 %v9192_v53, %v5011_v15  ;;  %v4569_v20 = vmul.f32 %v4908_v11, %v5846_v26  ;;  %v5014_v17 = vld [vmem:[%s5809_s13 + $0x532] sm:$0xff] }
 0x27f   : > { %v4647_v55 = vadd.f32 %v9265_v12, %v4631_v18  ;;  %v4632_v16 = vadd.f32 %v4616_v22, %v4583_v63  ;;  %v4390_v42 = vadd.f32 %v4374_v30, %v9216_v62  ;;  %v4375_v54 = vmul.f32 %v5476_v10, %v5824_v7  ;;  %v4912_v63 = vld [vmem:[%s5809_s13 + $0x541] sm:$0xff] }
 0x280   : > { %v4487_v50 = vadd.f32 %v9288_v28, %v4438_v24  ;;  %v4474_v13 = vmul.f32 %v5011_v15, %v5837_v21  ;;  %v4584_v5 = vadd.f32 %v4568_v43, %v4535_v59  ;;  %v4618_v45 = vmul.f32 %v9192_v53, %v5012_v38 }
 0x281   : > { %5491 = vst [vmem:[%s5976_s15 + $0x3c0] sm:$0xff] %v4647_v55  ;;  %v4521_v39 = vmul.f32 %v5479_v31, %v5844_v25  ;;  %v4648_v19 = vadd.f32 %v9265_v12, %v4632_v16  ;;  %v4439_v62 = vadd.f32 %v9305_v44, %v4390_v42  ;;  %v4391_v10 = vadd.f32 %v4375_v54, %v9251_v58 }
 0x282   : > { %v4536_v28 = vadd.f32 %v4520_v41, %v4487_v50  ;;  %v4633_v61 = vadd.f32 %v4617_v23, %v4584_v5  ;;  %v4426_v35 = vmul.f32 %v4908_v11, %v5829_v14  ;;  %v4570_v56 = vmul.f32 %v4909_v32, %v5846_v26 }
 0x283   : > { %v4376_v9 = vmul.f32 %v5477_v37, %v5824_v7  ;;  %5492 = vst [vmem:[%s5976_s15 + $0x3c8] sm:$0xff] %v4648_v19  ;;  %v4488_v0 = vadd.f32 %v9310_v8, %v4439_v62  ;;  %v4440_v3 = vadd.f32 %v4424_v48, %v4391_v10  ;;  %v4522_v44 = vmul.f32 %v5480_v34, %v5844_v25  ;;  %v4911_v48 = vld [vmem:[%s5809_s13 + $0x539] sm:$0xff] }
 0x284   : > { %v4585_v4 = vadd.f32 %v4569_v20, %v4536_v28  ;;  %v4649_v58 = vadd.f32 %v9265_v12, %v4633_v61  ;;  %v4619_v14 = vmul.f32 %v9192_v53, %v5013_v33  ;;  %v4377_v37 = vmul.f32 %v5478_v1, %v5824_v7  ;;  %v5015_v1 = vld [vmem:[%s5809_s13 + $0x53a] sm:$0xff] }
 0x285   : > { %v4392_v36 = vadd.f32 %v4376_v9, %v9280_v2  ;;  %v4537_v6 = vadd.f32 %v4521_v39, %v4488_v0  ;;  %v4489_v29 = vadd.f32 %v4473_v46, %v4440_v3  ;;  %v4571_v8 = vmul.f32 %v4910_v57, %v5846_v26 }
 0x286   : > { %v4634_v52 = vadd.f32 %v4618_v45, %v4585_v4  ;;  %5493 = vst [vmem:[%s5976_s15 + $0x3d0] sm:$0xff] %v4649_v58  ;;  %v4475_v22 = vmul.f32 %v5012_v38, %v5837_v21  ;;  %v4523_v18 = vmul.f32 %v5481_v60, %v5844_v25  ;;  %v4393_v2 = vadd.f32 %v4377_v37, %v9299_v49  ;;  %v5016_v49 = vld [vmem:[%s5809_s13 + $0x542] sm:$0xff] }
 0x287   : > { %v4441_v27 = vadd.f32 %v4425_v40, %v4392_v36  ;;  %v4586_v51 = vadd.f32 %v4570_v56, %v4537_v6  ;;  %v4538_v43 = vadd.f32 %v4522_v44, %v4489_v29  ;;  %v4620_v46 = vmul.f32 %v9192_v53, %v5014_v17 }
 0x288   : > { %v4650_v7 = vadd.f32 %v9265_v12, %v4634_v52  ;;  %v4572_v11 = vmul.f32 %v4911_v48, %v5846_v26  ;;  %v4442_v24 = vadd.f32 %v4426_v35, %v4393_v2  ;;  %v4524_v21 = vmul.f32 %v5482_v47, %v5844_v25 }
 0x289   : > { %v4490_v15 = vadd.f32 %v4474_v13, %v4441_v27  ;;  %v4635_v40 = vadd.f32 %v4619_v14, %v4586_v51  ;;  %v4587_v41 = vadd.f32 %v4571_v8, %v4538_v43  ;;  %v4621_v31 = vmul.f32 %v9192_v53, %v5015_v1 }
 0x28a   : > { %5494 = vst [vmem:[%s5976_s15 + $0x3d8] sm:$0xff] %v4650_v7  ;;  %v4491_v55 = vadd.f32 %v4475_v22, %v4442_v24  ;;  %v4573_v59 = vmul.f32 %v4912_v63, %v5846_v26  ;;  %v4622_v38 = vmul.f32 %v9192_v53, %v5016_v49 }
 0x28b   : > { %v4539_v30 = vadd.f32 %v4523_v18, %v4490_v15  ;;  %v4651_v23 = vadd.f32 %v9265_v12, %v4635_v40  ;;  %v4636_v20 = vadd.f32 %v4620_v46, %v4587_v41 }
 0x28c   : > { %v4540_v25 = vadd.f32 %v4524_v21, %v4491_v55 }
 0x28d   : > { %v4588_v16 = vadd.f32 %v4572_v11, %v4539_v30  ;;  %5495 = vst [vmem:[%s5976_s15 + $0x3e0] sm:$0xff] %v4651_v23  ;;  %v4652_v50 = vadd.f32 %v9265_v12, %v4636_v20 }
 0x28e   : > { %v4589_v42 = vadd.f32 %v4573_v59, %v4540_v25 }
 0x28f   : > { %v4637_v32 = vadd.f32 %v4621_v31, %v4588_v16  ;;  %5496 = vst [vmem:[%s5976_s15 + $0x3e8] sm:$0xff] %v4652_v50 }
 0x290   : > { %v4638_v54 = vadd.f32 %v4622_v38, %v4589_v42 }
 0x291   : > { %v4653_v26 = vadd.f32 %v9265_v12, %v4637_v32 }
 0x292   : > { %v4654_v53 = vadd.f32 %v9265_v12, %v4638_v54 }
 0x293   : > { %5497 = vst [vmem:[%s5976_s15 + $0x3f0] sm:$0xff] %v4653_v26 }
 0x294   : > { %5498 = vst [vmem:[%s5976_s15 + $0x3f8] sm:$0xff] %v4654_v53 }
 0x295   : > { %5604 = shalt.err (!%p5601_p8)
}
 0x296   : > { %s5605_s11 = scalar_lea.hbm %s9404_s27, 16384  ;;  %s5609_s14 = scalar_lea.hbm %s9463_s5, 32768 }
 0x297   : > { %p5606_p11 = scmp.ne.s32.totalorder %s9404_s27, %s5605_s11  ;;  %p5610_p0 = scmp.lt.u32.totalorder %s9404_s27, %s9463_s5 }
 0x298   : > { %p5611_p1 = scmp.lt.u32.totalorder %s5609_s14, %s5605_s11  ;;  %p5613_p3 = scmp.lt.u32.totalorder %s5605_s11, %s9404_s27 }
 0x299   : > { %p5607_p12 = pnand %p5606_p11, %p5747_p5 }
 0x29a   : > { %p5612_p2 = por %p5611_p1, %p5610_p0 }
 0x29b   : > { %p5608_p13 = pneg %p5607_p12 }
 0x29c   : > { %p5614_p4 = por %p5613_p3, %p5612_p2 }
 0x29e   : > { %p5615_p6 = pnand %p5614_p4, %p5608_p13 }
 0x2a0   : > { %5618 = shalt.err (!%p5615_p6)
}
 0x2a1   : > { %s5672_s24 = smov 128   ;;  %s5673_s25 = smov 8  }
 0x2a2   : > { %5506 = dma.vmem_to_hbm [thread:$0]  (%p5747_p5), %s9406_s17, 16384, %s9404_s27, %s4673_s21, %s5672_s24, %s5672_s24, %s5673_s25  }
 0x2a3 PF: > { %s4704_s30 = sand.u32 1, %s5649_s18   ;;  %p5509_p7 = pnand %p4800_p10, %p5758_p9 }
 0x2a4   : > { %s4705_s8 = scalar_lea.sflag [#allocation9], %s4704_s30 }
 0x2a5   : > { %5644 = dma.done.wait (!%p5509_p7), %s4705_s8, 16384  }
 0x2a6   : > { %5646 = vsyncadd (!%p5509_p7), %s4705_s8, 4294950912  ;;  %s18_s23 = sadd.s32 1, %s5669_s23   ;;  %s9467_s18 = smov %s5653_s19 }
 0x2a7   : > { %p15_p8 = scmp.ge.s32.totalorder %s18_s23, 4   ;;  %s9468_s19 = smov %s5657_s20 }
 0x2a8   : > { %s9469_s20 = smov %s5756_s6  ;;  %s9470_s21 = smov %s5665_s22 }
 0x2a9   : > { %s9471_s22 = smov %s9473_s26  ;;  %17 = sbr.rel (!%p15_p8) target bundleno = 4 (0x4), region = 242 }
 0x2b0   :  { %4710 = vsyncpa [#allocation9], 1 }
 0x2b1   :  { %4712 = vsyncpa [#allocation9 + $0x1], 1 }

</bundles_post_ra>
